<compile_context>
chip_gen: v5e
topology: v5e:2x2
jax: 0.10.0
libtpu: 0.0.40
codegen_flags: <defaults>
</compile_context>

<pallas_src>
import functools
import re

import jax
import jax.numpy as jnp
from jax.experimental import pallas as pl
from jax.experimental.pallas import tpu as pltpu


# ----------------------------- helpers ---------------------------------------


def _layer_norm(v, g, b, eps=1e-5):
    mu = jnp.mean(v, axis=-1, keepdims=True)
    var = jnp.mean((v - mu) ** 2, axis=-1, keepdims=True)
    return (v - mu) * jax.lax.rsqrt(var + eps) * g + b


def _tpu_generation():
    """Best-effort TPU generation (5/6/7); 0 if unknown."""
    try:
        kind = jax.devices()[0].device_kind
        m = re.search(r"(\d+)", kind)
        if m:
            return int(m.group(1))
    except Exception:
        pass
    return 0


def _vmem_capacity_bytes():
    try:
        return int(pltpu.get_tpu_info().vmem_capacity_bytes)
    except Exception:
        return (64 if _tpu_generation() >= 7 else 128) * 1024 * 1024


def _vmem_limit_bytes(S, D, F, H, dh, TQ, ffn_chunk, save_attn):
    f32, bf16 = 4, 2
    weights = (4 * D * D + 2 * D * F) * bf16          # single-buffered (Buffered(1))
    consts = (8 * D + 3 * H * dh + F) * f32           # biases + LN params
    io = 2 * (S * D + S + TQ * D) * f32               # double-buffered x / bias / out
    if save_attn:
        io += 2 * H * TQ * S * bf16                   # bf16 attention-pattern tile
    scratch = 2 * H * S * dh * bf16                   # persistent K/V scratch
    live = (2 * S * D + 8 * TQ * D + 4 * H * TQ * S   # scores/softmax + activations
            + 3 * H * TQ * dh + 3 * TQ * ffn_chunk) * f32
    total = int((weights + consts + io + scratch + live) * 1.25) + (2 << 20)
    cap = int(_vmem_capacity_bytes() * 0.8)           # chip-aware ceiling (v7x = 64 MiB)
    return max(min(total, cap), min(32 << 20, cap))


# ----------------------------- kernels ----------------------------------------


def encoder_block_kernel(
    x_ref, bias_ref,
    g1_ref, b1_ref,
    wq_ref, bq_ref, wk_ref, bk_ref, wv_ref, bv_ref,
    wo_ref, bo_ref,
    g2_ref, b2_ref,
    w1_ref, bf1_ref, w2_ref, bf2_ref,
    g3_ref, b3_ref,
    out_ref, *rest,
    num_heads, q_tile, ffn_chunk, final_norm, save_attn, gelu_bf16,
):
    if save_attn:
        attn_ref, k_scr, v_scr = rest
    else:
        attn_ref = None
        k_scr, v_scr = rest

    S, D = x_ref.shape[1], x_ref.shape[2]
    H, TQ = num_heads, q_tile
    dh = D // H
    F = w1_ref.shape[1]
    scale = 1.0 / (dh ** 0.5)
    bf16, f32 = jnp.bfloat16, jnp.float32

    # Hoisted parameter / bias loads (materialized once per invocation).
    g1, b1 = g1_ref[...], b1_ref[...]
    g2, b2 = g2_ref[...], b2_ref[...]
    bq_hm, bk_hm, bv_hm = bq_ref[...], bk_ref[...], bv_ref[...]   # (H, 1, dh)
    bo = bo_ref[...]                                              # (1, D)
    bias = bias_ref[0]                                            # (1, S) additive mask

    # --- K/V hoist: once per batch element, persists in scratch across q tiles
    @pl.when(pl.program_id(1) == 0)
    def _():
        hb_full = _layer_norm(x_ref[0], g1, b1).astype(bf16)      # (S, D)
        for h in range(H):                                        # head-major weights:
            kh = jnp.dot(hb_full, wk_ref[h],                      #   no lane slicing
                         preferred_element_type=f32) + bk_hm[h]
            vh = jnp.dot(hb_full, wv_ref[h],
                         preferred_element_type=f32) + bv_hm[h]
            k_scr[h] = kh.astype(bf16)                            # (S, dh)
            v_scr[h] = vh.astype(bf16)                            # (S, dh)

    # --- per-query-tile work --------------------------------------------------
    if TQ == S:                                                   # single tile (static)
        x_q = x_ref[0]
    else:
        r0 = pl.multiple_of(pl.program_id(1) * TQ, TQ)
        x_q = x_ref[0, pl.ds(r0, TQ), :]
    hb_q = _layer_norm(x_q, g1, b1).astype(bf16)                  # (TQ, D)

    # Per-head Q projection (full-D contraction), stacked along the major axis.
    q_heads = []
    for h in range(H):
        qh = jnp.dot(hb_q, wq_ref[h], preferred_element_type=f32) + bq_hm[h]
        q_heads.append((qh * scale).astype(bf16))
    q3 = jnp.stack(q_heads, axis=0)                               # (H, TQ, dh)

    # Head-batched scores / softmax / context (flash-style einsum pattern).
    s = jnp.einsum('hqd,hkd->hqk', q3, k_scr[...],
                   preferred_element_type=f32)                    # (H, TQ, S)
    s = s + bias                                                  # additive pad mask
    s = s - jnp.max(s, axis=-1, keepdims=True)
    e = jnp.exp(s)
    p = e * pl.reciprocal(jnp.sum(e, axis=-1, keepdims=True), approx=True)

    if save_attn:                                                 # bf16 writeback
        attn_ref[0] = p.astype(attn_ref.dtype)

    ctx = jnp.einsum('hqk,hkd->hqd', p.astype(bf16), v_scr[...],
                     preferred_element_type=f32)                  # (H, TQ, dh)
    ctx = ctx.astype(bf16)

    # Output projection: accumulate per head against head-major Wo
    # (concat_h(ctx_h) @ Wo == sum_h ctx_h @ Wo[h]; avoids the merge-heads
    # lane relayout and the (H, TQ, D) materialization + reduce).
    acc = bo
    for h in range(H):
        acc = acc + jnp.dot(ctx[h], wo_ref[h], preferred_element_type=f32)
    x1 = x_q + acc            # dropout1 == identity at inference

    # --- norm2 + FFN ------------------------------------------------------------
    # TODO(synk): reference FFN body is not given; GELU (BERT convention) assumed.
    h2 = _layer_norm(x1, g2, b2).astype(bf16)
    n_chunks = F // ffn_chunk
    facc = None
    for c in range(n_chunks):                                     # F-dim chunking
        c0 = c * ffn_chunk
        fc = (jnp.dot(h2, w1_ref[:, c0:c0 + ffn_chunk],
                      preferred_element_type=f32)
              + bf1_ref[:, c0:c0 + ffn_chunk])
        if gelu_bf16:                                             # bf16 VPU/EUP (v6e/v7x)
            fc = jax.nn.gelu(fc.astype(bf16))
        else:                                                     # f32 path (v5e)
            fc = jax.nn.gelu(fc).astype(bf16)
        oc = jnp.dot(fc, w2_ref[c0:c0 + ffn_chunk, :], preferred_element_type=f32)
        facc = oc if facc is None else facc + oc
    y = x1 + facc + bf2_ref[...]                                  # dropout2 == identity

    if final_norm:            # fused Encoder.norm_out on the last block
        y = _layer_norm(y, g3_ref[...], b3_ref[...])
    out_ref[0] = y


def layernorm_kernel(x_ref, g_ref, b_ref, o_ref):
    # Fallback only (used when there are zero encoder blocks).
    o_ref[0] = _layer_norm(x_ref[0], g_ref[...], b_ref[...])


# ----------------------------- wrappers ----------------------------------------


def run_encoder_block(x, attn_bias, p, norm_out_g, norm_out_b, num_heads, *,
                      final_norm=False, save_attn=False, q_tile=None, ffn_chunk=None):
    B, S, D = x.shape
    F = p["w1"].shape[1]
    H = num_heads
    dh = D // H
    gen = _tpu_generation()

    if q_tile is None:
        if gen == 6 and S % 256 == 0:
            q_tile = 256          # v6e: 256-wide MXU, 128 MiB VMEM
        elif S % 128 == 0 and S >= 128:
            q_tile = 128          # v5e / v7x default
        else:
            q_tile = S
    assert S % q_tile == 0, "seq_len must be divisible by the query tile"
    n_q = S // q_tile

    if ffn_chunk is None:
        ffn_chunk = 2048 if (gen >= 7 and F % 2048 == 0) else F   # v7x: 64 MiB VMEM
    assert F % ffn_chunk == 0

    # Head-major weight / bias layouts (wrapper-side; kernel never lane-slices).
    wq_r = p["wq"].reshape(D, H, dh).transpose(1, 0, 2)   # (H, D, dh)
    wk_r = p["wk"].reshape(D, H, dh).transpose(1, 0, 2)
    wv_r = p["wv"].reshape(D, H, dh).transpose(1, 0, 2)
    wo_r = p["wo"].reshape(H, dh, D)                      # (H, dh, D)
    bq_r = p["bq"].reshape(1, H, dh).transpose(1, 0, 2)   # (H, 1, dh)
    bk_r = p["bk"].reshape(1, H, dh).transpose(1, 0, 2)
    bv_r = p["bv"].reshape(1, H, dh).transpose(1, 0, 2)

    def _invariant_spec(shape, single_buffer):
        nd = len(shape)
        idx = lambda b, q, _nd=nd: (0,) * _nd
        if single_buffer:
            try:
                # Grid-invariant weights: single-buffer (halves VMEM footprint).
                return pl.BlockSpec(shape, idx, pipeline_mode=pl.Buffered(1))
            except Exception:
                pass
        return pl.BlockSpec(shape, idx)

    def _build_and_call(single_buffer):
        inv = lambda shape: _invariant_spec(shape, single_buffer)
        in_specs = [
            pl.BlockSpec((1, S, D), lambda b, q: (b, 0, 0)),      # x (full seq for K/V)
            pl.BlockSpec((1, 1, S), lambda b, q: (b, 0, 0)),      # additive attention bias
            inv((1, D)), inv((1, D)),                             # norm1 gamma/beta
            inv((H, D, dh)), inv((H, 1, dh)),                     # Wq, bq (head-major)
            inv((H, D, dh)), inv((H, 1, dh)),                     # Wk, bk
            inv((H, D, dh)), inv((H, 1, dh)),                     # Wv, bv
            inv((H, dh, D)), inv((1, D)),                         # Wo (head-major), bo
            inv((1, D)), inv((1, D)),                             # norm2 gamma/beta
            inv((D, F)), inv((1, F)),                             # FFN W1, b1
            inv((F, D)), inv((1, D)),                             # FFN W2, b2
            inv((1, D)), inv((1, D)),                             # fused norm_out gamma/beta
        ]
        out_specs = [pl.BlockSpec((1, q_tile, D), lambda b, q: (b, q, 0))]
        out_shape = [jax.ShapeDtypeStruct((B, S, D), jnp.float32)]
        if save_attn:
            out_specs.append(pl.BlockSpec((1, H, q_tile, S), lambda b, q: (b, 0, q, 0)))
            out_shape.append(jax.ShapeDtypeStruct((B, H, S, S), jnp.bfloat16))

        kernel = functools.partial(
            encoder_block_kernel, num_heads=H, q_tile=q_tile, ffn_chunk=ffn_chunk,
            final_norm=final_norm, save_attn=save_attn, gelu_bf16=(gen >= 6))

        return pl.pallas_call(
            kernel,
            grid=(B, n_q),
            in_specs=in_specs,
            out_specs=tuple(out_specs),
            out_shape=tuple(out_shape),
            scratch_shapes=[
                pltpu.VMEM((H, S, dh), jnp.bfloat16),   # K, persists across q tiles
                pltpu.VMEM((H, S, dh), jnp.bfloat16),   # V, persists across q tiles
            ],
            compiler_params=pltpu.CompilerParams(
                # batch carries megacore parallelism (v7x); q axis is "arbitrary"
                # because the K/V scratch persists across it.
                dimension_semantics=("parallel", "arbitrary"),
                vmem_limit_bytes=_vmem_limit_bytes(S, D, F, H, dh, q_tile,
                                                   ffn_chunk, save_attn)),
        )(
            x, attn_bias,
            p["g1"], p["b1"],
            wq_r, bq_r, wk_r, bk_r, wv_r, bv_r,
            wo_r, p["bo"],
            p["g2"], p["b2"],
            p["w1"], p["bf1"], p["w2"], p["bf2"],
            norm_out_g, norm_out_b,
        )

    try:
        outs = _build_and_call(single_buffer=True)
    except Exception:
        # Fallback for JAX builds where pl.Buffered(1) is rejected by the TPU pipeline.
        outs = _build_and_call(single_buffer=False)
    return outs[0], (outs[1] if save_attn else None)


def run_layernorm(x, g, b):
    B, S, D = x.shape
    return pl.pallas_call(
        layernorm_kernel,
        grid=(B,),
        in_specs=[
            pl.BlockSpec((1, S, D), lambda i: (i, 0, 0)),
            pl.BlockSpec((1, D), lambda i: (0, 0)),
            pl.BlockSpec((1, D), lambda i: (0, 0)),
        ],
        out_specs=pl.BlockSpec((1, S, D), lambda i: (i, 0, 0)),
        out_shape=jax.ShapeDtypeStruct((B, S, D), jnp.float32),
        compiler_params=pltpu.CompilerParams(dimension_semantics=("parallel",)),
    )(x, g, b)


def encoder_forward(tokens, seg, pad_mask, params, num_heads,
                    save_attn_pattern=False):
    """Matches Encoder.forward: returns (x, attn_patterns)."""
    B, S = tokens.shape
    # BERTEmbedding: token + position + segment embeddings (gather is glue JAX).
    x = (jnp.take(params["tok_emb"], tokens, axis=0)
         + params["pos_emb"][None, :S, :]
         + jnp.take(params["seg_emb"], seg, axis=0))
    # self.dropout: identity at inference.

    # Precompute an ADDITIVE attention mask once (0 = keep, -1e9 = masked).
    attn_bias = (pad_mask.astype(jnp.float32) - 1.0) * 1e9        # (B, 1, S)

    blocks = params["blocks"]
    n_blocks = len(blocks)
    attn_list = []
    for i, blk in enumerate(blocks):
        x, attn = run_encoder_block(
            x, attn_bias, blk,
            params["norm_out_g"], params["norm_out_b"], num_heads,
            final_norm=(i == n_blocks - 1),          # fuse Encoder.norm_out
            save_attn=save_attn_pattern)
        if save_attn_pattern:
            # attn_pattern[0].unsqueeze(0); cast the consumed slice back to f32.
            attn_list.append(attn[0].astype(jnp.float32)[None])

    if n_blocks == 0:
        x = run_layernorm(x, params["norm_out_g"], params["norm_out_b"])

    if attn_list:
        attn_patterns = jnp.concatenate(attn_list, axis=0)
    else:
        attn_patterns = jnp.zeros((0,), jnp.float32)
    return x, attn_patterns


# --------------------------- parameter init -------------------------------------


def init_encoder_params(key, vocab_size, max_len, num_blocks, d_model, d_ffn):
    ks = jax.random.split(key, 3 + num_blocks)
    params = {
        "tok_emb": 0.02 * jax.random.normal(ks[0], (vocab_size, d_model), jnp.float32),
        "pos_emb": 0.02 * jax.random.normal(ks[1], (max_len, d_model), jnp.float32),
        "seg_emb": 0.02 * jax.random.normal(ks[2], (2, d_model), jnp.float32),
        "norm_out_g": jnp.ones((1, d_model), jnp.float32),
        "norm_out_b": jnp.zeros((1, d_model), jnp.float32),
        "blocks": [],
    }
    bf16 = jnp.bfloat16
    for i in range(num_blocks):
        bk = jax.random.split(ks[3 + i], 6)
        blk = {
            "g1": jnp.ones((1, d_model), jnp.float32),
            "b1": jnp.zeros((1, d_model), jnp.float32),
            # weights stored in bf16 (MXU-native, half the HBM/VMEM traffic)
            "wq": (0.02 * jax.random.normal(bk[0], (d_model, d_model), jnp.float32)).astype(bf16),
            "bq": jnp.zeros((1, d_model), jnp.float32),
            "wk": (0.02 * jax.random.normal(bk[1], (d_model, d_model), jnp.float32)).astype(bf16),
            "bk": jnp.zeros((1, d_model), jnp.float32),
            "wv": (0.02 * jax.random.normal(bk[2], (d_model, d_model), jnp.float32)).astype(bf16),
            "bv": jnp.zeros((1, d_model), jnp.float32),
            "wo": (0.02 * jax.random.normal(bk[3], (d_model, d_model), jnp.float32)).astype(bf16),
            "bo": jnp.zeros((1, d_model), jnp.float32),
            "g2": jnp.ones((1, d_model), jnp.float32),
            "b2": jnp.zeros((1, d_model), jnp.float32),
            "w1": (0.02 * jax.random.normal(bk[4], (d_model, d_ffn), jnp.float32)).astype(bf16),
            "bf1": jnp.zeros((1, d_ffn), jnp.float32),
            "w2": (0.02 * jax.random.normal(bk[5], (d_ffn, d_model), jnp.float32)).astype(bf16),
            "bf2": jnp.zeros((1, d_model), jnp.float32),
        }
        params["blocks"].append(blk)
    return params


# --------------------------------- main ------------------------------------------


if __name__ == "__main__":
    # small shapes consistent with the module's forward
    B, S = 2, 8
    vocab_size, max_len = 50, 16
    num_blocks, d_model, d_ffn, num_heads = 2, 32, 64, 4

    key = jax.random.PRNGKey(0)
    kp, kx, ksg = jax.random.split(key, 3)
    params = init_encoder_params(kp, vocab_size, max_len, num_blocks, d_model, d_ffn)

    tokens = jax.random.randint(kx, (B, S), 0, vocab_size, dtype=jnp.int32)
    seg = jax.random.randint(ksg, (B, S), 0, 2, dtype=jnp.int32)
    lengths = jnp.array([S, 5], dtype=jnp.int32)
    pad_mask = (jnp.arange(S)[None, :] < lengths[:, None]).astype(jnp.float32)[:, None, :]  # (B,1,S)

    # With attention-pattern capture (emits the (B,H,S,S) bf16 output).
    out, attn_patterns = encoder_forward(
        tokens, seg, pad_mask, params, num_heads, save_attn_pattern=True)
    jax.block_until_ready(out)
    jax.block_until_ready(attn_patterns)
    assert out.shape == (B, S, d_model)
    assert attn_patterns.shape == (num_blocks, num_heads, S, S)

    # Fast path: no attention-pattern output compiled or written.
    out2, _ = encoder_forward(
        tokens, seg, pad_mask, params, num_heads, save_attn_pattern=False)
    jax.block_until_ready(out2)
    assert out2.shape == (B, S, d_model)

    # TODO(synk): dropout layers are identity (inference mode).
    print("KERNEL_OK")
</pallas_src>

<mosaic_0001>
module attributes {stable_mosaic.version = 11 : i64} {
  func.func @encoder_block_kernel(%arg0: i32, %arg1: i32, %arg2: memref<1x8x32xf32, #tpu.memory_space<vmem>>, %arg3: memref<1x1x8xf32, #tpu.memory_space<vmem>>, %arg4: memref<1x32xf32, #tpu.memory_space<vmem>>, %arg5: memref<1x32xf32, #tpu.memory_space<vmem>>, %arg6: memref<4x32x8xbf16, #tpu.memory_space<vmem>>, %arg7: memref<4x1x8xf32, #tpu.memory_space<vmem>>, %arg8: memref<4x32x8xbf16, #tpu.memory_space<vmem>>, %arg9: memref<4x1x8xf32, #tpu.memory_space<vmem>>, %arg10: memref<4x32x8xbf16, #tpu.memory_space<vmem>>, %arg11: memref<4x1x8xf32, #tpu.memory_space<vmem>>, %arg12: memref<4x8x32xbf16, #tpu.memory_space<vmem>>, %arg13: memref<1x32xf32, #tpu.memory_space<vmem>>, %arg14: memref<1x32xf32, #tpu.memory_space<vmem>>, %arg15: memref<1x32xf32, #tpu.memory_space<vmem>>, %arg16: memref<32x64xbf16, #tpu.memory_space<vmem>>, %arg17: memref<1x64xf32, #tpu.memory_space<vmem>>, %arg18: memref<64x32xbf16, #tpu.memory_space<vmem>>, %arg19: memref<1x32xf32, #tpu.memory_space<vmem>>, %arg20: memref<1x32xf32, #tpu.memory_space<vmem>>, %arg21: memref<1x32xf32, #tpu.memory_space<vmem>>, %arg22: memref<1x8x32xf32, #tpu.memory_space<vmem>>, %arg23: memref<1x4x8x8xbf16, #tpu.memory_space<vmem>>, %arg24: memref<4x8x8xbf16, #tpu.memory_space<vmem>>, %arg25: memref<4x8x8xbf16, #tpu.memory_space<vmem>>) attributes {dimension_semantics = [#tpu.dimension_semantics<parallel>, #tpu.dimension_semantics<arbitrary>], iteration_bounds = array<i64: 2, 1>, scalar_prefetch = 0 : i64, scratch_operands = 2 : i64, tpu.core_type = #tpu.core_type<tc>, window_params = [{transform_indices = @transform_0, window_bounds = array<i64: 1, 8, 32>}, {transform_indices = @transform_1, window_bounds = array<i64: 1, 1, 8>}, {pipeline_mode = #tpu.pipeline_mode<synchronous>, transform_indices = @transform_2, window_bounds = array<i64: 1, 32>}, {pipeline_mode = #tpu.pipeline_mode<synchronous>, transform_indices = @transform_3, window_bounds = array<i64: 1, 32>}, {pipeline_mode = #tpu.pipeline_mode<synchronous>, transform_indices = @transform_4, window_bounds = array<i64: 4, 32, 8>}, {pipeline_mode = #tpu.pipeline_mode<synchronous>, transform_indices = @transform_5, window_bounds = array<i64: 4, 1, 8>}, {pipeline_mode = #tpu.pipeline_mode<synchronous>, transform_indices = @transform_6, window_bounds = array<i64: 4, 32, 8>}, {pipeline_mode = #tpu.pipeline_mode<synchronous>, transform_indices = @transform_7, window_bounds = array<i64: 4, 1, 8>}, {pipeline_mode = #tpu.pipeline_mode<synchronous>, transform_indices = @transform_8, window_bounds = array<i64: 4, 32, 8>}, {pipeline_mode = #tpu.pipeline_mode<synchronous>, transform_indices = @transform_9, window_bounds = array<i64: 4, 1, 8>}, {pipeline_mode = #tpu.pipeline_mode<synchronous>, transform_indices = @transform_10, window_bounds = array<i64: 4, 8, 32>}, {pipeline_mode = #tpu.pipeline_mode<synchronous>, transform_indices = @transform_11, window_bounds = array<i64: 1, 32>}, {pipeline_mode = #tpu.pipeline_mode<synchronous>, transform_indices = @transform_12, window_bounds = array<i64: 1, 32>}, {pipeline_mode = #tpu.pipeline_mode<synchronous>, transform_indices = @transform_13, window_bounds = array<i64: 1, 32>}, {pipeline_mode = #tpu.pipeline_mode<synchronous>, transform_indices = @transform_14, window_bounds = array<i64: 32, 64>}, {pipeline_mode = #tpu.pipeline_mode<synchronous>, transform_indices = @transform_15, window_bounds = array<i64: 1, 64>}, {pipeline_mode = #tpu.pipeline_mode<synchronous>, transform_indices = @transform_16, window_bounds = array<i64: 64, 32>}, {pipeline_mode = #tpu.pipeline_mode<synchronous>, transform_indices = @transform_17, window_bounds = array<i64: 1, 32>}, {pipeline_mode = #tpu.pipeline_mode<synchronous>, transform_indices = @transform_18, window_bounds = array<i64: 1, 32>}, {pipeline_mode = #tpu.pipeline_mode<synchronous>, transform_indices = @transform_19, window_bounds = array<i64: 1, 32>}, {transform_indices = @transform_20, window_bounds = array<i64: 1, 8, 32>}, {transform_indices = @transform_21, window_bounds = array<i64: 1, 4, 8, 8>}]} {
    %c0 = arith.constant 0 : index
    %c0_0 = arith.constant 0 : index
    %0 = vector.load %arg4[%c0, %c0_0] : memref<1x32xf32, #tpu.memory_space<vmem>>, vector<1x32xf32>
    %c0_1 = arith.constant 0 : index
    %c0_2 = arith.constant 0 : index
    %1 = vector.load %arg5[%c0_1, %c0_2] : memref<1x32xf32, #tpu.memory_space<vmem>>, vector<1x32xf32>
    %c0_3 = arith.constant 0 : index
    %c0_4 = arith.constant 0 : index
    %2 = vector.load %arg14[%c0_3, %c0_4] : memref<1x32xf32, #tpu.memory_space<vmem>>, vector<1x32xf32>
    %c0_5 = arith.constant 0 : index
    %c0_6 = arith.constant 0 : index
    %3 = vector.load %arg15[%c0_5, %c0_6] : memref<1x32xf32, #tpu.memory_space<vmem>>, vector<1x32xf32>
    %c0_7 = arith.constant 0 : index
    %c0_8 = arith.constant 0 : index
    %c0_9 = arith.constant 0 : index
    %4 = vector.load %arg7[%c0_7, %c0_8, %c0_9] : memref<4x1x8xf32, #tpu.memory_space<vmem>>, vector<4x1x8xf32>
    %c0_10 = arith.constant 0 : index
    %c0_11 = arith.constant 0 : index
    %c0_12 = arith.constant 0 : index
    %5 = vector.load %arg9[%c0_10, %c0_11, %c0_12] : memref<4x1x8xf32, #tpu.memory_space<vmem>>, vector<4x1x8xf32>
    %c0_13 = arith.constant 0 : index
    %c0_14 = arith.constant 0 : index
    %c0_15 = arith.constant 0 : index
    %6 = vector.load %arg11[%c0_13, %c0_14, %c0_15] : memref<4x1x8xf32, #tpu.memory_space<vmem>>, vector<4x1x8xf32>
    %c0_16 = arith.constant 0 : index
    %c0_17 = arith.constant 0 : index
    %7 = vector.load %arg13[%c0_16, %c0_17] : memref<1x32xf32, #tpu.memory_space<vmem>>, vector<1x32xf32>
    %c0_18 = arith.constant 0 : index
    %c0_19 = arith.constant 0 : index
    %c0_20 = arith.constant 0 : index
    %8 = vector.load %arg3[%c0_18, %c0_19, %c0_20] : memref<1x1x8xf32, #tpu.memory_space<vmem>>, vector<1x1x8xf32>
    %9 = vector.shape_cast %8 : vector<1x1x8xf32> to vector<1x8xf32>
    %c0_i32 = arith.constant 0 : i32
    %10 = arith.cmpi eq, %arg1, %c0_i32 : i32
    %11 = arith.extui %10 : i1 to i32
    %c0_i32_21 = arith.constant 0 : i32
    %12 = arith.cmpi ne, %11, %c0_i32_21 : i32
    scf.if %12 {
      %c0_98 = arith.constant 0 : index
      %c0_99 = arith.constant 0 : index
      %c0_100 = arith.constant 0 : index
      %183 = vector.load %arg2[%c0_98, %c0_99, %c0_100] : memref<1x8x32xf32, #tpu.memory_space<vmem>>, vector<1x8x32xf32>
      %184 = vector.shape_cast %183 : vector<1x8x32xf32> to vector<8x32xf32>
      %cst_101 = arith.constant dense<0.000000e+00> : vector<8xf32>
      %185 = vector.multi_reduction <add>, %184, %cst_101 [1] : vector<8x32xf32> to vector<8xf32>
      %186 = vector.shape_cast %185 : vector<8xf32> to vector<8x1xf32>
      %cst_102 = arith.constant 3.200000e+01 : f32
      %187 = vector.broadcast %cst_102 : f32 to vector<8x1xf32>
      %188 = arith.divf %186, %187 : vector<8x1xf32>
      %189 = vector.broadcast %188 : vector<8x1xf32> to vector<8x32xf32>
      %190 = arith.subf %184, %189 : vector<8x32xf32>
      %191 = arith.mulf %190, %190 : vector<8x32xf32>
      %cst_103 = arith.constant dense<0.000000e+00> : vector<8xf32>
      %192 = vector.multi_reduction <add>, %191, %cst_103 [1] : vector<8x32xf32> to vector<8xf32>
      %193 = vector.shape_cast %192 : vector<8xf32> to vector<8x1xf32>
      %cst_104 = arith.constant 3.200000e+01 : f32
      %194 = vector.broadcast %cst_104 : f32 to vector<8x1xf32>
      %195 = arith.divf %193, %194 : vector<8x1xf32>
      %196 = vector.broadcast %188 : vector<8x1xf32> to vector<8x32xf32>
      %197 = arith.subf %184, %196 : vector<8x32xf32>
      %cst_105 = arith.constant 9.99999974E-6 : f32
      %198 = vector.broadcast %cst_105 : f32 to vector<8x1xf32>
      %199 = arith.addf %195, %198 : vector<8x1xf32>
      %200 = math.rsqrt %199 : vector<8x1xf32>
      %201 = vector.broadcast %200 : vector<8x1xf32> to vector<8x32xf32>
      %202 = arith.mulf %197, %201 : vector<8x32xf32>
      %203 = vector.broadcast %0 : vector<1x32xf32> to vector<8x32xf32>
      %204 = arith.mulf %202, %203 : vector<8x32xf32>
      %205 = vector.broadcast %1 : vector<1x32xf32> to vector<8x32xf32>
      %206 = arith.addf %204, %205 : vector<8x32xf32>
      %207 = arith.truncf %206 : vector<8x32xf32> to vector<8x32xbf16>
      %c0_106 = arith.constant 0 : index
      %c0_107 = arith.constant 0 : index
      %c0_108 = arith.constant 0 : index
      %208 = vector.load %arg8[%c0_106, %c0_107, %c0_108] : memref<4x32x8xbf16, #tpu.memory_space<vmem>>, vector<1x32x8xbf16>
      %209 = vector.shape_cast %208 : vector<1x32x8xbf16> to vector<32x8xbf16>
      %cst_109 = arith.constant dense<0.000000e+00> : vector<8x8xf32>
      %210 = tpu.matmul %207, %209, %cst_109 {dimension_numbers = #tpu.dot_dimension_numbers<[1], [0], [0], [1], [0, 0, 1, 1], [], []>} : vector<8x32xbf16>, vector<32x8xbf16>, vector<8x8xf32> -> vector<8x8xf32>
      %211 = vector.extract_strided_slice %5 {offsets = [0, 0, 0], sizes = [1, 1, 8], strides = [1, 1, 1]} : vector<4x1x8xf32> to vector<1x1x8xf32>
      %212 = vector.shape_cast %211 : vector<1x1x8xf32> to vector<1x8xf32>
      %213 = vector.broadcast %212 : vector<1x8xf32> to vector<8x8xf32>
      %214 = arith.addf %210, %213 : vector<8x8xf32>
      %c0_110 = arith.constant 0 : index
      %c0_111 = arith.constant 0 : index
      %c0_112 = arith.constant 0 : index
      %215 = vector.load %arg10[%c0_110, %c0_111, %c0_112] : memref<4x32x8xbf16, #tpu.memory_space<vmem>>, vector<1x32x8xbf16>
      %216 = vector.shape_cast %215 : vector<1x32x8xbf16> to vector<32x8xbf16>
      %cst_113 = arith.constant dense<0.000000e+00> : vector<8x8xf32>
      %217 = tpu.matmul %207, %216, %cst_113 {dimension_numbers = #tpu.dot_dimension_numbers<[1], [0], [0], [1], [0, 0, 1, 1], [], []>} : vector<8x32xbf16>, vector<32x8xbf16>, vector<8x8xf32> -> vector<8x8xf32>
      %218 = vector.extract_strided_slice %6 {offsets = [0, 0, 0], sizes = [1, 1, 8], strides = [1, 1, 1]} : vector<4x1x8xf32> to vector<1x1x8xf32>
      %219 = vector.shape_cast %218 : vector<1x1x8xf32> to vector<1x8xf32>
      %220 = vector.broadcast %219 : vector<1x8xf32> to vector<8x8xf32>
      %221 = arith.addf %217, %220 : vector<8x8xf32>
      %222 = arith.truncf %214 : vector<8x8xf32> to vector<8x8xbf16>
      %c0_114 = arith.constant 0 : index
      %c0_115 = arith.constant 0 : index
      %c0_116 = arith.constant 0 : index
      %223 = vector.load %arg24[%c0_114, %c0_115, %c0_116] : memref<4x8x8xbf16, #tpu.memory_space<vmem>>, vector<1x8x8xbf16>
      %224 = vector.shape_cast %223 : vector<1x8x8xbf16> to vector<8x8xbf16>
      %225 = vector.shape_cast %222 : vector<8x8xbf16> to vector<1x8x8xbf16>
      tpu.vector_store %arg24[%c0_114, %c0_115, %c0_116], %225 {strides = array<i32>} : memref<4x8x8xbf16, #tpu.memory_space<vmem>>, vector<1x8x8xbf16>,
      %226 = arith.truncf %221 : vector<8x8xf32> to vector<8x8xbf16>
      %c0_117 = arith.constant 0 : index
      %c0_118 = arith.constant 0 : index
      %c0_119 = arith.constant 0 : index
      %227 = vector.load %arg25[%c0_117, %c0_118, %c0_119] : memref<4x8x8xbf16, #tpu.memory_space<vmem>>, vector<1x8x8xbf16>
      %228 = vector.shape_cast %227 : vector<1x8x8xbf16> to vector<8x8xbf16>
      %229 = vector.shape_cast %226 : vector<8x8xbf16> to vector<1x8x8xbf16>
      tpu.vector_store %arg25[%c0_117, %c0_118, %c0_119], %229 {strides = array<i32>} : memref<4x8x8xbf16, #tpu.memory_space<vmem>>, vector<1x8x8xbf16>,
      %c1_120 = arith.constant 1 : index
      %c0_121 = arith.constant 0 : index
      %c0_122 = arith.constant 0 : index
      %230 = vector.load %arg8[%c1_120, %c0_121, %c0_122] : memref<4x32x8xbf16, #tpu.memory_space<vmem>>, vector<1x32x8xbf16>
      %231 = vector.shape_cast %230 : vector<1x32x8xbf16> to vector<32x8xbf16>
      %cst_123 = arith.constant dense<0.000000e+00> : vector<8x8xf32>
      %232 = tpu.matmul %207, %231, %cst_123 {dimension_numbers = #tpu.dot_dimension_numbers<[1], [0], [0], [1], [0, 0, 1, 1], [], []>} : vector<8x32xbf16>, vector<32x8xbf16>, vector<8x8xf32> -> vector<8x8xf32>
      %233 = vector.extract_strided_slice %5 {offsets = [1, 0, 0], sizes = [1, 1, 8], strides = [1, 1, 1]} : vector<4x1x8xf32> to vector<1x1x8xf32>
      %234 = vector.shape_cast %233 : vector<1x1x8xf32> to vector<1x8xf32>
      %235 = vector.broadcast %234 : vector<1x8xf32> to vector<8x8xf32>
      %236 = arith.addf %232, %235 : vector<8x8xf32>
      %c1_124 = arith.constant 1 : index
      %c0_125 = arith.constant 0 : index
      %c0_126 = arith.constant 0 : index
      %237 = vector.load %arg10[%c1_124, %c0_125, %c0_126] : memref<4x32x8xbf16, #tpu.memory_space<vmem>>, vector<1x32x8xbf16>
      %238 = vector.shape_cast %237 : vector<1x32x8xbf16> to vector<32x8xbf16>
      %cst_127 = arith.constant dense<0.000000e+00> : vector<8x8xf32>
      %239 = tpu.matmul %207, %238, %cst_127 {dimension_numbers = #tpu.dot_dimension_numbers<[1], [0], [0], [1], [0, 0, 1, 1], [], []>} : vector<8x32xbf16>, vector<32x8xbf16>, vector<8x8xf32> -> vector<8x8xf32>
      %240 = vector.extract_strided_slice %6 {offsets = [1, 0, 0], sizes = [1, 1, 8], strides = [1, 1, 1]} : vector<4x1x8xf32> to vector<1x1x8xf32>
      %241 = vector.shape_cast %240 : vector<1x1x8xf32> to vector<1x8xf32>
      %242 = vector.broadcast %241 : vector<1x8xf32> to vector<8x8xf32>
      %243 = arith.addf %239, %242 : vector<8x8xf32>
      %244 = arith.truncf %236 : vector<8x8xf32> to vector<8x8xbf16>
      %c1_128 = arith.constant 1 : index
      %c0_129 = arith.constant 0 : index
      %c0_130 = arith.constant 0 : index
      %245 = vector.load %arg24[%c1_128, %c0_129, %c0_130] : memref<4x8x8xbf16, #tpu.memory_space<vmem>>, vector<1x8x8xbf16>
      %246 = vector.shape_cast %245 : vector<1x8x8xbf16> to vector<8x8xbf16>
      %247 = vector.shape_cast %244 : vector<8x8xbf16> to vector<1x8x8xbf16>
      tpu.vector_store %arg24[%c1_128, %c0_129, %c0_130], %247 {strides = array<i32>} : memref<4x8x8xbf16, #tpu.memory_space<vmem>>, vector<1x8x8xbf16>,
      %248 = arith.truncf %243 : vector<8x8xf32> to vector<8x8xbf16>
      %c1_131 = arith.constant 1 : index
      %c0_132 = arith.constant 0 : index
      %c0_133 = arith.constant 0 : index
      %249 = vector.load %arg25[%c1_131, %c0_132, %c0_133] : memref<4x8x8xbf16, #tpu.memory_space<vmem>>, vector<1x8x8xbf16>
      %250 = vector.shape_cast %249 : vector<1x8x8xbf16> to vector<8x8xbf16>
      %251 = vector.shape_cast %248 : vector<8x8xbf16> to vector<1x8x8xbf16>
      tpu.vector_store %arg25[%c1_131, %c0_132, %c0_133], %251 {strides = array<i32>} : memref<4x8x8xbf16, #tpu.memory_space<vmem>>, vector<1x8x8xbf16>,
      %c2_134 = arith.constant 2 : index
      %c0_135 = arith.constant 0 : index
      %c0_136 = arith.constant 0 : index
      %252 = vector.load %arg8[%c2_134, %c0_135, %c0_136] : memref<4x32x8xbf16, #tpu.memory_space<vmem>>, vector<1x32x8xbf16>
      %253 = vector.shape_cast %252 : vector<1x32x8xbf16> to vector<32x8xbf16>
      %cst_137 = arith.constant dense<0.000000e+00> : vector<8x8xf32>
      %254 = tpu.matmul %207, %253, %cst_137 {dimension_numbers = #tpu.dot_dimension_numbers<[1], [0], [0], [1], [0, 0, 1, 1], [], []>} : vector<8x32xbf16>, vector<32x8xbf16>, vector<8x8xf32> -> vector<8x8xf32>
      %255 = vector.extract_strided_slice %5 {offsets = [2, 0, 0], sizes = [1, 1, 8], strides = [1, 1, 1]} : vector<4x1x8xf32> to vector<1x1x8xf32>
      %256 = vector.shape_cast %255 : vector<1x1x8xf32> to vector<1x8xf32>
      %257 = vector.broadcast %256 : vector<1x8xf32> to vector<8x8xf32>
      %258 = arith.addf %254, %257 : vector<8x8xf32>
      %c2_138 = arith.constant 2 : index
      %c0_139 = arith.constant 0 : index
      %c0_140 = arith.constant 0 : index
      %259 = vector.load %arg10[%c2_138, %c0_139, %c0_140] : memref<4x32x8xbf16, #tpu.memory_space<vmem>>, vector<1x32x8xbf16>
      %260 = vector.shape_cast %259 : vector<1x32x8xbf16> to vector<32x8xbf16>
      %cst_141 = arith.constant dense<0.000000e+00> : vector<8x8xf32>
      %261 = tpu.matmul %207, %260, %cst_141 {dimension_numbers = #tpu.dot_dimension_numbers<[1], [0], [0], [1], [0, 0, 1, 1], [], []>} : vector<8x32xbf16>, vector<32x8xbf16>, vector<8x8xf32> -> vector<8x8xf32>
      %262 = vector.extract_strided_slice %6 {offsets = [2, 0, 0], sizes = [1, 1, 8], strides = [1, 1, 1]} : vector<4x1x8xf32> to vector<1x1x8xf32>
      %263 = vector.shape_cast %262 : vector<1x1x8xf32> to vector<1x8xf32>
      %264 = vector.broadcast %263 : vector<1x8xf32> to vector<8x8xf32>
      %265 = arith.addf %261, %264 : vector<8x8xf32>
      %266 = arith.truncf %258 : vector<8x8xf32> to vector<8x8xbf16>
      %c2_142 = arith.constant 2 : index
      %c0_143 = arith.constant 0 : index
      %c0_144 = arith.constant 0 : index
      %267 = vector.load %arg24[%c2_142, %c0_143, %c0_144] : memref<4x8x8xbf16, #tpu.memory_space<vmem>>, vector<1x8x8xbf16>
      %268 = vector.shape_cast %267 : vector<1x8x8xbf16> to vector<8x8xbf16>
      %269 = vector.shape_cast %266 : vector<8x8xbf16> to vector<1x8x8xbf16>
      tpu.vector_store %arg24[%c2_142, %c0_143, %c0_144], %269 {strides = array<i32>} : memref<4x8x8xbf16, #tpu.memory_space<vmem>>, vector<1x8x8xbf16>,
      %270 = arith.truncf %265 : vector<8x8xf32> to vector<8x8xbf16>
      %c2_145 = arith.constant 2 : index
      %c0_146 = arith.constant 0 : index
      %c0_147 = arith.constant 0 : index
      %271 = vector.load %arg25[%c2_145, %c0_146, %c0_147] : memref<4x8x8xbf16, #tpu.memory_space<vmem>>, vector<1x8x8xbf16>
      %272 = vector.shape_cast %271 : vector<1x8x8xbf16> to vector<8x8xbf16>
      %273 = vector.shape_cast %270 : vector<8x8xbf16> to vector<1x8x8xbf16>
      tpu.vector_store %arg25[%c2_145, %c0_146, %c0_147], %273 {strides = array<i32>} : memref<4x8x8xbf16, #tpu.memory_space<vmem>>, vector<1x8x8xbf16>,
      %c3_148 = arith.constant 3 : index
      %c0_149 = arith.constant 0 : index
      %c0_150 = arith.constant 0 : index
      %274 = vector.load %arg8[%c3_148, %c0_149, %c0_150] : memref<4x32x8xbf16, #tpu.memory_space<vmem>>, vector<1x32x8xbf16>
      %275 = vector.shape_cast %274 : vector<1x32x8xbf16> to vector<32x8xbf16>
      %cst_151 = arith.constant dense<0.000000e+00> : vector<8x8xf32>
      %276 = tpu.matmul %207, %275, %cst_151 {dimension_numbers = #tpu.dot_dimension_numbers<[1], [0], [0], [1], [0, 0, 1, 1], [], []>} : vector<8x32xbf16>, vector<32x8xbf16>, vector<8x8xf32> -> vector<8x8xf32>
      %277 = vector.extract_strided_slice %5 {offsets = [3, 0, 0], sizes = [1, 1, 8], strides = [1, 1, 1]} : vector<4x1x8xf32> to vector<1x1x8xf32>
      %278 = vector.shape_cast %277 : vector<1x1x8xf32> to vector<1x8xf32>
      %279 = vector.broadcast %278 : vector<1x8xf32> to vector<8x8xf32>
      %280 = arith.addf %276, %279 : vector<8x8xf32>
      %c3_152 = arith.constant 3 : index
      %c0_153 = arith.constant 0 : index
      %c0_154 = arith.constant 0 : index
      %281 = vector.load %arg10[%c3_152, %c0_153, %c0_154] : memref<4x32x8xbf16, #tpu.memory_space<vmem>>, vector<1x32x8xbf16>
      %282 = vector.shape_cast %281 : vector<1x32x8xbf16> to vector<32x8xbf16>
      %cst_155 = arith.constant dense<0.000000e+00> : vector<8x8xf32>
      %283 = tpu.matmul %207, %282, %cst_155 {dimension_numbers = #tpu.dot_dimension_numbers<[1], [0], [0], [1], [0, 0, 1, 1], [], []>} : vector<8x32xbf16>, vector<32x8xbf16>, vector<8x8xf32> -> vector<8x8xf32>
      %284 = vector.extract_strided_slice %6 {offsets = [3, 0, 0], sizes = [1, 1, 8], strides = [1, 1, 1]} : vector<4x1x8xf32> to vector<1x1x8xf32>
      %285 = vector.shape_cast %284 : vector<1x1x8xf32> to vector<1x8xf32>
      %286 = vector.broadcast %285 : vector<1x8xf32> to vector<8x8xf32>
      %287 = arith.addf %283, %286 : vector<8x8xf32>
      %288 = arith.truncf %280 : vector<8x8xf32> to vector<8x8xbf16>
      %c3_156 = arith.constant 3 : index
      %c0_157 = arith.constant 0 : index
      %c0_158 = arith.constant 0 : index
      %289 = vector.load %arg24[%c3_156, %c0_157, %c0_158] : memref<4x8x8xbf16, #tpu.memory_space<vmem>>, vector<1x8x8xbf16>
      %290 = vector.shape_cast %289 : vector<1x8x8xbf16> to vector<8x8xbf16>
      %291 = vector.shape_cast %288 : vector<8x8xbf16> to vector<1x8x8xbf16>
      tpu.vector_store %arg24[%c3_156, %c0_157, %c0_158], %291 {strides = array<i32>} : memref<4x8x8xbf16, #tpu.memory_space<vmem>>, vector<1x8x8xbf16>,
      %292 = arith.truncf %287 : vector<8x8xf32> to vector<8x8xbf16>
      %c3_159 = arith.constant 3 : index
      %c0_160 = arith.constant 0 : index
      %c0_161 = arith.constant 0 : index
      %293 = vector.load %arg25[%c3_159, %c0_160, %c0_161] : memref<4x8x8xbf16, #tpu.memory_space<vmem>>, vector<1x8x8xbf16>
      %294 = vector.shape_cast %293 : vector<1x8x8xbf16> to vector<8x8xbf16>
      %295 = vector.shape_cast %292 : vector<8x8xbf16> to vector<1x8x8xbf16>
      tpu.vector_store %arg25[%c3_159, %c0_160, %c0_161], %295 {strides = array<i32>} : memref<4x8x8xbf16, #tpu.memory_space<vmem>>, vector<1x8x8xbf16>,
    } else {
    }
    %c0_22 = arith.constant 0 : index
    %c0_23 = arith.constant 0 : index
    %c0_24 = arith.constant 0 : index
    %13 = vector.load %arg2[%c0_22, %c0_23, %c0_24] : memref<1x8x32xf32, #tpu.memory_space<vmem>>, vector<1x8x32xf32>
    %14 = vector.shape_cast %13 : vector<1x8x32xf32> to vector<8x32xf32>
    %cst = arith.constant dense<0.000000e+00> : vector<8xf32>
    %15 = vector.multi_reduction <add>, %14, %cst [1] : vector<8x32xf32> to vector<8xf32>
    %16 = vector.shape_cast %15 : vector<8xf32> to vector<8x1xf32>
    %cst_25 = arith.constant 3.200000e+01 : f32
    %17 = vector.broadcast %cst_25 : f32 to vector<8x1xf32>
    %18 = arith.divf %16, %17 : vector<8x1xf32>
    %19 = vector.broadcast %18 : vector<8x1xf32> to vector<8x32xf32>
    %20 = arith.subf %14, %19 : vector<8x32xf32>
    %21 = arith.mulf %20, %20 : vector<8x32xf32>
    %cst_26 = arith.constant dense<0.000000e+00> : vector<8xf32>
    %22 = vector.multi_reduction <add>, %21, %cst_26 [1] : vector<8x32xf32> to vector<8xf32>
    %23 = vector.shape_cast %22 : vector<8xf32> to vector<8x1xf32>
    %cst_27 = arith.constant 3.200000e+01 : f32
    %24 = vector.broadcast %cst_27 : f32 to vector<8x1xf32>
    %25 = arith.divf %23, %24 : vector<8x1xf32>
    %26 = vector.broadcast %18 : vector<8x1xf32> to vector<8x32xf32>
    %27 = arith.subf %14, %26 : vector<8x32xf32>
    %cst_28 = arith.constant 9.99999974E-6 : f32
    %28 = vector.broadcast %cst_28 : f32 to vector<8x1xf32>
    %29 = arith.addf %25, %28 : vector<8x1xf32>
    %30 = math.rsqrt %29 : vector<8x1xf32>
    %31 = vector.broadcast %30 : vector<8x1xf32> to vector<8x32xf32>
    %32 = arith.mulf %27, %31 : vector<8x32xf32>
    %33 = vector.broadcast %0 : vector<1x32xf32> to vector<8x32xf32>
    %34 = arith.mulf %32, %33 : vector<8x32xf32>
    %35 = vector.broadcast %1 : vector<1x32xf32> to vector<8x32xf32>
    %36 = arith.addf %34, %35 : vector<8x32xf32>
    %37 = arith.truncf %36 : vector<8x32xf32> to vector<8x32xbf16>
    %c0_29 = arith.constant 0 : index
    %c0_30 = arith.constant 0 : index
    %c0_31 = arith.constant 0 : index
    %38 = vector.load %arg6[%c0_29, %c0_30, %c0_31] : memref<4x32x8xbf16, #tpu.memory_space<vmem>>, vector<1x32x8xbf16>
    %39 = vector.shape_cast %38 : vector<1x32x8xbf16> to vector<32x8xbf16>
    %cst_32 = arith.constant dense<0.000000e+00> : vector<8x8xf32>
    %40 = tpu.matmul %37, %39, %cst_32 {dimension_numbers = #tpu.dot_dimension_numbers<[1], [0], [0], [1], [0, 0, 1, 1], [], []>} : vector<8x32xbf16>, vector<32x8xbf16>, vector<8x8xf32> -> vector<8x8xf32>
    %41 = vector.extract_strided_slice %4 {offsets = [0, 0, 0], sizes = [1, 1, 8], strides = [1, 1, 1]} : vector<4x1x8xf32> to vector<1x1x8xf32>
    %42 = vector.shape_cast %41 : vector<1x1x8xf32> to vector<1x8xf32>
    %43 = vector.broadcast %42 : vector<1x8xf32> to vector<8x8xf32>
    %44 = arith.addf %40, %43 : vector<8x8xf32>
    %cst_33 = arith.constant 0.353553385 : f32
    %45 = vector.broadcast %cst_33 : f32 to vector<8x8xf32>
    %46 = arith.mulf %44, %45 : vector<8x8xf32>
    %47 = arith.truncf %46 : vector<8x8xf32> to vector<8x8xbf16>
    %c1 = arith.constant 1 : index
    %c0_34 = arith.constant 0 : index
    %c0_35 = arith.constant 0 : index
    %48 = vector.load %arg6[%c1, %c0_34, %c0_35] : memref<4x32x8xbf16, #tpu.memory_space<vmem>>, vector<1x32x8xbf16>
    %49 = vector.shape_cast %48 : vector<1x32x8xbf16> to vector<32x8xbf16>
    %cst_36 = arith.constant dense<0.000000e+00> : vector<8x8xf32>
    %50 = tpu.matmul %37, %49, %cst_36 {dimension_numbers = #tpu.dot_dimension_numbers<[1], [0], [0], [1], [0, 0, 1, 1], [], []>} : vector<8x32xbf16>, vector<32x8xbf16>, vector<8x8xf32> -> vector<8x8xf32>
    %51 = vector.extract_strided_slice %4 {offsets = [1, 0, 0], sizes = [1, 1, 8], strides = [1, 1, 1]} : vector<4x1x8xf32> to vector<1x1x8xf32>
    %52 = vector.shape_cast %51 : vector<1x1x8xf32> to vector<1x8xf32>
    %53 = vector.broadcast %52 : vector<1x8xf32> to vector<8x8xf32>
    %54 = arith.addf %50, %53 : vector<8x8xf32>
    %cst_37 = arith.constant 0.353553385 : f32
    %55 = vector.broadcast %cst_37 : f32 to vector<8x8xf32>
    %56 = arith.mulf %54, %55 : vector<8x8xf32>
    %57 = arith.truncf %56 : vector<8x8xf32> to vector<8x8xbf16>
    %c2 = arith.constant 2 : index
    %c0_38 = arith.constant 0 : index
    %c0_39 = arith.constant 0 : index
    %58 = vector.load %arg6[%c2, %c0_38, %c0_39] : memref<4x32x8xbf16, #tpu.memory_space<vmem>>, vector<1x32x8xbf16>
    %59 = vector.shape_cast %58 : vector<1x32x8xbf16> to vector<32x8xbf16>
    %cst_40 = arith.constant dense<0.000000e+00> : vector<8x8xf32>
    %60 = tpu.matmul %37, %59, %cst_40 {dimension_numbers = #tpu.dot_dimension_numbers<[1], [0], [0], [1], [0, 0, 1, 1], [], []>} : vector<8x32xbf16>, vector<32x8xbf16>, vector<8x8xf32> -> vector<8x8xf32>
    %61 = vector.extract_strided_slice %4 {offsets = [2, 0, 0], sizes = [1, 1, 8], strides = [1, 1, 1]} : vector<4x1x8xf32> to vector<1x1x8xf32>
    %62 = vector.shape_cast %61 : vector<1x1x8xf32> to vector<1x8xf32>
    %63 = vector.broadcast %62 : vector<1x8xf32> to vector<8x8xf32>
    %64 = arith.addf %60, %63 : vector<8x8xf32>
    %cst_41 = arith.constant 0.353553385 : f32
    %65 = vector.broadcast %cst_41 : f32 to vector<8x8xf32>
    %66 = arith.mulf %64, %65 : vector<8x8xf32>
    %67 = arith.truncf %66 : vector<8x8xf32> to vector<8x8xbf16>
    %c3 = arith.constant 3 : index
    %c0_42 = arith.constant 0 : index
    %c0_43 = arith.constant 0 : index
    %68 = vector.load %arg6[%c3, %c0_42, %c0_43] : memref<4x32x8xbf16, #tpu.memory_space<vmem>>, vector<1x32x8xbf16>
    %69 = vector.shape_cast %68 : vector<1x32x8xbf16> to vector<32x8xbf16>
    %cst_44 = arith.constant dense<0.000000e+00> : vector<8x8xf32>
    %70 = tpu.matmul %37, %69, %cst_44 {dimension_numbers = #tpu.dot_dimension_numbers<[1], [0], [0], [1], [0, 0, 1, 1], [], []>} : vector<8x32xbf16>, vector<32x8xbf16>, vector<8x8xf32> -> vector<8x8xf32>
    %71 = vector.extract_strided_slice %4 {offsets = [3, 0, 0], sizes = [1, 1, 8], strides = [1, 1, 1]} : vector<4x1x8xf32> to vector<1x1x8xf32>
    %72 = vector.shape_cast %71 : vector<1x1x8xf32> to vector<1x8xf32>
    %73 = vector.broadcast %72 : vector<1x8xf32> to vector<8x8xf32>
    %74 = arith.addf %70, %73 : vector<8x8xf32>
    %cst_45 = arith.constant 0.353553385 : f32
    %75 = vector.broadcast %cst_45 : f32 to vector<8x8xf32>
    %76 = arith.mulf %74, %75 : vector<8x8xf32>
    %77 = arith.truncf %76 : vector<8x8xf32> to vector<8x8xbf16>
    %78 = vector.shape_cast %47 : vector<8x8xbf16> to vector<1x8x8xbf16>
    %79 = vector.shape_cast %57 : vector<8x8xbf16> to vector<1x8x8xbf16>
    %80 = vector.shape_cast %67 : vector<8x8xbf16> to vector<1x8x8xbf16>
    %81 = vector.shape_cast %77 : vector<8x8xbf16> to vector<1x8x8xbf16>
    %82 = tpu.concatenate %78, %79, %80, %81 in 0 : vector<1x8x8xbf16>, vector<1x8x8xbf16>, vector<1x8x8xbf16>, vector<1x8x8xbf16> -> vector<4x8x8xbf16>
    %c0_46 = arith.constant 0 : index
    %c0_47 = arith.constant 0 : index
    %c0_48 = arith.constant 0 : index
    %83 = vector.load %arg24[%c0_46, %c0_47, %c0_48] : memref<4x8x8xbf16, #tpu.memory_space<vmem>>, vector<4x8x8xbf16>
    "tpu.trace_start"() <{level = 10 : i32, message = "hqd,hkd->hqk"}> : () -> ()
    %cst_49 = arith.constant dense<0.000000e+00> : vector<4x8x8xf32>
    %84 = tpu.matmul %82, %83, %cst_49 {dimension_numbers = #tpu.dot_dimension_numbers<[2], [2], [1], [1], [0, 0, 0, 1, 1, 1], [0], [0]>} : vector<4x8x8xbf16>, vector<4x8x8xbf16>, vector<4x8x8xf32> -> vector<4x8x8xf32>
    "tpu.trace_stop"() : () -> ()
    %85 = vector.shape_cast %9 : vector<1x8xf32> to vector<1x1x8xf32>
    %86 = vector.broadcast %85 : vector<1x1x8xf32> to vector<4x8x8xf32>
    %87 = arith.addf %84, %86 : vector<4x8x8xf32>
    %cst_50 = arith.constant dense<0xFF800000> : vector<4x8xf32>
    %88 = vector.multi_reduction <maximumf>, %87, %cst_50 [2] : vector<4x8x8xf32> to vector<4x8xf32>
    %89 = vector.shape_cast %88 : vector<4x8xf32> to vector<4x8x1xf32>
    %90 = vector.broadcast %89 : vector<4x8x1xf32> to vector<4x8x8xf32>
    %91 = arith.subf %87, %90 : vector<4x8x8xf32>
    %92 = math.exp %91 : vector<4x8x8xf32>
    %cst_51 = arith.constant dense<0.000000e+00> : vector<4x8xf32>
    %93 = vector.multi_reduction <add>, %92, %cst_51 [2] : vector<4x8x8xf32> to vector<4x8xf32>
    %94 = vector.shape_cast %93 : vector<4x8xf32> to vector<4x8x1xf32>
    %95 = tpu.reciprocal %94 {approx = true} : vector<4x8x1xf32> -> vector<4x8x1xf32>
    %96 = vector.broadcast %95 : vector<4x8x1xf32> to vector<4x8x8xf32>
    %97 = arith.mulf %92, %96 : vector<4x8x8xf32>
    %98 = arith.truncf %97 : vector<4x8x8xf32> to vector<4x8x8xbf16>
    %c0_52 = arith.constant 0 : index
    %c0_53 = arith.constant 0 : index
    %c0_54 = arith.constant 0 : index
    %c0_55 = arith.constant 0 : index
    %99 = vector.load %arg23[%c0_52, %c0_53, %c0_54, %c0_55] : memref<1x4x8x8xbf16, #tpu.memory_space<vmem>>, vector<1x4x8x8xbf16>
    %100 = vector.shape_cast %99 : vector<1x4x8x8xbf16> to vector<4x8x8xbf16>
    %101 = vector.shape_cast %98 : vector<4x8x8xbf16> to vector<1x4x8x8xbf16>
    tpu.vector_store %arg23[%c0_52, %c0_53, %c0_54, %c0_55], %101 {strides = array<i32>} : memref<1x4x8x8xbf16, #tpu.memory_space<vmem>>, vector<1x4x8x8xbf16>,
    %102 = arith.truncf %97 : vector<4x8x8xf32> to vector<4x8x8xbf16>
    %c0_56 = arith.constant 0 : index
    %c0_57 = arith.constant 0 : index
    %c0_58 = arith.constant 0 : index
    %103 = vector.load %arg25[%c0_56, %c0_57, %c0_58] : memref<4x8x8xbf16, #tpu.memory_space<vmem>>, vector<4x8x8xbf16>
    "tpu.trace_start"() <{level = 10 : i32, message = "hqk,hkd->hqd"}> : () -> ()
    %cst_59 = arith.constant dense<0.000000e+00> : vector<4x8x8xf32>
    %104 = tpu.matmul %102, %103, %cst_59 {dimension_numbers = #tpu.dot_dimension_numbers<[2], [1], [1], [2], [0, 0, 0, 1, 1, 2], [0], [0]>} : vector<4x8x8xbf16>, vector<4x8x8xbf16>, vector<4x8x8xf32> -> vector<4x8x8xf32>
    "tpu.trace_stop"() : () -> ()
    %105 = arith.truncf %104 : vector<4x8x8xf32> to vector<4x8x8xbf16>
    %106 = vector.extract_strided_slice %105 {offsets = [0, 0, 0], sizes = [1, 8, 8], strides = [1, 1, 1]} : vector<4x8x8xbf16> to vector<1x8x8xbf16>
    %107 = vector.shape_cast %106 : vector<1x8x8xbf16> to vector<8x8xbf16>
    %c0_60 = arith.constant 0 : index
    %c0_61 = arith.constant 0 : index
    %c0_62 = arith.constant 0 : index
    %108 = vector.load %arg12[%c0_60, %c0_61, %c0_62] : memref<4x8x32xbf16, #tpu.memory_space<vmem>>, vector<1x8x32xbf16>
    %109 = vector.shape_cast %108 : vector<1x8x32xbf16> to vector<8x32xbf16>
    %cst_63 = arith.constant dense<0.000000e+00> : vector<8x32xf32>
    %110 = tpu.matmul %107, %109, %cst_63 {dimension_numbers = #tpu.dot_dimension_numbers<[1], [0], [0], [1], [0, 0, 1, 1], [], []>} : vector<8x8xbf16>, vector<8x32xbf16>, vector<8x32xf32> -> vector<8x32xf32>
    %111 = vector.broadcast %7 : vector<1x32xf32> to vector<8x32xf32>
    %112 = arith.addf %111, %110 : vector<8x32xf32>
    %113 = vector.extract_strided_slice %105 {offsets = [1, 0, 0], sizes = [1, 8, 8], strides = [1, 1, 1]} : vector<4x8x8xbf16> to vector<1x8x8xbf16>
    %114 = vector.shape_cast %113 : vector<1x8x8xbf16> to vector<8x8xbf16>
    %c1_64 = arith.constant 1 : index
    %c0_65 = arith.constant 0 : index
    %c0_66 = arith.constant 0 : index
    %115 = vector.load %arg12[%c1_64, %c0_65, %c0_66] : memref<4x8x32xbf16, #tpu.memory_space<vmem>>, vector<1x8x32xbf16>
    %116 = vector.shape_cast %115 : vector<1x8x32xbf16> to vector<8x32xbf16>
    %cst_67 = arith.constant dense<0.000000e+00> : vector<8x32xf32>
    %117 = tpu.matmul %114, %116, %cst_67 {dimension_numbers = #tpu.dot_dimension_numbers<[1], [0], [0], [1], [0, 0, 1, 1], [], []>} : vector<8x8xbf16>, vector<8x32xbf16>, vector<8x32xf32> -> vector<8x32xf32>
    %118 = arith.addf %112, %117 : vector<8x32xf32>
    %119 = vector.extract_strided_slice %105 {offsets = [2, 0, 0], sizes = [1, 8, 8], strides = [1, 1, 1]} : vector<4x8x8xbf16> to vector<1x8x8xbf16>
    %120 = vector.shape_cast %119 : vector<1x8x8xbf16> to vector<8x8xbf16>
    %c2_68 = arith.constant 2 : index
    %c0_69 = arith.constant 0 : index
    %c0_70 = arith.constant 0 : index
    %121 = vector.load %arg12[%c2_68, %c0_69, %c0_70] : memref<4x8x32xbf16, #tpu.memory_space<vmem>>, vector<1x8x32xbf16>
    %122 = vector.shape_cast %121 : vector<1x8x32xbf16> to vector<8x32xbf16>
    %cst_71 = arith.constant dense<0.000000e+00> : vector<8x32xf32>
    %123 = tpu.matmul %120, %122, %cst_71 {dimension_numbers = #tpu.dot_dimension_numbers<[1], [0], [0], [1], [0, 0, 1, 1], [], []>} : vector<8x8xbf16>, vector<8x32xbf16>, vector<8x32xf32> -> vector<8x32xf32>
    %124 = arith.addf %118, %123 : vector<8x32xf32>
    %125 = vector.extract_strided_slice %105 {offsets = [3, 0, 0], sizes = [1, 8, 8], strides = [1, 1, 1]} : vector<4x8x8xbf16> to vector<1x8x8xbf16>
    %126 = vector.shape_cast %125 : vector<1x8x8xbf16> to vector<8x8xbf16>
    %c3_72 = arith.constant 3 : index
    %c0_73 = arith.constant 0 : index
    %c0_74 = arith.constant 0 : index
    %127 = vector.load %arg12[%c3_72, %c0_73, %c0_74] : memref<4x8x32xbf16, #tpu.memory_space<vmem>>, vector<1x8x32xbf16>
    %128 = vector.shape_cast %127 : vector<1x8x32xbf16> to vector<8x32xbf16>
    %cst_75 = arith.constant dense<0.000000e+00> : vector<8x32xf32>
    %129 = tpu.matmul %126, %128, %cst_75 {dimension_numbers = #tpu.dot_dimension_numbers<[1], [0], [0], [1], [0, 0, 1, 1], [], []>} : vector<8x8xbf16>, vector<8x32xbf16>, vector<8x32xf32> -> vector<8x32xf32>
    %130 = arith.addf %124, %129 : vector<8x32xf32>
    %131 = arith.addf %14, %130 : vector<8x32xf32>
    %cst_76 = arith.constant dense<0.000000e+00> : vector<8xf32>
    %132 = vector.multi_reduction <add>, %131, %cst_76 [1] : vector<8x32xf32> to vector<8xf32>
    %133 = vector.shape_cast %132 : vector<8xf32> to vector<8x1xf32>
    %cst_77 = arith.constant 3.200000e+01 : f32
    %134 = vector.broadcast %cst_77 : f32 to vector<8x1xf32>
    %135 = arith.divf %133, %134 : vector<8x1xf32>
    %136 = vector.broadcast %135 : vector<8x1xf32> to vector<8x32xf32>
    %137 = arith.subf %131, %136 : vector<8x32xf32>
    %138 = arith.mulf %137, %137 : vector<8x32xf32>
    %cst_78 = arith.constant dense<0.000000e+00> : vector<8xf32>
    %139 = vector.multi_reduction <add>, %138, %cst_78 [1] : vector<8x32xf32> to vector<8xf32>
    %140 = vector.shape_cast %139 : vector<8xf32> to vector<8x1xf32>
    %cst_79 = arith.constant 3.200000e+01 : f32
    %141 = vector.broadcast %cst_79 : f32 to vector<8x1xf32>
    %142 = arith.divf %140, %141 : vector<8x1xf32>
    %143 = vector.broadcast %135 : vector<8x1xf32> to vector<8x32xf32>
    %144 = arith.subf %131, %143 : vector<8x32xf32>
    %cst_80 = arith.constant 9.99999974E-6 : f32
    %145 = vector.broadcast %cst_80 : f32 to vector<8x1xf32>
    %146 = arith.addf %142, %145 : vector<8x1xf32>
    %147 = math.rsqrt %146 : vector<8x1xf32>
    %148 = vector.broadcast %147 : vector<8x1xf32> to vector<8x32xf32>
    %149 = arith.mulf %144, %148 : vector<8x32xf32>
    %150 = vector.broadcast %2 : vector<1x32xf32> to vector<8x32xf32>
    %151 = arith.mulf %149, %150 : vector<8x32xf32>
    %152 = vector.broadcast %3 : vector<1x32xf32> to vector<8x32xf32>
    %153 = arith.addf %151, %152 : vector<8x32xf32>
    %154 = arith.truncf %153 : vector<8x32xf32> to vector<8x32xbf16>
    %c0_81 = arith.constant 0 : index
    %c0_82 = arith.constant 0 : index
    %155 = vector.load %arg16[%c0_81, %c0_82] : memref<32x64xbf16, #tpu.memory_space<vmem>>, vector<32x64xbf16>
    %cst_83 = arith.constant dense<0.000000e+00> : vector<8x64xf32>
    %156 = tpu.matmul %154, %155, %cst_83 {dimension_numbers = #tpu.dot_dimension_numbers<[1], [0], [0], [1], [0, 0, 1, 1], [], []>} : vector<8x32xbf16>, vector<32x64xbf16>, vector<8x64xf32> -> vector<8x64xf32>
    %c0_84 = arith.constant 0 : index
    %c0_85 = arith.constant 0 : index
    %157 = vector.load %arg17[%c0_84, %c0_85] : memref<1x64xf32, #tpu.memory_space<vmem>>, vector<1x64xf32>
    %158 = vector.broadcast %157 : vector<1x64xf32> to vector<8x64xf32>
    %159 = arith.addf %156, %158 : vector<8x64xf32>
    %160 = arith.mulf %159, %159 : vector<8x64xf32>
    %161 = arith.mulf %159, %160 : vector<8x64xf32>
    %cst_86 = arith.constant 4.471500e-02 : f32
    %162 = vector.broadcast %cst_86 : f32 to vector<8x64xf32>
    %163 = arith.mulf %162, %161 : vector<8x64xf32>
    %164 = arith.addf %159, %163 : vector<8x64xf32>
    %cst_87 = arith.constant 0.797884583 : f32
    %165 = vector.broadcast %cst_87 : f32 to vector<8x64xf32>
    %166 = arith.mulf %165, %164 : vector<8x64xf32>
    %167 = math.tanh %166 : vector<8x64xf32>
    %cst_88 = arith.constant 1.000000e+00 : f32
    %168 = vector.broadcast %cst_88 : f32 to vector<8x64xf32>
    %169 = arith.addf %168, %167 : vector<8x64xf32>
    %cst_89 = arith.constant 5.000000e-01 : f32
    %170 = vector.broadcast %cst_89 : f32 to vector<8x64xf32>
    %171 = arith.mulf %170, %169 : vector<8x64xf32>
    %172 = arith.mulf %159, %171 : vector<8x64xf32>
    %173 = arith.truncf %172 : vector<8x64xf32> to vector<8x64xbf16>
    %c0_90 = arith.constant 0 : index
    %c0_91 = arith.constant 0 : index
    %174 = vector.load %arg18[%c0_90, %c0_91] : memref<64x32xbf16, #tpu.memory_space<vmem>>, vector<64x32xbf16>
    %cst_92 = arith.constant dense<0.000000e+00> : vector<8x32xf32>
    %175 = tpu.matmul %173, %174, %cst_92 {dimension_numbers = #tpu.dot_dimension_numbers<[1], [0], [0], [1], [0, 0, 1, 1], [], []>} : vector<8x64xbf16>, vector<64x32xbf16>, vector<8x32xf32> -> vector<8x32xf32>
    %176 = arith.addf %131, %175 : vector<8x32xf32>
    %c0_93 = arith.constant 0 : index
    %c0_94 = arith.constant 0 : index
    %177 = vector.load %arg19[%c0_93, %c0_94] : memref<1x32xf32, #tpu.memory_space<vmem>>, vector<1x32xf32>
    %178 = vector.broadcast %177 : vector<1x32xf32> to vector<8x32xf32>
    %179 = arith.addf %176, %178 : vector<8x32xf32>
    %c0_95 = arith.constant 0 : index
    %c0_96 = arith.constant 0 : index
    %c0_97 = arith.constant 0 : index
    %180 = vector.load %arg22[%c0_95, %c0_96, %c0_97] : memref<1x8x32xf32, #tpu.memory_space<vmem>>, vector<1x8x32xf32>
    %181 = vector.shape_cast %180 : vector<1x8x32xf32> to vector<8x32xf32>
    %182 = vector.shape_cast %179 : vector<8x32xf32> to vector<1x8x32xf32>
    tpu.vector_store %arg22[%c0_95, %c0_96, %c0_97], %182 {strides = array<i32>} : memref<1x8x32xf32, #tpu.memory_space<vmem>>, vector<1x8x32xf32>,
    return
  }
  func.func @transform_0(%arg0: i32, %arg1: i32) -> (i32, i32, i32) {
    %c0_i32 = arith.constant 0 : i32
    %c0_i32_0 = arith.constant 0 : i32
    %c0_i32_1 = arith.constant 0 : i32
    return %arg0, %c0_i32, %c0_i32_0 : i32, i32, i32
  }
  func.func @transform_1(%arg0: i32, %arg1: i32) -> (i32, i32, i32) {
    %c0_i32 = arith.constant 0 : i32
    %c0_i32_0 = arith.constant 0 : i32
    %c0_i32_1 = arith.constant 0 : i32
    return %arg0, %c0_i32, %c0_i32_0 : i32, i32, i32
  }
  func.func @transform_2(%arg0: i32, %arg1: i32) -> (i32, i32) {
    %c0_i32 = arith.constant 0 : i32
    %c0_i32_0 = arith.constant 0 : i32
    %c0_i32_1 = arith.constant 0 : i32
    return %c0_i32, %c0_i32_0 : i32, i32
  }
  func.func @transform_3(%arg0: i32, %arg1: i32) -> (i32, i32) {
    %c0_i32 = arith.constant 0 : i32
    %c0_i32_0 = arith.constant 0 : i32
    %c0_i32_1 = arith.constant 0 : i32
    return %c0_i32, %c0_i32_0 : i32, i32
  }
  func.func @transform_4(%arg0: i32, %arg1: i32) -> (i32, i32, i32) {
    %c0_i32 = arith.constant 0 : i32
    %c0_i32_0 = arith.constant 0 : i32
    %c0_i32_1 = arith.constant 0 : i32
    %c0_i32_2 = arith.constant 0 : i32
    return %c0_i32, %c0_i32_0, %c0_i32_1 : i32, i32, i32
  }
  func.func @transform_5(%arg0: i32, %arg1: i32) -> (i32, i32, i32) {
    %c0_i32 = arith.constant 0 : i32
    %c0_i32_0 = arith.constant 0 : i32
    %c0_i32_1 = arith.constant 0 : i32
    %c0_i32_2 = arith.constant 0 : i32
    return %c0_i32, %c0_i32_0, %c0_i32_1 : i32, i32, i32
  }
  func.func @transform_6(%arg0: i32, %arg1: i32) -> (i32, i32, i32) {
    %c0_i32 = arith.constant 0 : i32
    %c0_i32_0 = arith.constant 0 : i32
    %c0_i32_1 = arith.constant 0 : i32
    %c0_i32_2 = arith.constant 0 : i32
    return %c0_i32, %c0_i32_0, %c0_i32_1 : i32, i32, i32
  }
  func.func @transform_7(%arg0: i32, %arg1: i32) -> (i32, i32, i32) {
    %c0_i32 = arith.constant 0 : i32
    %c0_i32_0 = arith.constant 0 : i32
    %c0_i32_1 = arith.constant 0 : i32
    %c0_i32_2 = arith.constant 0 : i32
    return %c0_i32, %c0_i32_0, %c0_i32_1 : i32, i32, i32
  }
  func.func @transform_8(%arg0: i32, %arg1: i32) -> (i32, i32, i32) {
    %c0_i32 = arith.constant 0 : i32
    %c0_i32_0 = arith.constant 0 : i32
    %c0_i32_1 = arith.constant 0 : i32
    %c0_i32_2 = arith.constant 0 : i32
    return %c0_i32, %c0_i32_0, %c0_i32_1 : i32, i32, i32
  }
  func.func @transform_9(%arg0: i32, %arg1: i32) -> (i32, i32, i32) {
    %c0_i32 = arith.constant 0 : i32
    %c0_i32_0 = arith.constant 0 : i32
    %c0_i32_1 = arith.constant 0 : i32
    %c0_i32_2 = arith.constant 0 : i32
    return %c0_i32, %c0_i32_0, %c0_i32_1 : i32, i32, i32
  }
  func.func @transform_10(%arg0: i32, %arg1: i32) -> (i32, i32, i32) {
    %c0_i32 = arith.constant 0 : i32
    %c0_i32_0 = arith.constant 0 : i32
    %c0_i32_1 = arith.constant 0 : i32
    %c0_i32_2 = arith.constant 0 : i32
    return %c0_i32, %c0_i32_0, %c0_i32_1 : i32, i32, i32
  }
  func.func @transform_11(%arg0: i32, %arg1: i32) -> (i32, i32) {
    %c0_i32 = arith.constant 0 : i32
    %c0_i32_0 = arith.constant 0 : i32
    %c0_i32_1 = arith.constant 0 : i32
    return %c0_i32, %c0_i32_0 : i32, i32
  }
  func.func @transform_12(%arg0: i32, %arg1: i32) -> (i32, i32) {
    %c0_i32 = arith.constant 0 : i32
    %c0_i32_0 = arith.constant 0 : i32
    %c0_i32_1 = arith.constant 0 : i32
    return %c0_i32, %c0_i32_0 : i32, i32
  }
  func.func @transform_13(%arg0: i32, %arg1: i32) -> (i32, i32) {
    %c0_i32 = arith.constant 0 : i32
    %c0_i32_0 = arith.constant 0 : i32
    %c0_i32_1 = arith.constant 0 : i32
    return %c0_i32, %c0_i32_0 : i32, i32
  }
  func.func @transform_14(%arg0: i32, %arg1: i32) -> (i32, i32) {
    %c0_i32 = arith.constant 0 : i32
    %c0_i32_0 = arith.constant 0 : i32
    %c0_i32_1 = arith.constant 0 : i32
    return %c0_i32, %c0_i32_0 : i32, i32
  }
  func.func @transform_15(%arg0: i32, %arg1: i32) -> (i32, i32) {
    %c0_i32 = arith.constant 0 : i32
    %c0_i32_0 = arith.constant 0 : i32
    %c0_i32_1 = arith.constant 0 : i32
    return %c0_i32, %c0_i32_0 : i32, i32
  }
  func.func @transform_16(%arg0: i32, %arg1: i32) -> (i32, i32) {
    %c0_i32 = arith.constant 0 : i32
    %c0_i32_0 = arith.constant 0 : i32
    %c0_i32_1 = arith.constant 0 : i32
    return %c0_i32, %c0_i32_0 : i32, i32
  }
  func.func @transform_17(%arg0: i32, %arg1: i32) -> (i32, i32) {
    %c0_i32 = arith.constant 0 : i32
    %c0_i32_0 = arith.constant 0 : i32
    %c0_i32_1 = arith.constant 0 : i32
    return %c0_i32, %c0_i32_0 : i32, i32
  }
  func.func @transform_18(%arg0: i32, %arg1: i32) -> (i32, i32) {
    %c0_i32 = arith.constant 0 : i32
    %c0_i32_0 = arith.constant 0 : i32
    %c0_i32_1 = arith.constant 0 : i32
    return %c0_i32, %c0_i32_0 : i32, i32
  }
  func.func @transform_19(%arg0: i32, %arg1: i32) -> (i32, i32) {
    %c0_i32 = arith.constant 0 : i32
    %c0_i32_0 = arith.constant 0 : i32
    %c0_i32_1 = arith.constant 0 : i32
    return %c0_i32, %c0_i32_0 : i32, i32
  }
  func.func @transform_20(%arg0: i32, %arg1: i32) -> (i32, i32, i32) {
    %c0_i32 = arith.constant 0 : i32
    %c0_i32_0 = arith.constant 0 : i32
    return %arg0, %arg1, %c0_i32 : i32, i32, i32
  }
  func.func @transform_21(%arg0: i32, %arg1: i32) -> (i32, i32, i32, i32) {
    %c0_i32 = arith.constant 0 : i32
    %c0_i32_0 = arith.constant 0 : i32
    %c0_i32_1 = arith.constant 0 : i32
    return %arg0, %c0_i32, %arg1, %c0_i32_0 : i32, i32, i32, i32
  }
}

module attributes {stable_mosaic.version = 11 : i64} {
  func.func @encoder_block_kernel(%arg0: i32, %arg1: i32, %arg2: memref<1x8x32xf32, #tpu.memory_space<vmem>>, %arg3: memref<1x1x8xf32, #tpu.memory_space<vmem>>, %arg4: memref<1x32xf32, #tpu.memory_space<vmem>>, %arg5: memref<1x32xf32, #tpu.memory_space<vmem>>, %arg6: memref<4x32x8xbf16, #tpu.memory_space<vmem>>, %arg7: memref<4x1x8xf32, #tpu.memory_space<vmem>>, %arg8: memref<4x32x8xbf16, #tpu.memory_space<vmem>>, %arg9: memref<4x1x8xf32, #tpu.memory_space<vmem>>, %arg10: memref<4x32x8xbf16, #tpu.memory_space<vmem>>, %arg11: memref<4x1x8xf32, #tpu.memory_space<vmem>>, %arg12: memref<4x8x32xbf16, #tpu.memory_space<vmem>>, %arg13: memref<1x32xf32, #tpu.memory_space<vmem>>, %arg14: memref<1x32xf32, #tpu.memory_space<vmem>>, %arg15: memref<1x32xf32, #tpu.memory_space<vmem>>, %arg16: memref<32x64xbf16, #tpu.memory_space<vmem>>, %arg17: memref<1x64xf32, #tpu.memory_space<vmem>>, %arg18: memref<64x32xbf16, #tpu.memory_space<vmem>>, %arg19: memref<1x32xf32, #tpu.memory_space<vmem>>, %arg20: memref<1x32xf32, #tpu.memory_space<vmem>>, %arg21: memref<1x32xf32, #tpu.memory_space<vmem>>, %arg22: memref<1x8x32xf32, #tpu.memory_space<vmem>>, %arg23: memref<1x4x8x8xbf16, #tpu.memory_space<vmem>>, %arg24: memref<4x8x8xbf16, #tpu.memory_space<vmem>>, %arg25: memref<4x8x8xbf16, #tpu.memory_space<vmem>>) attributes {dimension_semantics = [#tpu.dimension_semantics<parallel>, #tpu.dimension_semantics<arbitrary>], iteration_bounds = array<i64: 2, 1>, scalar_prefetch = 0 : i64, scratch_operands = 2 : i64, tpu.core_type = #tpu.core_type<tc>, window_params = [{transform_indices = @transform_0, window_bounds = array<i64: 1, 8, 32>}, {transform_indices = @transform_1, window_bounds = array<i64: 1, 1, 8>}, {pipeline_mode = #tpu.pipeline_mode<synchronous>, transform_indices = @transform_2, window_bounds = array<i64: 1, 32>}, {pipeline_mode = #tpu.pipeline_mode<synchronous>, transform_indices = @transform_3, window_bounds = array<i64: 1, 32>}, {pipeline_mode = #tpu.pipeline_mode<synchronous>, transform_indices = @transform_4, window_bounds = array<i64: 4, 32, 8>}, {pipeline_mode = #tpu.pipeline_mode<synchronous>, transform_indices = @transform_5, window_bounds = array<i64: 4, 1, 8>}, {pipeline_mode = #tpu.pipeline_mode<synchronous>, transform_indices = @transform_6, window_bounds = array<i64: 4, 32, 8>}, {pipeline_mode = #tpu.pipeline_mode<synchronous>, transform_indices = @transform_7, window_bounds = array<i64: 4, 1, 8>}, {pipeline_mode = #tpu.pipeline_mode<synchronous>, transform_indices = @transform_8, window_bounds = array<i64: 4, 32, 8>}, {pipeline_mode = #tpu.pipeline_mode<synchronous>, transform_indices = @transform_9, window_bounds = array<i64: 4, 1, 8>}, {pipeline_mode = #tpu.pipeline_mode<synchronous>, transform_indices = @transform_10, window_bounds = array<i64: 4, 8, 32>}, {pipeline_mode = #tpu.pipeline_mode<synchronous>, transform_indices = @transform_11, window_bounds = array<i64: 1, 32>}, {pipeline_mode = #tpu.pipeline_mode<synchronous>, transform_indices = @transform_12, window_bounds = array<i64: 1, 32>}, {pipeline_mode = #tpu.pipeline_mode<synchronous>, transform_indices = @transform_13, window_bounds = array<i64: 1, 32>}, {pipeline_mode = #tpu.pipeline_mode<synchronous>, transform_indices = @transform_14, window_bounds = array<i64: 32, 64>}, {pipeline_mode = #tpu.pipeline_mode<synchronous>, transform_indices = @transform_15, window_bounds = array<i64: 1, 64>}, {pipeline_mode = #tpu.pipeline_mode<synchronous>, transform_indices = @transform_16, window_bounds = array<i64: 64, 32>}, {pipeline_mode = #tpu.pipeline_mode<synchronous>, transform_indices = @transform_17, window_bounds = array<i64: 1, 32>}, {pipeline_mode = #tpu.pipeline_mode<synchronous>, transform_indices = @transform_18, window_bounds = array<i64: 1, 32>}, {pipeline_mode = #tpu.pipeline_mode<synchronous>, transform_indices = @transform_19, window_bounds = array<i64: 1, 32>}, {transform_indices = @transform_20, window_bounds = array<i64: 1, 8, 32>}, {transform_indices = @transform_21, window_bounds = array<i64: 1, 4, 8, 8>}]} {
    %c0 = arith.constant 0 : index
    %c0_0 = arith.constant 0 : index
    %0 = vector.load %arg4[%c0, %c0_0] : memref<1x32xf32, #tpu.memory_space<vmem>>, vector<1x32xf32>
    %c0_1 = arith.constant 0 : index
    %c0_2 = arith.constant 0 : index
    %1 = vector.load %arg5[%c0_1, %c0_2] : memref<1x32xf32, #tpu.memory_space<vmem>>, vector<1x32xf32>
    %c0_3 = arith.constant 0 : index
    %c0_4 = arith.constant 0 : index
    %2 = vector.load %arg14[%c0_3, %c0_4] : memref<1x32xf32, #tpu.memory_space<vmem>>, vector<1x32xf32>
    %c0_5 = arith.constant 0 : index
    %c0_6 = arith.constant 0 : index
    %3 = vector.load %arg15[%c0_5, %c0_6] : memref<1x32xf32, #tpu.memory_space<vmem>>, vector<1x32xf32>
    %c0_7 = arith.constant 0 : index
    %c0_8 = arith.constant 0 : index
    %c0_9 = arith.constant 0 : index
    %4 = vector.load %arg7[%c0_7, %c0_8, %c0_9] : memref<4x1x8xf32, #tpu.memory_space<vmem>>, vector<4x1x8xf32>
    %c0_10 = arith.constant 0 : index
    %c0_11 = arith.constant 0 : index
    %c0_12 = arith.constant 0 : index
    %5 = vector.load %arg9[%c0_10, %c0_11, %c0_12] : memref<4x1x8xf32, #tpu.memory_space<vmem>>, vector<4x1x8xf32>
    %c0_13 = arith.constant 0 : index
    %c0_14 = arith.constant 0 : index
    %c0_15 = arith.constant 0 : index
    %6 = vector.load %arg11[%c0_13, %c0_14, %c0_15] : memref<4x1x8xf32, #tpu.memory_space<vmem>>, vector<4x1x8xf32>
    %c0_16 = arith.constant 0 : index
    %c0_17 = arith.constant 0 : index
    %7 = vector.load %arg13[%c0_16, %c0_17] : memref<1x32xf32, #tpu.memory_space<vmem>>, vector<1x32xf32>
    %c0_18 = arith.constant 0 : index
    %c0_19 = arith.constant 0 : index
    %c0_20 = arith.constant 0 : index
    %8 = vector.load %arg3[%c0_18, %c0_19, %c0_20] : memref<1x1x8xf32, #tpu.memory_space<vmem>>, vector<1x1x8xf32>
    %9 = vector.shape_cast %8 : vector<1x1x8xf32> to vector<1x8xf32>
    %c0_i32 = arith.constant 0 : i32
    %10 = arith.cmpi eq, %arg1, %c0_i32 : i32
    %11 = arith.extui %10 : i1 to i32
    %c0_i32_21 = arith.constant 0 : i32
    %12 = arith.cmpi ne, %11, %c0_i32_21 : i32
    scf.if %12 {
      %c0_98 = arith.constant 0 : index
      %c0_99 = arith.constant 0 : index
      %c0_100 = arith.constant 0 : index
      %183 = vector.load %arg2[%c0_98, %c0_99, %c0_100] : memref<1x8x32xf32, #tpu.memory_space<vmem>>, vector<1x8x32xf32>
      %184 = vector.shape_cast %183 : vector<1x8x32xf32> to vector<8x32xf32>
      %cst_101 = arith.constant dense<0.000000e+00> : vector<8xf32>
      %185 = vector.multi_reduction <add>, %184, %cst_101 [1] : vector<8x32xf32> to vector<8xf32>
      %186 = vector.shape_cast %185 : vector<8xf32> to vector<8x1xf32>
      %cst_102 = arith.constant 3.200000e+01 : f32
      %187 = vector.broadcast %cst_102 : f32 to vector<8x1xf32>
      %188 = arith.divf %186, %187 : vector<8x1xf32>
      %189 = vector.broadcast %188 : vector<8x1xf32> to vector<8x32xf32>
      %190 = arith.subf %184, %189 : vector<8x32xf32>
      %191 = arith.mulf %190, %190 : vector<8x32xf32>
      %cst_103 = arith.constant dense<0.000000e+00> : vector<8xf32>
      %192 = vector.multi_reduction <add>, %191, %cst_103 [1] : vector<8x32xf32> to vector<8xf32>
      %193 = vector.shape_cast %192 : vector<8xf32> to vector<8x1xf32>
      %cst_104 = arith.constant 3.200000e+01 : f32
      %194 = vector.broadcast %cst_104 : f32 to vector<8x1xf32>
      %195 = arith.divf %193, %194 : vector<8x1xf32>
      %196 = vector.broadcast %188 : vector<8x1xf32> to vector<8x32xf32>
      %197 = arith.subf %184, %196 : vector<8x32xf32>
      %cst_105 = arith.constant 9.99999974E-6 : f32
      %198 = vector.broadcast %cst_105 : f32 to vector<8x1xf32>
      %199 = arith.addf %195, %198 : vector<8x1xf32>
      %200 = math.rsqrt %199 : vector<8x1xf32>
      %201 = vector.broadcast %200 : vector<8x1xf32> to vector<8x32xf32>
      %202 = arith.mulf %197, %201 : vector<8x32xf32>
      %203 = vector.broadcast %0 : vector<1x32xf32> to vector<8x32xf32>
      %204 = arith.mulf %202, %203 : vector<8x32xf32>
      %205 = vector.broadcast %1 : vector<1x32xf32> to vector<8x32xf32>
      %206 = arith.addf %204, %205 : vector<8x32xf32>
      %207 = arith.truncf %206 : vector<8x32xf32> to vector<8x32xbf16>
      %c0_106 = arith.constant 0 : index
      %c0_107 = arith.constant 0 : index
      %c0_108 = arith.constant 0 : index
      %208 = vector.load %arg8[%c0_106, %c0_107, %c0_108] : memref<4x32x8xbf16, #tpu.memory_space<vmem>>, vector<1x32x8xbf16>
      %209 = vector.shape_cast %208 : vector<1x32x8xbf16> to vector<32x8xbf16>
      %cst_109 = arith.constant dense<0.000000e+00> : vector<8x8xf32>
      %210 = tpu.matmul %207, %209, %cst_109 {dimension_numbers = #tpu.dot_dimension_numbers<[1], [0], [0], [1], [0, 0, 1, 1], [], []>} : vector<8x32xbf16>, vector<32x8xbf16>, vector<8x8xf32> -> vector<8x8xf32>
      %211 = vector.extract_strided_slice %5 {offsets = [0, 0, 0], sizes = [1, 1, 8], strides = [1, 1, 1]} : vector<4x1x8xf32> to vector<1x1x8xf32>
      %212 = vector.shape_cast %211 : vector<1x1x8xf32> to vector<1x8xf32>
      %213 = vector.broadcast %212 : vector<1x8xf32> to vector<8x8xf32>
      %214 = arith.addf %210, %213 : vector<8x8xf32>
      %c0_110 = arith.constant 0 : index
      %c0_111 = arith.constant 0 : index
      %c0_112 = arith.constant 0 : index
      %215 = vector.load %arg10[%c0_110, %c0_111, %c0_112] : memref<4x32x8xbf16, #tpu.memory_space<vmem>>, vector<1x32x8xbf16>
      %216 = vector.shape_cast %215 : vector<1x32x8xbf16> to vector<32x8xbf16>
      %cst_113 = arith.constant dense<0.000000e+00> : vector<8x8xf32>
      %217 = tpu.matmul %207, %216, %cst_113 {dimension_numbers = #tpu.dot_dimension_numbers<[1], [0], [0], [1], [0, 0, 1, 1], [], []>} : vector<8x32xbf16>, vector<32x8xbf16>, vector<8x8xf32> -> vector<8x8xf32>
      %218 = vector.extract_strided_slice %6 {offsets = [0, 0, 0], sizes = [1, 1, 8], strides = [1, 1, 1]} : vector<4x1x8xf32> to vector<1x1x8xf32>
      %219 = vector.shape_cast %218 : vector<1x1x8xf32> to vector<1x8xf32>
      %220 = vector.broadcast %219 : vector<1x8xf32> to vector<8x8xf32>
      %221 = arith.addf %217, %220 : vector<8x8xf32>
      %222 = arith.truncf %214 : vector<8x8xf32> to vector<8x8xbf16>
      %c0_114 = arith.constant 0 : index
      %c0_115 = arith.constant 0 : index
      %c0_116 = arith.constant 0 : index
      %223 = vector.load %arg24[%c0_114, %c0_115, %c0_116] : memref<4x8x8xbf16, #tpu.memory_space<vmem>>, vector<1x8x8xbf16>
      %224 = vector.shape_cast %223 : vector<1x8x8xbf16> to vector<8x8xbf16>
      %225 = vector.shape_cast %222 : vector<8x8xbf16> to vector<1x8x8xbf16>
      tpu.vector_store %arg24[%c0_114, %c0_115, %c0_116], %225 {strides = array<i32>} : memref<4x8x8xbf16, #tpu.memory_space<vmem>>, vector<1x8x8xbf16>,
      %226 = arith.truncf %221 : vector<8x8xf32> to vector<8x8xbf16>
      %c0_117 = arith.constant 0 : index
      %c0_118 = arith.constant 0 : index
      %c0_119 = arith.constant 0 : index
      %227 = vector.load %arg25[%c0_117, %c0_118, %c0_119] : memref<4x8x8xbf16, #tpu.memory_space<vmem>>, vector<1x8x8xbf16>
      %228 = vector.shape_cast %227 : vector<1x8x8xbf16> to vector<8x8xbf16>
      %229 = vector.shape_cast %226 : vector<8x8xbf16> to vector<1x8x8xbf16>
      tpu.vector_store %arg25[%c0_117, %c0_118, %c0_119], %229 {strides = array<i32>} : memref<4x8x8xbf16, #tpu.memory_space<vmem>>, vector<1x8x8xbf16>,
      %c1_120 = arith.constant 1 : index
      %c0_121 = arith.constant 0 : index
      %c0_122 = arith.constant 0 : index
      %230 = vector.load %arg8[%c1_120, %c0_121, %c0_122] : memref<4x32x8xbf16, #tpu.memory_space<vmem>>, vector<1x32x8xbf16>
      %231 = vector.shape_cast %230 : vector<1x32x8xbf16> to vector<32x8xbf16>
      %cst_123 = arith.constant dense<0.000000e+00> : vector<8x8xf32>
      %232 = tpu.matmul %207, %231, %cst_123 {dimension_numbers = #tpu.dot_dimension_numbers<[1], [0], [0], [1], [0, 0, 1, 1], [], []>} : vector<8x32xbf16>, vector<32x8xbf16>, vector<8x8xf32> -> vector<8x8xf32>
      %233 = vector.extract_strided_slice %5 {offsets = [1, 0, 0], sizes = [1, 1, 8], strides = [1, 1, 1]} : vector<4x1x8xf32> to vector<1x1x8xf32>
      %234 = vector.shape_cast %233 : vector<1x1x8xf32> to vector<1x8xf32>
      %235 = vector.broadcast %234 : vector<1x8xf32> to vector<8x8xf32>
      %236 = arith.addf %232, %235 : vector<8x8xf32>
      %c1_124 = arith.constant 1 : index
      %c0_125 = arith.constant 0 : index
      %c0_126 = arith.constant 0 : index
      %237 = vector.load %arg10[%c1_124, %c0_125, %c0_126] : memref<4x32x8xbf16, #tpu.memory_space<vmem>>, vector<1x32x8xbf16>
      %238 = vector.shape_cast %237 : vector<1x32x8xbf16> to vector<32x8xbf16>
      %cst_127 = arith.constant dense<0.000000e+00> : vector<8x8xf32>
      %239 = tpu.matmul %207, %238, %cst_127 {dimension_numbers = #tpu.dot_dimension_numbers<[1], [0], [0], [1], [0, 0, 1, 1], [], []>} : vector<8x32xbf16>, vector<32x8xbf16>, vector<8x8xf32> -> vector<8x8xf32>
      %240 = vector.extract_strided_slice %6 {offsets = [1, 0, 0], sizes = [1, 1, 8], strides = [1, 1, 1]} : vector<4x1x8xf32> to vector<1x1x8xf32>
      %241 = vector.shape_cast %240 : vector<1x1x8xf32> to vector<1x8xf32>
      %242 = vector.broadcast %241 : vector<1x8xf32> to vector<8x8xf32>
      %243 = arith.addf %239, %242 : vector<8x8xf32>
      %244 = arith.truncf %236 : vector<8x8xf32> to vector<8x8xbf16>
      %c1_128 = arith.constant 1 : index
      %c0_129 = arith.constant 0 : index
      %c0_130 = arith.constant 0 : index
      %245 = vector.load %arg24[%c1_128, %c0_129, %c0_130] : memref<4x8x8xbf16, #tpu.memory_space<vmem>>, vector<1x8x8xbf16>
      %246 = vector.shape_cast %245 : vector<1x8x8xbf16> to vector<8x8xbf16>
      %247 = vector.shape_cast %244 : vector<8x8xbf16> to vector<1x8x8xbf16>
      tpu.vector_store %arg24[%c1_128, %c0_129, %c0_130], %247 {strides = array<i32>} : memref<4x8x8xbf16, #tpu.memory_space<vmem>>, vector<1x8x8xbf16>,
      %248 = arith.truncf %243 : vector<8x8xf32> to vector<8x8xbf16>
      %c1_131 = arith.constant 1 : index
      %c0_132 = arith.constant 0 : index
      %c0_133 = arith.constant 0 : index
      %249 = vector.load %arg25[%c1_131, %c0_132, %c0_133] : memref<4x8x8xbf16, #tpu.memory_space<vmem>>, vector<1x8x8xbf16>
      %250 = vector.shape_cast %249 : vector<1x8x8xbf16> to vector<8x8xbf16>
      %251 = vector.shape_cast %248 : vector<8x8xbf16> to vector<1x8x8xbf16>
      tpu.vector_store %arg25[%c1_131, %c0_132, %c0_133], %251 {strides = array<i32>} : memref<4x8x8xbf16, #tpu.memory_space<vmem>>, vector<1x8x8xbf16>,
      %c2_134 = arith.constant 2 : index
      %c0_135 = arith.constant 0 : index
      %c0_136 = arith.constant 0 : index
      %252 = vector.load %arg8[%c2_134, %c0_135, %c0_136] : memref<4x32x8xbf16, #tpu.memory_space<vmem>>, vector<1x32x8xbf16>
      %253 = vector.shape_cast %252 : vector<1x32x8xbf16> to vector<32x8xbf16>
      %cst_137 = arith.constant dense<0.000000e+00> : vector<8x8xf32>
      %254 = tpu.matmul %207, %253, %cst_137 {dimension_numbers = #tpu.dot_dimension_numbers<[1], [0], [0], [1], [0, 0, 1, 1], [], []>} : vector<8x32xbf16>, vector<32x8xbf16>, vector<8x8xf32> -> vector<8x8xf32>
      %255 = vector.extract_strided_slice %5 {offsets = [2, 0, 0], sizes = [1, 1, 8], strides = [1, 1, 1]} : vector<4x1x8xf32> to vector<1x1x8xf32>
      %256 = vector.shape_cast %255 : vector<1x1x8xf32> to vector<1x8xf32>
      %257 = vector.broadcast %256 : vector<1x8xf32> to vector<8x8xf32>
      %258 = arith.addf %254, %257 : vector<8x8xf32>
      %c2_138 = arith.constant 2 : index
      %c0_139 = arith.constant 0 : index
      %c0_140 = arith.constant 0 : index
      %259 = vector.load %arg10[%c2_138, %c0_139, %c0_140] : memref<4x32x8xbf16, #tpu.memory_space<vmem>>, vector<1x32x8xbf16>
      %260 = vector.shape_cast %259 : vector<1x32x8xbf16> to vector<32x8xbf16>
      %cst_141 = arith.constant dense<0.000000e+00> : vector<8x8xf32>
      %261 = tpu.matmul %207, %260, %cst_141 {dimension_numbers = #tpu.dot_dimension_numbers<[1], [0], [0], [1], [0, 0, 1, 1], [], []>} : vector<8x32xbf16>, vector<32x8xbf16>, vector<8x8xf32> -> vector<8x8xf32>
      %262 = vector.extract_strided_slice %6 {offsets = [2, 0, 0], sizes = [1, 1, 8], strides = [1, 1, 1]} : vector<4x1x8xf32> to vector<1x1x8xf32>
      %263 = vector.shape_cast %262 : vector<1x1x8xf32> to vector<1x8xf32>
      %264 = vector.broadcast %263 : vector<1x8xf32> to vector<8x8xf32>
      %265 = arith.addf %261, %264 : vector<8x8xf32>
      %266 = arith.truncf %258 : vector<8x8xf32> to vector<8x8xbf16>
      %c2_142 = arith.constant 2 : index
      %c0_143 = arith.constant 0 : index
      %c0_144 = arith.constant 0 : index
      %267 = vector.load %arg24[%c2_142, %c0_143, %c0_144] : memref<4x8x8xbf16, #tpu.memory_space<vmem>>, vector<1x8x8xbf16>
      %268 = vector.shape_cast %267 : vector<1x8x8xbf16> to vector<8x8xbf16>
      %269 = vector.shape_cast %266 : vector<8x8xbf16> to vector<1x8x8xbf16>
      tpu.vector_store %arg24[%c2_142, %c0_143, %c0_144], %269 {strides = array<i32>} : memref<4x8x8xbf16, #tpu.memory_space<vmem>>, vector<1x8x8xbf16>,
      %270 = arith.truncf %265 : vector<8x8xf32> to vector<8x8xbf16>
      %c2_145 = arith.constant 2 : index
      %c0_146 = arith.constant 0 : index
      %c0_147 = arith.constant 0 : index
      %271 = vector.load %arg25[%c2_145, %c0_146, %c0_147] : memref<4x8x8xbf16, #tpu.memory_space<vmem>>, vector<1x8x8xbf16>
      %272 = vector.shape_cast %271 : vector<1x8x8xbf16> to vector<8x8xbf16>
      %273 = vector.shape_cast %270 : vector<8x8xbf16> to vector<1x8x8xbf16>
      tpu.vector_store %arg25[%c2_145, %c0_146, %c0_147], %273 {strides = array<i32>} : memref<4x8x8xbf16, #tpu.memory_space<vmem>>, vector<1x8x8xbf16>,
      %c3_148 = arith.constant 3 : index
      %c0_149 = arith.constant 0 : index
      %c0_150 = arith.constant 0 : index
      %274 = vector.load %arg8[%c3_148, %c0_149, %c0_150] : memref<4x32x8xbf16, #tpu.memory_space<vmem>>, vector<1x32x8xbf16>
      %275 = vector.shape_cast %274 : vector<1x32x8xbf16> to vector<32x8xbf16>
      %cst_151 = arith.constant dense<0.000000e+00> : vector<8x8xf32>
      %276 = tpu.matmul %207, %275, %cst_151 {dimension_numbers = #tpu.dot_dimension_numbers<[1], [0], [0], [1], [0, 0, 1, 1], [], []>} : vector<8x32xbf16>, vector<32x8xbf16>, vector<8x8xf32> -> vector<8x8xf32>
      %277 = vector.extract_strided_slice %5 {offsets = [3, 0, 0], sizes = [1, 1, 8], strides = [1, 1, 1]} : vector<4x1x8xf32> to vector<1x1x8xf32>
      %278 = vector.shape_cast %277 : vector<1x1x8xf32> to vector<1x8xf32>
      %279 = vector.broadcast %278 : vector<1x8xf32> to vector<8x8xf32>
      %280 = arith.addf %276, %279 : vector<8x8xf32>
      %c3_152 = arith.constant 3 : index
      %c0_153 = arith.constant 0 : index
      %c0_154 = arith.constant 0 : index
      %281 = vector.load %arg10[%c3_152, %c0_153, %c0_154] : memref<4x32x8xbf16, #tpu.memory_space<vmem>>, vector<1x32x8xbf16>
      %282 = vector.shape_cast %281 : vector<1x32x8xbf16> to vector<32x8xbf16>
      %cst_155 = arith.constant dense<0.000000e+00> : vector<8x8xf32>
      %283 = tpu.matmul %207, %282, %cst_155 {dimension_numbers = #tpu.dot_dimension_numbers<[1], [0], [0], [1], [0, 0, 1, 1], [], []>} : vector<8x32xbf16>, vector<32x8xbf16>, vector<8x8xf32> -> vector<8x8xf32>
      %284 = vector.extract_strided_slice %6 {offsets = [3, 0, 0], sizes = [1, 1, 8], strides = [1, 1, 1]} : vector<4x1x8xf32> to vector<1x1x8xf32>
      %285 = vector.shape_cast %284 : vector<1x1x8xf32> to vector<1x8xf32>
      %286 = vector.broadcast %285 : vector<1x8xf32> to vector<8x8xf32>
      %287 = arith.addf %283, %286 : vector<8x8xf32>
      %288 = arith.truncf %280 : vector<8x8xf32> to vector<8x8xbf16>
      %c3_156 = arith.constant 3 : index
      %c0_157 = arith.constant 0 : index
      %c0_158 = arith.constant 0 : index
      %289 = vector.load %arg24[%c3_156, %c0_157, %c0_158] : memref<4x8x8xbf16, #tpu.memory_space<vmem>>, vector<1x8x8xbf16>
      %290 = vector.shape_cast %289 : vector<1x8x8xbf16> to vector<8x8xbf16>
      %291 = vector.shape_cast %288 : vector<8x8xbf16> to vector<1x8x8xbf16>
      tpu.vector_store %arg24[%c3_156, %c0_157, %c0_158], %291 {strides = array<i32>} : memref<4x8x8xbf16, #tpu.memory_space<vmem>>, vector<1x8x8xbf16>,
      %292 = arith.truncf %287 : vector<8x8xf32> to vector<8x8xbf16>
      %c3_159 = arith.constant 3 : index
      %c0_160 = arith.constant 0 : index
      %c0_161 = arith.constant 0 : index
      %293 = vector.load %arg25[%c3_159, %c0_160, %c0_161] : memref<4x8x8xbf16, #tpu.memory_space<vmem>>, vector<1x8x8xbf16>
      %294 = vector.shape_cast %293 : vector<1x8x8xbf16> to vector<8x8xbf16>
      %295 = vector.shape_cast %292 : vector<8x8xbf16> to vector<1x8x8xbf16>
      tpu.vector_store %arg25[%c3_159, %c0_160, %c0_161], %295 {strides = array<i32>} : memref<4x8x8xbf16, #tpu.memory_space<vmem>>, vector<1x8x8xbf16>,
    } else {
    }
    %c0_22 = arith.constant 0 : index
    %c0_23 = arith.constant 0 : index
    %c0_24 = arith.constant 0 : index
    %13 = vector.load %arg2[%c0_22, %c0_23, %c0_24] : memref<1x8x32xf32, #tpu.memory_space<vmem>>, vector<1x8x32xf32>
    %14 = vector.shape_cast %13 : vector<1x8x32xf32> to vector<8x32xf32>
    %cst = arith.constant dense<0.000000e+00> : vector<8xf32>
    %15 = vector.multi_reduction <add>, %14, %cst [1] : vector<8x32xf32> to vector<8xf32>
    %16 = vector.shape_cast %15 : vector<8xf32> to vector<8x1xf32>
    %cst_25 = arith.constant 3.200000e+01 : f32
    %17 = vector.broadcast %cst_25 : f32 to vector<8x1xf32>
    %18 = arith.divf %16, %17 : vector<8x1xf32>
    %19 = vector.broadcast %18 : vector<8x1xf32> to vector<8x32xf32>
    %20 = arith.subf %14, %19 : vector<8x32xf32>
    %21 = arith.mulf %20, %20 : vector<8x32xf32>
    %cst_26 = arith.constant dense<0.000000e+00> : vector<8xf32>
    %22 = vector.multi_reduction <add>, %21, %cst_26 [1] : vector<8x32xf32> to vector<8xf32>
    %23 = vector.shape_cast %22 : vector<8xf32> to vector<8x1xf32>
    %cst_27 = arith.constant 3.200000e+01 : f32
    %24 = vector.broadcast %cst_27 : f32 to vector<8x1xf32>
    %25 = arith.divf %23, %24 : vector<8x1xf32>
    %26 = vector.broadcast %18 : vector<8x1xf32> to vector<8x32xf32>
    %27 = arith.subf %14, %26 : vector<8x32xf32>
    %cst_28 = arith.constant 9.99999974E-6 : f32
    %28 = vector.broadcast %cst_28 : f32 to vector<8x1xf32>
    %29 = arith.addf %25, %28 : vector<8x1xf32>
    %30 = math.rsqrt %29 : vector<8x1xf32>
    %31 = vector.broadcast %30 : vector<8x1xf32> to vector<8x32xf32>
    %32 = arith.mulf %27, %31 : vector<8x32xf32>
    %33 = vector.broadcast %0 : vector<1x32xf32> to vector<8x32xf32>
    %34 = arith.mulf %32, %33 : vector<8x32xf32>
    %35 = vector.broadcast %1 : vector<1x32xf32> to vector<8x32xf32>
    %36 = arith.addf %34, %35 : vector<8x32xf32>
    %37 = arith.truncf %36 : vector<8x32xf32> to vector<8x32xbf16>
    %c0_29 = arith.constant 0 : index
    %c0_30 = arith.constant 0 : index
    %c0_31 = arith.constant 0 : index
    %38 = vector.load %arg6[%c0_29, %c0_30, %c0_31] : memref<4x32x8xbf16, #tpu.memory_space<vmem>>, vector<1x32x8xbf16>
    %39 = vector.shape_cast %38 : vector<1x32x8xbf16> to vector<32x8xbf16>
    %cst_32 = arith.constant dense<0.000000e+00> : vector<8x8xf32>
    %40 = tpu.matmul %37, %39, %cst_32 {dimension_numbers = #tpu.dot_dimension_numbers<[1], [0], [0], [1], [0, 0, 1, 1], [], []>} : vector<8x32xbf16>, vector<32x8xbf16>, vector<8x8xf32> -> vector<8x8xf32>
    %41 = vector.extract_strided_slice %4 {offsets = [0, 0, 0], sizes = [1, 1, 8], strides = [1, 1, 1]} : vector<4x1x8xf32> to vector<1x1x8xf32>
    %42 = vector.shape_cast %41 : vector<1x1x8xf32> to vector<1x8xf32>
    %43 = vector.broadcast %42 : vector<1x8xf32> to vector<8x8xf32>
    %44 = arith.addf %40, %43 : vector<8x8xf32>
    %cst_33 = arith.constant 0.353553385 : f32
    %45 = vector.broadcast %cst_33 : f32 to vector<8x8xf32>
    %46 = arith.mulf %44, %45 : vector<8x8xf32>
    %47 = arith.truncf %46 : vector<8x8xf32> to vector<8x8xbf16>
    %c1 = arith.constant 1 : index
    %c0_34 = arith.constant 0 : index
    %c0_35 = arith.constant 0 : index
    %48 = vector.load %arg6[%c1, %c0_34, %c0_35] : memref<4x32x8xbf16, #tpu.memory_space<vmem>>, vector<1x32x8xbf16>
    %49 = vector.shape_cast %48 : vector<1x32x8xbf16> to vector<32x8xbf16>
    %cst_36 = arith.constant dense<0.000000e+00> : vector<8x8xf32>
    %50 = tpu.matmul %37, %49, %cst_36 {dimension_numbers = #tpu.dot_dimension_numbers<[1], [0], [0], [1], [0, 0, 1, 1], [], []>} : vector<8x32xbf16>, vector<32x8xbf16>, vector<8x8xf32> -> vector<8x8xf32>
    %51 = vector.extract_strided_slice %4 {offsets = [1, 0, 0], sizes = [1, 1, 8], strides = [1, 1, 1]} : vector<4x1x8xf32> to vector<1x1x8xf32>
    %52 = vector.shape_cast %51 : vector<1x1x8xf32> to vector<1x8xf32>
    %53 = vector.broadcast %52 : vector<1x8xf32> to vector<8x8xf32>
    %54 = arith.addf %50, %53 : vector<8x8xf32>
    %cst_37 = arith.constant 0.353553385 : f32
    %55 = vector.broadcast %cst_37 : f32 to vector<8x8xf32>
    %56 = arith.mulf %54, %55 : vector<8x8xf32>
    %57 = arith.truncf %56 : vector<8x8xf32> to vector<8x8xbf16>
    %c2 = arith.constant 2 : index
    %c0_38 = arith.constant 0 : index
    %c0_39 = arith.constant 0 : index
    %58 = vector.load %arg6[%c2, %c0_38, %c0_39] : memref<4x32x8xbf16, #tpu.memory_space<vmem>>, vector<1x32x8xbf16>
    %59 = vector.shape_cast %58 : vector<1x32x8xbf16> to vector<32x8xbf16>
    %cst_40 = arith.constant dense<0.000000e+00> : vector<8x8xf32>
    %60 = tpu.matmul %37, %59, %cst_40 {dimension_numbers = #tpu.dot_dimension_numbers<[1], [0], [0], [1], [0, 0, 1, 1], [], []>} : vector<8x32xbf16>, vector<32x8xbf16>, vector<8x8xf32> -> vector<8x8xf32>
    %61 = vector.extract_strided_slice %4 {offsets = [2, 0, 0], sizes = [1, 1, 8], strides = [1, 1, 1]} : vector<4x1x8xf32> to vector<1x1x8xf32>
    %62 = vector.shape_cast %61 : vector<1x1x8xf32> to vector<1x8xf32>
    %63 = vector.broadcast %62 : vector<1x8xf32> to vector<8x8xf32>
    %64 = arith.addf %60, %63 : vector<8x8xf32>
    %cst_41 = arith.constant 0.353553385 : f32
    %65 = vector.broadcast %cst_41 : f32 to vector<8x8xf32>
    %66 = arith.mulf %64, %65 : vector<8x8xf32>
    %67 = arith.truncf %66 : vector<8x8xf32> to vector<8x8xbf16>
    %c3 = arith.constant 3 : index
    %c0_42 = arith.constant 0 : index
    %c0_43 = arith.constant 0 : index
    %68 = vector.load %arg6[%c3, %c0_42, %c0_43] : memref<4x32x8xbf16, #tpu.memory_space<vmem>>, vector<1x32x8xbf16>
    %69 = vector.shape_cast %68 : vector<1x32x8xbf16> to vector<32x8xbf16>
    %cst_44 = arith.constant dense<0.000000e+00> : vector<8x8xf32>
    %70 = tpu.matmul %37, %69, %cst_44 {dimension_numbers = #tpu.dot_dimension_numbers<[1], [0], [0], [1], [0, 0, 1, 1], [], []>} : vector<8x32xbf16>, vector<32x8xbf16>, vector<8x8xf32> -> vector<8x8xf32>
    %71 = vector.extract_strided_slice %4 {offsets = [3, 0, 0], sizes = [1, 1, 8], strides = [1, 1, 1]} : vector<4x1x8xf32> to vector<1x1x8xf32>
    %72 = vector.shape_cast %71 : vector<1x1x8xf32> to vector<1x8xf32>
    %73 = vector.broadcast %72 : vector<1x8xf32> to vector<8x8xf32>
    %74 = arith.addf %70, %73 : vector<8x8xf32>
    %cst_45 = arith.constant 0.353553385 : f32
    %75 = vector.broadcast %cst_45 : f32 to vector<8x8xf32>
    %76 = arith.mulf %74, %75 : vector<8x8xf32>
    %77 = arith.truncf %76 : vector<8x8xf32> to vector<8x8xbf16>
    %78 = vector.shape_cast %47 : vector<8x8xbf16> to vector<1x8x8xbf16>
    %79 = vector.shape_cast %57 : vector<8x8xbf16> to vector<1x8x8xbf16>
    %80 = vector.shape_cast %67 : vector<8x8xbf16> to vector<1x8x8xbf16>
    %81 = vector.shape_cast %77 : vector<8x8xbf16> to vector<1x8x8xbf16>
    %82 = tpu.concatenate %78, %79, %80, %81 in 0 : vector<1x8x8xbf16>, vector<1x8x8xbf16>, vector<1x8x8xbf16>, vector<1x8x8xbf16> -> vector<4x8x8xbf16>
    %c0_46 = arith.constant 0 : index
    %c0_47 = arith.constant 0 : index
    %c0_48 = arith.constant 0 : index
    %83 = vector.load %arg24[%c0_46, %c0_47, %c0_48] : memref<4x8x8xbf16, #tpu.memory_space<vmem>>, vector<4x8x8xbf16>
    "tpu.trace_start"() <{level = 10 : i32, message = "hqd,hkd->hqk"}> : () -> ()
    %cst_49 = arith.constant dense<0.000000e+00> : vector<4x8x8xf32>
    %84 = tpu.matmul %82, %83, %cst_49 {dimension_numbers = #tpu.dot_dimension_numbers<[2], [2], [1], [1], [0, 0, 0, 1, 1, 1], [0], [0]>} : vector<4x8x8xbf16>, vector<4x8x8xbf16>, vector<4x8x8xf32> -> vector<4x8x8xf32>
    "tpu.trace_stop"() : () -> ()
    %85 = vector.shape_cast %9 : vector<1x8xf32> to vector<1x1x8xf32>
    %86 = vector.broadcast %85 : vector<1x1x8xf32> to vector<4x8x8xf32>
    %87 = arith.addf %84, %86 : vector<4x8x8xf32>
    %cst_50 = arith.constant dense<0xFF800000> : vector<4x8xf32>
    %88 = vector.multi_reduction <maximumf>, %87, %cst_50 [2] : vector<4x8x8xf32> to vector<4x8xf32>
    %89 = vector.shape_cast %88 : vector<4x8xf32> to vector<4x8x1xf32>
    %90 = vector.broadcast %89 : vector<4x8x1xf32> to vector<4x8x8xf32>
    %91 = arith.subf %87, %90 : vector<4x8x8xf32>
    %92 = math.exp %91 : vector<4x8x8xf32>
    %cst_51 = arith.constant dense<0.000000e+00> : vector<4x8xf32>
    %93 = vector.multi_reduction <add>, %92, %cst_51 [2] : vector<4x8x8xf32> to vector<4x8xf32>
    %94 = vector.shape_cast %93 : vector<4x8xf32> to vector<4x8x1xf32>
    %95 = tpu.reciprocal %94 {approx = true} : vector<4x8x1xf32> -> vector<4x8x1xf32>
    %96 = vector.broadcast %95 : vector<4x8x1xf32> to vector<4x8x8xf32>
    %97 = arith.mulf %92, %96 : vector<4x8x8xf32>
    %98 = arith.truncf %97 : vector<4x8x8xf32> to vector<4x8x8xbf16>
    %c0_52 = arith.constant 0 : index
    %c0_53 = arith.constant 0 : index
    %c0_54 = arith.constant 0 : index
    %c0_55 = arith.constant 0 : index
    %99 = vector.load %arg23[%c0_52, %c0_53, %c0_54, %c0_55] : memref<1x4x8x8xbf16, #tpu.memory_space<vmem>>, vector<1x4x8x8xbf16>
    %100 = vector.shape_cast %99 : vector<1x4x8x8xbf16> to vector<4x8x8xbf16>
    %101 = vector.shape_cast %98 : vector<4x8x8xbf16> to vector<1x4x8x8xbf16>
    tpu.vector_store %arg23[%c0_52, %c0_53, %c0_54, %c0_55], %101 {strides = array<i32>} : memref<1x4x8x8xbf16, #tpu.memory_space<vmem>>, vector<1x4x8x8xbf16>,
    %102 = arith.truncf %97 : vector<4x8x8xf32> to vector<4x8x8xbf16>
    %c0_56 = arith.constant 0 : index
    %c0_57 = arith.constant 0 : index
    %c0_58 = arith.constant 0 : index
    %103 = vector.load %arg25[%c0_56, %c0_57, %c0_58] : memref<4x8x8xbf16, #tpu.memory_space<vmem>>, vector<4x8x8xbf16>
    "tpu.trace_start"() <{level = 10 : i32, message = "hqk,hkd->hqd"}> : () -> ()
    %cst_59 = arith.constant dense<0.000000e+00> : vector<4x8x8xf32>
    %104 = tpu.matmul %102, %103, %cst_59 {dimension_numbers = #tpu.dot_dimension_numbers<[2], [1], [1], [2], [0, 0, 0, 1, 1, 2], [0], [0]>} : vector<4x8x8xbf16>, vector<4x8x8xbf16>, vector<4x8x8xf32> -> vector<4x8x8xf32>
    "tpu.trace_stop"() : () -> ()
    %105 = arith.truncf %104 : vector<4x8x8xf32> to vector<4x8x8xbf16>
    %106 = vector.extract_strided_slice %105 {offsets = [0, 0, 0], sizes = [1, 8, 8], strides = [1, 1, 1]} : vector<4x8x8xbf16> to vector<1x8x8xbf16>
    %107 = vector.shape_cast %106 : vector<1x8x8xbf16> to vector<8x8xbf16>
    %c0_60 = arith.constant 0 : index
    %c0_61 = arith.constant 0 : index
    %c0_62 = arith.constant 0 : index
    %108 = vector.load %arg12[%c0_60, %c0_61, %c0_62] : memref<4x8x32xbf16, #tpu.memory_space<vmem>>, vector<1x8x32xbf16>
    %109 = vector.shape_cast %108 : vector<1x8x32xbf16> to vector<8x32xbf16>
    %cst_63 = arith.constant dense<0.000000e+00> : vector<8x32xf32>
    %110 = tpu.matmul %107, %109, %cst_63 {dimension_numbers = #tpu.dot_dimension_numbers<[1], [0], [0], [1], [0, 0, 1, 1], [], []>} : vector<8x8xbf16>, vector<8x32xbf16>, vector<8x32xf32> -> vector<8x32xf32>
    %111 = vector.broadcast %7 : vector<1x32xf32> to vector<8x32xf32>
    %112 = arith.addf %111, %110 : vector<8x32xf32>
    %113 = vector.extract_strided_slice %105 {offsets = [1, 0, 0], sizes = [1, 8, 8], strides = [1, 1, 1]} : vector<4x8x8xbf16> to vector<1x8x8xbf16>
    %114 = vector.shape_cast %113 : vector<1x8x8xbf16> to vector<8x8xbf16>
    %c1_64 = arith.constant 1 : index
    %c0_65 = arith.constant 0 : index
    %c0_66 = arith.constant 0 : index
    %115 = vector.load %arg12[%c1_64, %c0_65, %c0_66] : memref<4x8x32xbf16, #tpu.memory_space<vmem>>, vector<1x8x32xbf16>
    %116 = vector.shape_cast %115 : vector<1x8x32xbf16> to vector<8x32xbf16>
    %cst_67 = arith.constant dense<0.000000e+00> : vector<8x32xf32>
    %117 = tpu.matmul %114, %116, %cst_67 {dimension_numbers = #tpu.dot_dimension_numbers<[1], [0], [0], [1], [0, 0, 1, 1], [], []>} : vector<8x8xbf16>, vector<8x32xbf16>, vector<8x32xf32> -> vector<8x32xf32>
    %118 = arith.addf %112, %117 : vector<8x32xf32>
    %119 = vector.extract_strided_slice %105 {offsets = [2, 0, 0], sizes = [1, 8, 8], strides = [1, 1, 1]} : vector<4x8x8xbf16> to vector<1x8x8xbf16>
    %120 = vector.shape_cast %119 : vector<1x8x8xbf16> to vector<8x8xbf16>
    %c2_68 = arith.constant 2 : index
    %c0_69 = arith.constant 0 : index
    %c0_70 = arith.constant 0 : index
    %121 = vector.load %arg12[%c2_68, %c0_69, %c0_70] : memref<4x8x32xbf16, #tpu.memory_space<vmem>>, vector<1x8x32xbf16>
    %122 = vector.shape_cast %121 : vector<1x8x32xbf16> to vector<8x32xbf16>
    %cst_71 = arith.constant dense<0.000000e+00> : vector<8x32xf32>
    %123 = tpu.matmul %120, %122, %cst_71 {dimension_numbers = #tpu.dot_dimension_numbers<[1], [0], [0], [1], [0, 0, 1, 1], [], []>} : vector<8x8xbf16>, vector<8x32xbf16>, vector<8x32xf32> -> vector<8x32xf32>
    %124 = arith.addf %118, %123 : vector<8x32xf32>
    %125 = vector.extract_strided_slice %105 {offsets = [3, 0, 0], sizes = [1, 8, 8], strides = [1, 1, 1]} : vector<4x8x8xbf16> to vector<1x8x8xbf16>
    %126 = vector.shape_cast %125 : vector<1x8x8xbf16> to vector<8x8xbf16>
    %c3_72 = arith.constant 3 : index
    %c0_73 = arith.constant 0 : index
    %c0_74 = arith.constant 0 : index
    %127 = vector.load %arg12[%c3_72, %c0_73, %c0_74] : memref<4x8x32xbf16, #tpu.memory_space<vmem>>, vector<1x8x32xbf16>
    %128 = vector.shape_cast %127 : vector<1x8x32xbf16> to vector<8x32xbf16>
    %cst_75 = arith.constant dense<0.000000e+00> : vector<8x32xf32>
    %129 = tpu.matmul %126, %128, %cst_75 {dimension_numbers = #tpu.dot_dimension_numbers<[1], [0], [0], [1], [0, 0, 1, 1], [], []>} : vector<8x8xbf16>, vector<8x32xbf16>, vector<8x32xf32> -> vector<8x32xf32>
    %130 = arith.addf %124, %129 : vector<8x32xf32>
    %131 = arith.addf %14, %130 : vector<8x32xf32>
    %cst_76 = arith.constant dense<0.000000e+00> : vector<8xf32>
    %132 = vector.multi_reduction <add>, %131, %cst_76 [1] : vector<8x32xf32> to vector<8xf32>
    %133 = vector.shape_cast %132 : vector<8xf32> to vector<8x1xf32>
    %cst_77 = arith.constant 3.200000e+01 : f32
    %134 = vector.broadcast %cst_77 : f32 to vector<8x1xf32>
    %135 = arith.divf %133, %134 : vector<8x1xf32>
    %136 = vector.broadcast %135 : vector<8x1xf32> to vector<8x32xf32>
    %137 = arith.subf %131, %136 : vector<8x32xf32>
    %138 = arith.mulf %137, %137 : vector<8x32xf32>
    %cst_78 = arith.constant dense<0.000000e+00> : vector<8xf32>
    %139 = vector.multi_reduction <add>, %138, %cst_78 [1] : vector<8x32xf32> to vector<8xf32>
    %140 = vector.shape_cast %139 : vector<8xf32> to vector<8x1xf32>
    %cst_79 = arith.constant 3.200000e+01 : f32
    %141 = vector.broadcast %cst_79 : f32 to vector<8x1xf32>
    %142 = arith.divf %140, %141 : vector<8x1xf32>
    %143 = vector.broadcast %135 : vector<8x1xf32> to vector<8x32xf32>
    %144 = arith.subf %131, %143 : vector<8x32xf32>
    %cst_80 = arith.constant 9.99999974E-6 : f32
    %145 = vector.broadcast %cst_80 : f32 to vector<8x1xf32>
    %146 = arith.addf %142, %145 : vector<8x1xf32>
    %147 = math.rsqrt %146 : vector<8x1xf32>
    %148 = vector.broadcast %147 : vector<8x1xf32> to vector<8x32xf32>
    %149 = arith.mulf %144, %148 : vector<8x32xf32>
    %150 = vector.broadcast %2 : vector<1x32xf32> to vector<8x32xf32>
    %151 = arith.mulf %149, %150 : vector<8x32xf32>
    %152 = vector.broadcast %3 : vector<1x32xf32> to vector<8x32xf32>
    %153 = arith.addf %151, %152 : vector<8x32xf32>
    %154 = arith.truncf %153 : vector<8x32xf32> to vector<8x32xbf16>
    %c0_81 = arith.constant 0 : index
    %c0_82 = arith.constant 0 : index
    %155 = vector.load %arg16[%c0_81, %c0_82] : memref<32x64xbf16, #tpu.memory_space<vmem>>, vector<32x64xbf16>
    %cst_83 = arith.constant dense<0.000000e+00> : vector<8x64xf32>
    %156 = tpu.matmul %154, %155, %cst_83 {dimension_numbers = #tpu.dot_dimension_numbers<[1], [0], [0], [1], [0, 0, 1, 1], [], []>} : vector<8x32xbf16>, vector<32x64xbf16>, vector<8x64xf32> -> vector<8x64xf32>
    %c0_84 = arith.constant 0 : index
    %c0_85 = arith.constant 0 : index
    %157 = vector.load %arg17[%c0_84, %c0_85] : memref<1x64xf32, #tpu.memory_space<vmem>>, vector<1x64xf32>
    %158 = vector.broadcast %157 : vector<1x64xf32> to vector<8x64xf32>
    %159 = arith.addf %156, %158 : vector<8x64xf32>
    %160 = arith.mulf %159, %159 : vector<8x64xf32>
    %161 = arith.mulf %159, %160 : vector<8x64xf32>
    %cst_86 = arith.constant 4.471500e-02 : f32
    %162 = vector.broadcast %cst_86 : f32 to vector<8x64xf32>
    %163 = arith.mulf %162, %161 : vector<8x64xf32>
    %164 = arith.addf %159, %163 : vector<8x64xf32>
    %cst_87 = arith.constant 0.797884583 : f32
    %165 = vector.broadcast %cst_87 : f32 to vector<8x64xf32>
    %166 = arith.mulf %165, %164 : vector<8x64xf32>
    %167 = math.tanh %166 : vector<8x64xf32>
    %cst_88 = arith.constant 1.000000e+00 : f32
    %168 = vector.broadcast %cst_88 : f32 to vector<8x64xf32>
    %169 = arith.addf %168, %167 : vector<8x64xf32>
    %cst_89 = arith.constant 5.000000e-01 : f32
    %170 = vector.broadcast %cst_89 : f32 to vector<8x64xf32>
    %171 = arith.mulf %170, %169 : vector<8x64xf32>
    %172 = arith.mulf %159, %171 : vector<8x64xf32>
    %173 = arith.truncf %172 : vector<8x64xf32> to vector<8x64xbf16>
    %c0_90 = arith.constant 0 : index
    %c0_91 = arith.constant 0 : index
    %174 = vector.load %arg18[%c0_90, %c0_91] : memref<64x32xbf16, #tpu.memory_space<vmem>>, vector<64x32xbf16>
    %cst_92 = arith.constant dense<0.000000e+00> : vector<8x32xf32>
    %175 = tpu.matmul %173, %174, %cst_92 {dimension_numbers = #tpu.dot_dimension_numbers<[1], [0], [0], [1], [0, 0, 1, 1], [], []>} : vector<8x64xbf16>, vector<64x32xbf16>, vector<8x32xf32> -> vector<8x32xf32>
    %176 = arith.addf %131, %175 : vector<8x32xf32>
    %c0_93 = arith.constant 0 : index
    %c0_94 = arith.constant 0 : index
    %177 = vector.load %arg19[%c0_93, %c0_94] : memref<1x32xf32, #tpu.memory_space<vmem>>, vector<1x32xf32>
    %178 = vector.broadcast %177 : vector<1x32xf32> to vector<8x32xf32>
    %179 = arith.addf %176, %178 : vector<8x32xf32>
    %c0_95 = arith.constant 0 : index
    %c0_96 = arith.constant 0 : index
    %c0_97 = arith.constant 0 : index
    %180 = vector.load %arg22[%c0_95, %c0_96, %c0_97] : memref<1x8x32xf32, #tpu.memory_space<vmem>>, vector<1x8x32xf32>
    %181 = vector.shape_cast %180 : vector<1x8x32xf32> to vector<8x32xf32>
    %182 = vector.shape_cast %179 : vector<8x32xf32> to vector<1x8x32xf32>
    tpu.vector_store %arg22[%c0_95, %c0_96, %c0_97], %182 {strides = array<i32>} : memref<1x8x32xf32, #tpu.memory_space<vmem>>, vector<1x8x32xf32>,
    return
  }
  func.func @transform_0(%arg0: i32, %arg1: i32) -> (i32, i32, i32) {
    %c0_i32 = arith.constant 0 : i32
    %c0_i32_0 = arith.constant 0 : i32
    %c0_i32_1 = arith.constant 0 : i32
    return %arg0, %c0_i32, %c0_i32_0 : i32, i32, i32
  }
  func.func @transform_1(%arg0: i32, %arg1: i32) -> (i32, i32, i32) {
    %c0_i32 = arith.constant 0 : i32
    %c0_i32_0 = arith.constant 0 : i32
    %c0_i32_1 = arith.constant 0 : i32
    return %arg0, %c0_i32, %c0_i32_0 : i32, i32, i32
  }
  func.func @transform_2(%arg0: i32, %arg1: i32) -> (i32, i32) {
    %c0_i32 = arith.constant 0 : i32
    %c0_i32_0 = arith.constant 0 : i32
    %c0_i32_1 = arith.constant 0 : i32
    return %c0_i32, %c0_i32_0 : i32, i32
  }
  func.func @transform_3(%arg0: i32, %arg1: i32) -> (i32, i32) {
    %c0_i32 = arith.constant 0 : i32
    %c0_i32_0 = arith.constant 0 : i32
    %c0_i32_1 = arith.constant 0 : i32
    return %c0_i32, %c0_i32_0 : i32, i32
  }
  func.func @transform_4(%arg0: i32, %arg1: i32) -> (i32, i32, i32) {
    %c0_i32 = arith.constant 0 : i32
    %c0_i32_0 = arith.constant 0 : i32
    %c0_i32_1 = arith.constant 0 : i32
    %c0_i32_2 = arith.constant 0 : i32
    return %c0_i32, %c0_i32_0, %c0_i32_1 : i32, i32, i32
  }
  func.func @transform_5(%arg0: i32, %arg1: i32) -> (i32, i32, i32) {
    %c0_i32 = arith.constant 0 : i32
    %c0_i32_0 = arith.constant 0 : i32
    %c0_i32_1 = arith.constant 0 : i32
    %c0_i32_2 = arith.constant 0 : i32
    return %c0_i32, %c0_i32_0, %c0_i32_1 : i32, i32, i32
  }
  func.func @transform_6(%arg0: i32, %arg1: i32) -> (i32, i32, i32) {
    %c0_i32 = arith.constant 0 : i32
    %c0_i32_0 = arith.constant 0 : i32
    %c0_i32_1 = arith.constant 0 : i32
    %c0_i32_2 = arith.constant 0 : i32
    return %c0_i32, %c0_i32_0, %c0_i32_1 : i32, i32, i32
  }
  func.func @transform_7(%arg0: i32, %arg1: i32) -> (i32, i32, i32) {
    %c0_i32 = arith.constant 0 : i32
    %c0_i32_0 = arith.constant 0 : i32
    %c0_i32_1 = arith.constant 0 : i32
    %c0_i32_2 = arith.constant 0 : i32
    return %c0_i32, %c0_i32_0, %c0_i32_1 : i32, i32, i32
  }
  func.func @transform_8(%arg0: i32, %arg1: i32) -> (i32, i32, i32) {
    %c0_i32 = arith.constant 0 : i32
    %c0_i32_0 = arith.constant 0 : i32
    %c0_i32_1 = arith.constant 0 : i32
    %c0_i32_2 = arith.constant 0 : i32
    return %c0_i32, %c0_i32_0, %c0_i32_1 : i32, i32, i32
  }
  func.func @transform_9(%arg0: i32, %arg1: i32) -> (i32, i32, i32) {
    %c0_i32 = arith.constant 0 : i32
    %c0_i32_0 = arith.constant 0 : i32
    %c0_i32_1 = arith.constant 0 : i32
    %c0_i32_2 = arith.constant 0 : i32
    return %c0_i32, %c0_i32_0, %c0_i32_1 : i32, i32, i32
  }
  func.func @transform_10(%arg0: i32, %arg1: i32) -> (i32, i32, i32) {
    %c0_i32 = arith.constant 0 : i32
    %c0_i32_0 = arith.constant 0 : i32
    %c0_i32_1 = arith.constant 0 : i32
    %c0_i32_2 = arith.constant 0 : i32
    return %c0_i32, %c0_i32_0, %c0_i32_1 : i32, i32, i32
  }
  func.func @transform_11(%arg0: i32, %arg1: i32) -> (i32, i32) {
    %c0_i32 = arith.constant 0 : i32
    %c0_i32_0 = arith.constant 0 : i32
    %c0_i32_1 = arith.constant 0 : i32
    return %c0_i32, %c0_i32_0 : i32, i32
  }
  func.func @transform_12(%arg0: i32, %arg1: i32) -> (i32, i32) {
    %c0_i32 = arith.constant 0 : i32
    %c0_i32_0 = arith.constant 0 : i32
    %c0_i32_1 = arith.constant 0 : i32
    return %c0_i32, %c0_i32_0 : i32, i32
  }
  func.func @transform_13(%arg0: i32, %arg1: i32) -> (i32, i32) {
    %c0_i32 = arith.constant 0 : i32
    %c0_i32_0 = arith.constant 0 : i32
    %c0_i32_1 = arith.constant 0 : i32
    return %c0_i32, %c0_i32_0 : i32, i32
  }
  func.func @transform_14(%arg0: i32, %arg1: i32) -> (i32, i32) {
    %c0_i32 = arith.constant 0 : i32
    %c0_i32_0 = arith.constant 0 : i32
    %c0_i32_1 = arith.constant 0 : i32
    return %c0_i32, %c0_i32_0 : i32, i32
  }
  func.func @transform_15(%arg0: i32, %arg1: i32) -> (i32, i32) {
    %c0_i32 = arith.constant 0 : i32
    %c0_i32_0 = arith.constant 0 : i32
    %c0_i32_1 = arith.constant 0 : i32
    return %c0_i32, %c0_i32_0 : i32, i32
  }
  func.func @transform_16(%arg0: i32, %arg1: i32) -> (i32, i32) {
    %c0_i32 = arith.constant 0 : i32
    %c0_i32_0 = arith.constant 0 : i32
    %c0_i32_1 = arith.constant 0 : i32
    return %c0_i32, %c0_i32_0 : i32, i32
  }
  func.func @transform_17(%arg0: i32, %arg1: i32) -> (i32, i32) {
    %c0_i32 = arith.constant 0 : i32
    %c0_i32_0 = arith.constant 0 : i32
    %c0_i32_1 = arith.constant 0 : i32
    return %c0_i32, %c0_i32_0 : i32, i32
  }
  func.func @transform_18(%arg0: i32, %arg1: i32) -> (i32, i32) {
    %c0_i32 = arith.constant 0 : i32
    %c0_i32_0 = arith.constant 0 : i32
    %c0_i32_1 = arith.constant 0 : i32
    return %c0_i32, %c0_i32_0 : i32, i32
  }
  func.func @transform_19(%arg0: i32, %arg1: i32) -> (i32, i32) {
    %c0_i32 = arith.constant 0 : i32
    %c0_i32_0 = arith.constant 0 : i32
    %c0_i32_1 = arith.constant 0 : i32
    return %c0_i32, %c0_i32_0 : i32, i32
  }
  func.func @transform_20(%arg0: i32, %arg1: i32) -> (i32, i32, i32) {
    %c0_i32 = arith.constant 0 : i32
    %c0_i32_0 = arith.constant 0 : i32
    return %arg0, %arg1, %c0_i32 : i32, i32, i32
  }
  func.func @transform_21(%arg0: i32, %arg1: i32) -> (i32, i32, i32, i32) {
    %c0_i32 = arith.constant 0 : i32
    %c0_i32_0 = arith.constant 0 : i32
    %c0_i32_1 = arith.constant 0 : i32
    return %arg0, %c0_i32, %arg1, %c0_i32_0 : i32, i32, i32, i32
  }
}

</mosaic_0001>

<bundles_post_ra>
// kernel: tpu_custom_call.1
= control target key start
LH: loop header
LB: loop body
LE: loop exit
PB: predicated region body
PF: predicated region fallthrough
CT: control target
= control target key end

     0   :  { %s2776_s0 = inlined_call_operand.vmem [shape: f32[2,8,32], index: 0, kind: input, shape index: {}]   ;;  %s2777_s1 = inlined_call_operand.vmem [shape: f32[2,1,8], index: 1, kind: input, shape index: {}]   ;;  %s2778_s2 = inlined_call_operand.vmem [shape: f32[1,32], index: 2, kind: input, shape index: {}]   ;;  %s2779_s3 = inlined_call_operand.vmem [shape: f32[1,32], index: 3, kind: input, shape index: {}]   ;;  %s2780_s4 = inlined_call_operand.vmem [shape: bf16[4,32,8], index: 4, kind: input, shape index: {}]   ;;  %s2781_s5 = inlined_call_operand.vmem [shape: f32[4,1,8], index: 5, kind: input, shape index: {}]   ;;  %s2782_s6 = inlined_call_operand.vmem [shape: bf16[4,32,8], index: 6, kind: input, shape index: {}]   ;;  %s2783_s7 = inlined_call_operand.vmem [shape: f32[4,1,8], index: 7, kind: input, shape index: {}]   ;;  %s2784_s8 = inlined_call_operand.vmem [shape: bf16[4,32,8], index: 8, kind: input, shape index: {}]   ;;  %s2785_s9 = inlined_call_operand.vmem [shape: f32[4,1,8], index: 9, kind: input, shape index: {}]   ;;  %s2786_s10 = inlined_call_operand.vmem [shape: bf16[4,8,32], index: 10, kind: input, shape index: {}]   ;;  %s2787_s11 = inlined_call_operand.vmem [shape: f32[1,32], index: 11, kind: input, shape index: {}]   ;;  %s2788_s12 = inlined_call_operand.vmem [shape: f32[1,32], index: 12, kind: input, shape index: {}]   ;;  %s2789_s13 = inlined_call_operand.vmem [shape: f32[1,32], index: 13, kind: input, shape index: {}]   ;;  %s2790_s14 = inlined_call_operand.vmem [shape: bf16[32,64], index: 14, kind: input, shape index: {}]   ;;  %s2791_s15 = inlined_call_operand.vmem [shape: f32[1,64], index: 15, kind: input, shape index: {}]   ;;  %s2792_s16 = inlined_call_operand.vmem [shape: bf16[64,32], index: 16, kind: input, shape index: {}]   ;;  %s2793_s17 = inlined_call_operand.vmem [shape: f32[1,32], index: 17, kind: input, shape index: {}]   ;;  %s2794_s18 = inlined_call_operand.vmem [shape: f32[1,32], index: 18, kind: input, shape index: {}]   ;;  %s2795_s19 = inlined_call_operand.vmem [shape: f32[1,32], index: 19, kind: input, shape index: {}]   ;;  %s2796_s20 = inlined_call_operand.hbm [shape: f32[2,8,32], index: 20, kind: output, shape index: {0}]   ;;  %s2797_s21 = inlined_call_operand.hbm [shape: bf16[2,4,8,8], index: 21, kind: output, shape index: {1}]  }
   0x1   :  { %2806 = sst [smem:[#allocation15_spill]] %s2776_s0 }
   0x2   :  { %2807 = sst [smem:[#allocation16_spill]] %s2777_s1 }
   0x3   :  { %2808 = sst [smem:[#allocation17_spill]] %s2778_s2 }
   0x4   :  { %2809 = sst [smem:[#allocation18_spill]] %s2779_s3 }
   0x5   :  { %2810 = sst [smem:[#allocation19_spill]] %s2780_s4 }
   0x6   :  { %2811 = sst [smem:[#allocation20_spill]] %s2781_s5 }
   0x7   :  { %2812 = sst [smem:[#allocation21_spill]] %s2782_s6 }
   0x8   :  { %2813 = sst [smem:[#allocation22_spill]] %s2783_s7 }
   0x9   :  { %2814 = sst [smem:[#allocation23_spill]] %s2784_s8 }
   0xa   :  { %2815 = sst [smem:[#allocation24_spill]] %s2785_s9 }
   0xb   :  { %2816 = sst [smem:[#allocation25_spill]] %s2786_s10 }
   0xc   :  { %2817 = sst [smem:[#allocation26_spill]] %s2787_s11 }
   0xd   :  { %27 = vsyncpa [#allocation5], 0 }
   0xe   :  { %29 = vsyncpa [#allocation5 + $0x1], 0 }
   0xf   :  { %30 = vsyncpa [#allocation7], 0 }
  0x10   :  { %32 = vsyncpa [#allocation7 + $0x1], 0  ;;  %s2389_s2 = smov 0   ;;  %s2391_s25 = smov 0  }
  0x11   :  { %s2393_s26 = smov 0   ;;  %s2395_s18 = smov 0  }
  0x12   :  { %s2397_s27 = smov 0   ;;  %s2399_s19 = smov 0  }
  0x13 LB: > { %2818 = sst [smem:[#allocation10_spill]] %s2262_s26  ;;  %s1824_s3 = sadd.s32 4294967295, %s2274_s19   ;;  %s2274_s19 = sphi %s2399_s19, %s38_s19   ;;  %s2270_s27 = sphi %s2397_s27, %s2843_s27   ;;  %s2266_s18 = sphi %s2395_s18, %s2842_s18   ;;  %s2262_s26 = sphi %s2393_s26, %s2841_s26   ;;  %s2258_s25 = sphi %s2391_s25, %s2845_s25   ;;  %s2254_s2 = sphi %s2389_s2, %s2844_s2  }
  0x14   : > { %2819 = sst [smem:[#allocation11_spill]] %s2270_s27  ;;  %s1825_s28 = sadd.s32 4294967294, %s2274_s19  }
  0x15   : > { %s50_s29 = sadd.s32 1, %s2270_s27  ;;  %s489_s0 = sadd.s32 1, %s2262_s26 }
  0x16   : > { %p52_p0 = scmp.ge.s32.totalorder %s50_s29, 2  ;;  %p499_p1 = scmp.ne.s32.totalorder %s2262_s26, %s2258_s25 }
  0x17   : > { %p500_p2 = scmp.eq.s32.totalorder %s1824_s3, 1  ;;  %p505_p3 = scmp.ne.s32.totalorder %s2258_s25, %s2254_s2 }
  0x18   : > { %s2847_s29 = smov (%p52_p0, %s50_s29), 0  ;;  %p506_p5 = scmp.eq.s32.totalorder %s1825_s28, 1 }
  0x19   : > { %2820 = sst [smem:[#allocation12_spill]] %s2847_s29  ;;  %p2429_p4 = por %p500_p2, %p499_p1 }
  0x1a   : > { %s484_s30 = ssub.s32 %s2270_s27, %s2847_s29  ;;  %p1828_p6 = scmp.ge.s32.totalorder %s2274_s19, 1 }
  0x1b   : > { %p487_p7 = scmp.eq.s32.totalorder %s484_s30, 0  ;;  %p2436_p8 = por %p506_p5, %p505_p3 }
  0x1c   : > { %p619_p9 = scmp.lt.s32.totalorder %s2274_s19, 3 }
  0x1d   : > { %s2822_s5 = scalar_select %p2436_p8, 1, 0 }
  0x1e   : > { %s2442_s22 = scalar_select %p487_p7, %s2262_s26, %s489_s0  }
  0x1f   : > { %2823 = sst [smem:[#allocation13_spill]] %s2822_s5  ;;  %p620_p10 = pnand %p1828_p6, %p619_p9 }
  0x20   : > { %2824 = sst [smem:[#allocation14_spill]] %s2442_s22  ;;  %p686_p11 = scmp.lt.s32.totalorder (!%p620_p10), %s2266_s18, 1 }
  0x21   : > { %623 = sbr.rel (%p620_p10) target bundleno = 1710 (0x6ae), region = 100  ;;  %s2825_s28 = sld [smem:[#allocation16_spill]] (!%p620_p10) }
  0x22   : > { %s2826_s5 = sld [smem:[#allocation15_spill]] (!%p620_p10) }
  0x23   : > { %s2827_s6 = sld [smem:[#allocation21_spill]] (!%p620_p10) }
  0x24   : > { %s2828_s8 = sld [smem:[#allocation23_spill]] (!%p620_p10) }
  0x25   : > { %s2829_s24 = sld [smem:[#allocation17_spill]] (!%p620_p10) }
  0x26   : > { %s2446_s23 = scalar_select %p686_p11, %s2266_s18, 1  ;;  %vm717_vm0 = vcmask 261120   ;;  %v2276_v2 = vmov 32.0   ;;  %vm824_vm8 = vcmask 60416   ;;  %vm1233_vm9 = vcmask 64512  }
  0x27   : > { %2138 = vrcp.f32 %v2276_v2  ;;  %s2830_s22 = sld [smem:[#allocation18_spill]]  ;;  %vm1370_vm10 = vcmask 1043456   ;;  %vm1648_vm14 = vcmask 523264  }
  0x28   : > { %s1831_s1 = sshll.u32 %s2446_s23, 3  ;;  %s2831_s27 = sld [smem:[#allocation19_spill]] }
  0x29   : > { %s689_s0 = scalar_lea.vmem %s2826_s5, %s1831_s1  ;;  %v2025_v19 = vld [vmem:[%s2827_s6 + $0x8] sm:$0xff]  ;;  %v2029_v21 = vld [vmem:[%s2827_s6 + $0x18] sm:$0xff]  ;;  %v2024_v23 = vld [vmem:[%s2827_s6] sm:$0xff]  ;;  %s2833_s7 = sld [smem:[#allocation22_spill]] }
  0x2a   : > { %v2456_v0 = vld [vmem:[%s689_s0] sm:$0xff]  ;;  %v2027_v20 = vld [vmem:[%s2828_s8 + $0x8] sm:$0xff]  ;;  %v2031_v22 = vld [vmem:[%s2828_s8 + $0x18] sm:$0xff]  ;;  %784 = vmatpush.bf16.msra.mxu0 %v2025_v19  ;;  %854 = vmatpush.bf16.msra.mxu2 %v2029_v21  ;;  %s2834_s9 = sld [smem:[#allocation24_spill]]  ;;  %s2836_s5 = scalar_lea.vmem %s2825_s28, %s2446_s23 }
  0x2b   : > { %v718_v1 = vsel %vm717_vm0, %v2456_v0, 0.0  ;;  %816 = vmatpush.bf16.msra.mxu1 %v2027_v20  ;;  %887 = vmatpush.bf16.msra.mxu3 %v2031_v22  ;;  %v2026_v24 = vld [vmem:[%s2828_s8] sm:$0xff]  ;;  %v2028_v25 = vld [vmem:[%s2827_s6 + $0x10] sm:$0xff]  ;;  %v2037_v29 = vld [vmem:[%s2827_s6 + $0x38] sm:$0xff]  ;;  %s2835_s1 = sld [smem:[#allocation20_spill]]  ;;  %s2640_s23 = sand.u32 1, %s2258_s25  }
  0x2c   : > { %719 = vadd.xlane.f32.xlu0 %v718_v1  ;;  %v2030_v26 = vld [vmem:[%s2828_s8 + $0x10] sm:$0xff]  ;;  %v2033_v30 = vld [vmem:[%s2827_s6 + $0x28] sm:$0xff]  ;;  %v2039_v32 = vld [vmem:[%s2828_s8 + $0x38] sm:$0xff]  ;;  %s2837_s10 = sld [smem:[#allocation25_spill]] }
  0x2d   : > { %v2139_v3 = vpop.eup %2138  ;;  %v2035_v31 = vld [vmem:[%s2828_s8 + $0x28] sm:$0xff]  ;;  %v2036_v34 = vld [vmem:[%s2827_s6 + $0x30] sm:$0xff]  ;;  %v2032_v35 = vld [vmem:[%s2827_s6 + $0x20] sm:$0xff]  ;;  %s2838_s11 = sld [smem:[#allocation26_spill]] }
  0x2e   : > { %v722_v4 = vmul.f32 32.0, %v2139_v3  ;;  %vm726_vm1 = vweird.f32 %v2139_v3  ;;  %785 = vmatpush.bf16.msra.mxu0 %v2024_v23  ;;  %855 = vmatpush.bf16.msra.mxu2 %v2028_v25  ;;  %v2034_v36 = vld [vmem:[%s2828_s8 + $0x20] sm:$0xff]  ;;  %v2038_v37 = vld [vmem:[%s2828_s8 + $0x30] sm:$0xff]  ;;  %s2832_s29 = smov %s2831_s27  ;;  %v2045_v56 = vld [vmem:[%s2831_s27 + $0x28] sm:$0xff] }
  0x2f   : > { %817 = vmatpush.bf16.msra.mxu1 %v2026_v24  ;;  %888 = vmatpush.bf16.msra.mxu3 %v2030_v26  ;;  %v2119_v47 = vld [vmem:[%s2829_s24] ss:$0 sm:$0xff]  ;;  %v2041_v57 = vld [vmem:[%s2832_s29 + $0x8] sm:$0xff]  ;;  %v2043_v59 = vld [vmem:[%s2832_s29 + $0x18] sm:$0xff]  ;;  %s1830_s24 = sshll.u32 %s2640_s23, 4 }
  0x30   : > { %v723_v5 = vsub.f32 1.0, %v722_v4  ;;  %v2120_v50 = vld [vmem:[%s2830_s22] ss:$0 sm:$0xff]  ;;  %v2047_v60 = vld [vmem:[%s2832_s29 + $0x38] sm:$0xff]  ;;  %v2046_v2 = vld [vmem:[%s2832_s29 + $0x30] sm:$0xff]  ;;  %s2644_s3 = scalar_lea.vmem [#allocation6], %s1830_s24 }
  0x31   : > { %v2044_v61 = vld [vmem:[%s2832_s29 + $0x20] sm:$0xff] }
  0x32   : > { %v724_v6 = vmul.f32 %v2139_v3, %v723_v5  ;;  %998 = vmatpush.bf16.msrb.mxu2 %v2037_v29  ;;  %926 = vmatpush.bf16.msrb.mxu0 %v2033_v30  ;;  %v2040_v62 = vld [vmem:[%s2832_s29] sm:$0xff] }
  0x33   : > { %959 = vmatpush.bf16.msrb.mxu1 %v2035_v31  ;;  %1031 = vmatpush.bf16.msrb.mxu3 %v2039_v32  ;;  %v2123_v19 = vld [vmem:[%s2833_s7 + $0x1] ss:$0 sm:$0xff]  ;;  %v2125_v29 = vld [vmem:[%s2833_s7 + $0x2] ss:$0 sm:$0xff] }
  0x34   : > { %1047 = vadd.xlane.f32.xlu0 %v718_v1  ;;  %v725_v7 = vadd.f32 %v2139_v3, %v724_v6  ;;  %v2042_v1 = vld [vmem:[%s2832_s29 + $0x10] sm:$0xff]  ;;  %v2124_v20 = vld [vmem:[%s2834_s9 + $0x1] ss:$0 sm:$0xff]  ;;  %v2126_v31 = vld [vmem:[%s2834_s9 + $0x2] ss:$0 sm:$0xff] }
  0x36   : > { %v2460_v8 = vsel %vm726_vm1, %v2139_v3, %v725_v7  ;;  %999 = vmatpush.bf16.msrb.mxu2 %v2036_v34  ;;  %927 = vmatpush.bf16.msrb.mxu0 %v2032_v35 }
  0x37   : > { %960 = vmatpush.bf16.msrb.mxu1 %v2034_v36  ;;  %1032 = vmatpush.bf16.msrb.mxu3 %v2038_v37 }
  0x9f   : > { %v720_v9 = vpop.xlane.xlu0 %719 }
  0xa0   : > { %v728_v10 = vmul.f32 %v2460_v8, %v720_v9 }
  0xa2   : > { %v2464_v11 = vsub.f32 %v2456_v0, %v728_v10 }
  0xa4   : > { %v730_v12 = vmul.f32 %v2464_v11, %v2464_v11 }
  0xa6   : > { %v731_v13 = vsel %vm717_vm0, %v730_v12, 0.0  ;;  %v2122_v12 = vld [vmem:[%s2834_s9] ss:$0 sm:$0xff] }
  0xa7   : > { %732 = vadd.xlane.f32.xlu1 %v731_v13  ;;  %v1048_v14 = vpop.xlane.xlu0 %1047 }
  0xa8   : > { %v1056_v15 = vmul.f32 %v1048_v14, %v2460_v8 }
  0xaa   : > { %v2471_v16 = vsub.f32 %v2456_v0, %v1056_v15 }
  0xac   : > { %v1058_v17 = vmul.f32 %v2471_v16, %v2471_v16 }
  0xae   : > { %v1059_v18 = vsel %vm717_vm0, %v1058_v17, 0.0 }
  0xaf   : > { %1060 = vadd.xlane.f32.xlu1 %v1059_v18 }
 0x11a   : > { %v733_v27 = vpop.xlane.xlu1 %732 }
 0x11b   : > { %v734_v28 = vmul.f32 %v733_v27, %v2460_v8 }
 0x11d   : > { %v735_v33 = vadd.f32 1e-05, %v734_v28 }
 0x11f   : > { %2140 = vrsqrt.f32 %v735_v33  ;;  %vm742_vm3 = vweird.f32 %v735_v33 }
 0x122   : > { %v1061_v38 = vpop.xlane.xlu1 %1060 }
 0x123   : > { %v1062_v39 = vmul.f32 %v1061_v38, %v2460_v8 }
 0x125   : > { %v2141_v40 = vpop.eup %2140  ;;  %v1063_v42 = vadd.f32 1e-05, %v1062_v39 }
 0x126   : > { %v737_v41 = vmul.f32 %v2141_v40, %v735_v33  ;;  %vm743_vm2 = vweird.f32 %v2141_v40 }
 0x127   : > { %2142 = vrsqrt.f32 %v1063_v42  ;;  %vm744_vm4 = vmor %vm742_vm3, %vm743_vm2  ;;  %vm1070_vm5 = vweird.f32 %v1063_v42 }
 0x128   : > { %v738_v43 = vmul.f32 %v2141_v40, %v737_v41 }
 0x12a   : > { %v739_v44 = vmul.f32 0.5, %v738_v43 }
 0x12c   : > { %v740_v45 = vsub.f32 1.5, %v739_v44  ;;  %v2127_v44 = vld [vmem:[%s2833_s7 + $0x3] ss:$0 sm:$0xff] }
 0x12d   : > { %v2143_v49 = vpop.eup %2142 }
 0x12e   : > { %v741_v46 = vmul.f32 %v2141_v40, %v740_v45  ;;  %v1065_v53 = vmul.f32 %v2143_v49, %v1063_v42  ;;  %vm1071_vm6 = vweird.f32 %v2143_v49 }
 0x12f   : > { %vm1072_vm7 = vmor %vm1070_vm5, %vm1071_vm6 }
 0x130   : > { %v745_v48 = vsel %vm744_vm4, %v2141_v40, %v741_v46  ;;  %v1066_v58 = vmul.f32 %v2143_v49, %v1065_v53 }
 0x131   : > { %v746_v51 = vmul.f32 %v745_v48, %v2464_v11  ;;  %v2121_v11 = vld [vmem:[%s2833_s7] ss:$0 sm:$0xff]  ;;  %s2054_s7 = sshll.u32 %s2266_s18, 4 }
 0x132   : > { %v1067_v63 = vmul.f32 0.5, %v1066_v58  ;;  %s1705_s0 = scalar_lea.hbm %s2797_s21, %s2054_s7 }
 0x133   : > { %v750_v52 = vmul.f32 %v2119_v47, %v746_v51  ;;  %s1708_s27 = sshll.u32 %s1705_s0, 4  ;;  %s1709_s27 = int_to_ptr.hbm [resolvable:$true] %s1708_s27 }
 0x134   : > { %v1068_v3 = vsub.f32 1.5, %v1067_v63  ;;  %s2178_s24 = sshra.s32 %s1709_s27, 4  ;;  %s2179_s24 = int_to_ptr.hbm [resolvable:$true] %s2178_s24 }
 0x135   : > { %v754_v54 = vadd.f32 %v2120_v50, %v750_v52  ;;  %s2180_s26 = scalar_lea.hbm %s2179_s24, 16  ;;  %p2185_p1 = scmp.lt.s32.totalorder %s2179_s24, %s2797_s21 }
 0x136   : > { %v1069_v4 = vmul.f32 %v2143_v49, %v1068_v3  ;;  %p2181_p12 = scmp.ne.s32.totalorder %s2179_s24, %s2180_s26 }
 0x137   : > { %v755_v55 = vpack.c.bf16 %v754_v54, %v754_v54 }
 0x138   : > { %v1073_v5 = vsel %vm1072_vm7, %v2143_v49, %v1069_v4  ;;  %p2182_p13 = pnand %p2181_p12, %p2429_p4 }
 0x139   : > { %1840 = vmatmul.msk.bf16.vlgmr.msra.gmra.mxu0 %vm717_vm0, %v755_v55  ;;  %1849 = vmatmul.msk.bf16.vlgmr.msra.gmra.mxu1 %vm717_vm0, %v755_v55  ;;  %v1074_v6 = vmul.f32 %v1073_v5, %v2471_v16 }
 0x13a   : > { %1862 = vmatmul.msk.bf16.vlgmr.msra.gmra.mxu2 %vm717_vm0, %v755_v55  ;;  %1875 = vmatmul.msk.bf16.vlgmr.msra.gmra.mxu3 %vm717_vm0, %v755_v55  ;;  %p2183_p0 = pneg %p2182_p13 }
 0x13b   : > { %1182 = vmatpush.bf16.msra.mxu2 %v2045_v56  ;;  %1112 = vmatpush.bf16.msra.mxu0 %v2041_v57  ;;  %v1078_v7 = vmul.f32 %v2119_v47, %v1074_v6  ;;  %v2128_v47 = vld [vmem:[%s2834_s9 + $0x3] ss:$0 sm:$0xff]  ;;  %v2129_v57 = vld [vmem:[%s2835_s1] ss:$0 sm:$0xff]  ;;  %v2131_v6 = vld [vmem:[%s2835_s1 + $0x2] ss:$0 sm:$0xff] }
 0x13c   : > { %1147 = vmatpush.bf16.msra.mxu1 %v2043_v59  ;;  %1217 = vmatpush.bf16.msra.mxu3 %v2047_v60  ;;  %v2130_v59 = vld [vmem:[%s2835_s1 + $0x1] ss:$0 sm:$0xff]  ;;  %s2184_s9 = scalar_lea.hbm %s2797_s21, 32 }
 0x13d   : > { %v1082_v9 = vadd.f32 %v2120_v50, %v1078_v7  ;;  %p2186_p2 = scmp.lt.s32.totalorder %s2184_s9, %s2180_s26 }
 0x13f   : > { %1183 = vmatpush.bf16.msra.mxu2 %v2044_v61  ;;  %1113 = vmatpush.bf16.msra.mxu0 %v2040_v62  ;;  %v1083_v10 = vpack.c.bf16 %v1082_v9, %v1082_v9  ;;  %p2187_p3 = por %p2186_p2, %p2185_p1 }
 0x140   : > { %1148 = vmatpush.bf16.msra.mxu1 %v2042_v1  ;;  %1218 = vmatpush.bf16.msra.mxu3 %v2046_v2 }
 0x141   : > { %p2188_p5 = pnand %p2187_p3, %p2183_p0 }
 0x149   : > { %1888 = vmatmul.msk.bf16.vlgmr.msrb.gmra.mxu0 %vm717_vm0, %v755_v55  ;;  %1901 = vmatmul.msk.bf16.vlgmr.msrb.gmra.mxu1 %vm717_vm0, %v755_v55 }
 0x14a   : > { %1914 = vmatmul.msk.bf16.vlgmr.msrb.gmra.mxu2 %vm717_vm0, %v755_v55  ;;  %1927 = vmatmul.msk.bf16.vlgmr.msrb.gmra.mxu3 %vm717_vm0, %v755_v55 }
 0x159   : > { %1936 = vmatmul.msk.bf16.vlgmr.msra.gmra.mxu0 %vm717_vm0, %v1083_v10  ;;  %1949 = vmatmul.msk.bf16.vlgmr.msra.gmra.mxu1 %vm717_vm0, %v1083_v10 }
 0x15a   : > { %1962 = vmatmul.msk.bf16.vlgmr.msra.gmra.mxu2 %vm717_vm0, %v1083_v10  ;;  %1975 = vmatmul.msk.bf16.vlgmr.msra.gmra.mxu3 %vm717_vm0, %v1083_v10 }
 0x1b6   : > { %v787_v13 = vpop.f32.mrf.mxu0  ;;  %v819_v14 = vpop.f32.mrf.mxu1 }
 0x1b7   : > { %v788_v15 = vadd.f32 %v2121_v11, %v787_v13  ;;  %v820_v16 = vadd.f32 %v2122_v12, %v819_v14  ;;  %v2132_v13 = vld [vmem:[%s2835_s1 + $0x3] ss:$0 sm:$0xff]  ;;  %s1706_s1 = sshll.u32 %s2644_s3, 4  ;;  %s1707_s1 = int_to_ptr.vmem [resolvable:$true] %s1706_s1 }
 0x1b9   : > { %v823_v17 = vpack.c.bf16 %v788_v15, %v788_v15  ;;  %v826_v18 = vpack.c.bf16 %v820_v16, %v820_v16 }
 0x1bb   : > { %825 = vst.msk [vmem:[#allocation2] sm:$0xf] %vm824_vm8, %v823_v17 }
 0x1bc   : > { %827 = vst.msk [vmem:[#allocation3] sm:$0xf] %vm824_vm8, %v826_v18 }
 0x1bd   : > { %v857_v21 = vpop.f32.mrf.mxu2  ;;  %v890_v22 = vpop.f32.mrf.mxu3 }
 0x1be   : > { %v858_v23 = vadd.f32 %v2123_v19, %v857_v21  ;;  %v891_v24 = vadd.f32 %v2124_v20, %v890_v22  ;;  %v789_v25 = vpop.f32.mrf.mxu0  ;;  %v821_v26 = vpop.f32.mrf.mxu1 }
 0x1c0   : > { %v894_v27 = vpack.c.bf16 %v858_v23, %v858_v23  ;;  %v897_v28 = vpack.c.bf16 %v891_v24, %v891_v24 }
 0x1c2   : > { %896 = vst.msk [vmem:[#allocation2 + $0x4] sm:$0xf] %vm824_vm8, %v894_v27  ;;  %v1226_v30 = vld [vmem:[#allocation2] sm:$0xf] }
 0x1c3   : > { %899 = vst.msk [vmem:[#allocation3 + $0x4] sm:$0xf] %vm824_vm8, %v897_v28  ;;  %v1238_v32 = vsel %vm1233_vm9, %v1226_v30, 0  ;;  %v1363_v33 = vld [vmem:[#allocation3] sm:$0xf] }
 0x1c4   : > { %1247 = vmatpush.bf16.xpose.msrb.mxu0 %v1238_v32  ;;  %v1372_v34 = vsel %vm1370_vm10, %v1363_v33, 0 }
 0x1c5   : > { %v859_v35 = vpop.f32.mrf.mxu2  ;;  %v892_v36 = vpop.f32.mrf.mxu3 }
 0x1c6   : > { %v929_v37 = vpop.f32.mrf.mxu0  ;;  %v962_v38 = vpop.f32.mrf.mxu1 }
 0x1c7   : > { %v930_v39 = vadd.f32 %v2125_v29, %v929_v37  ;;  %v963_v40 = vadd.f32 %v2126_v31, %v962_v38  ;;  %v2118_v29 = vld [vmem:[%s2836_s5] ss:$0 sm:$0xff]  ;;  %s1678_s5 = scalar_lea.sflag [#allocation7], %s2640_s23 }
 0x1c9   : > { %v966_v41 = vpack.c.bf16 %v930_v39, %v930_v39  ;;  %v969_v42 = vpack.c.bf16 %v963_v40, %v963_v40  ;;  %v1227_v43 = vld [vmem:[#allocation2 + $0x4] sm:$0xf] }
 0x1ca   : > { %v1257_v45 = vsel %vm1233_vm9, %v1227_v43, 0  ;;  %v1364_v46 = vld [vmem:[#allocation3 + $0x4] sm:$0xf] }
 0x1cb   : > { %968 = vst.msk [vmem:[#allocation2 + $0x8] sm:$0xf] %vm824_vm8, %v966_v41  ;;  %1266 = vmatpush.bf16.xpose.msrb.mxu1 %v1257_v45  ;;  %v1391_v48 = vsel %vm1370_vm10, %v1364_v46, 0 }
 0x1cc   : > { %1381 = vmatpush.bf16.msra.mxu0 %v1372_v34  ;;  %971 = vst.msk [vmem:[#allocation3 + $0x8] sm:$0xf] %vm824_vm8, %v969_v42 }
 0x1cd   : > { %v1001_v49 = vpop.f32.mrf.mxu2  ;;  %v1034_v50 = vpop.f32.mrf.mxu3 }
 0x1ce   : > { %v1002_v51 = vadd.f32 %v2127_v44, %v1001_v49  ;;  %v1035_v52 = vadd.f32 %v2128_v47, %v1034_v50  ;;  %v931_v53 = vpop.f32.mrf.mxu0  ;;  %v964_v54 = vpop.f32.mrf.mxu1 }
 0x1d0   : > { %v1038_v55 = vpack.c.bf16 %v1002_v51, %v1002_v51  ;;  %v1041_v56 = vpack.c.bf16 %v1035_v52, %v1035_v52 }
 0x1d2   : > { %1040 = vst.msk [vmem:[#allocation2 + $0xc] sm:$0xf] %vm824_vm8, %v1038_v55  ;;  %v1228_v58 = vld [vmem:[#allocation2 + $0x8] sm:$0xf] }
 0x1d3   : > { %1400 = vmatpush.bf16.msra.mxu1 %v1391_v48  ;;  %1043 = vst.msk [vmem:[#allocation3 + $0xc] sm:$0xf] %vm824_vm8, %v1041_v56  ;;  %v1276_v60 = vsel %vm1233_vm9, %v1228_v58, 0  ;;  %v1365_v61 = vld [vmem:[#allocation3 + $0x8] sm:$0xf] }
 0x1d4   : > { %1285 = vmatpush.bf16.xpose.msrb.mxu2 %v1276_v60  ;;  %v1410_v62 = vsel %vm1370_vm10, %v1365_v61, 0 }
 0x1d5   : > { %v1003_v63 = vpop.f32.mrf.mxu2  ;;  %v1036_v1 = vpop.f32.mrf.mxu3 }
 0x1d6   : > { %v1115_v2 = vpop.f32.mrf.mxu0  ;;  %v1150_v3 = vpop.f32.mrf.mxu1 }
 0x1d7   : > { %v1116_v4 = vadd.f32 %v2129_v57, %v1115_v2  ;;  %v1151_v5 = vadd.f32 %v2130_v59, %v1150_v3 }
 0x1d9   : > { %v1119_v7 = vmul.f32 0.35355338, %v1116_v4  ;;  %v1154_v9 = vmul.f32 0.35355338, %v1151_v5  ;;  %v1229_v10 = vld [vmem:[#allocation2 + $0xc] sm:$0xf] }
 0x1da   : > { %v1295_v11 = vsel %vm1233_vm9, %v1229_v10, 0  ;;  %v1366_v12 = vld [vmem:[#allocation3 + $0xc] sm:$0xf] }
 0x1db   : > { %v1120_v14 = vpack.c.bf16 %v1119_v7, %v1119_v7  ;;  %v1155_v15 = vpack.c.bf16 %v1154_v9, %v1154_v9  ;;  %1304 = vmatpush.bf16.xpose.msrb.mxu3 %v1295_v11  ;;  %v1429_v16 = vsel %vm1370_vm10, %v1366_v12, 0 }
 0x1dc   : > { %1419 = vmatpush.bf16.msra.mxu2 %v1410_v62 }
 0x1dd   : > { %v1185_v17 = vpop.f32.mrf.mxu2  ;;  %v1220_v18 = vpop.f32.mrf.mxu3  ;;  %1976 = vmatmul.msk.bf16.vlgmr.msrb.gmra.mxu0 %vm1233_vm9, %v1120_v14  ;;  %1977 = vmatmul.msk.bf16.vlgmr.msrb.gmra.mxu1 %vm1233_vm9, %v1155_v15 }
 0x1de   : > { %v1186_v19 = vadd.f32 %v2131_v6, %v1185_v17  ;;  %v1221_v20 = vadd.f32 %v2132_v13, %v1220_v18  ;;  %v1117_v21 = vpop.f32.mrf.mxu0  ;;  %v1152_v22 = vpop.f32.mrf.mxu1 }
 0x1df   : > { %v1987_v22 = vld [vmem:[%s2837_s10 + $0x8] sm:$0xf] }
 0x1e0   : > { %v1189_v23 = vmul.f32 0.35355338, %v1186_v19  ;;  %v1224_v24 = vmul.f32 0.35355338, %v1221_v20  ;;  %v1448_v20 = vld [vmem:[%s2837_s10] sm:$0xf] }
 0x1e1   : > { %v1453_v21 = vsel %vm1370_vm10, %v1448_v20, 0 }
 0x1e2   : > { %v1190_v25 = vpack.c.bf16 %v1189_v23, %v1189_v23  ;;  %v1225_v26 = vpack.c.bf16 %v1224_v24, %v1224_v24  ;;  %1462 = vmatpush.bf16.msrb.mxu0 %v1453_v21  ;;  %v1989_v23 = vld [vmem:[%s2837_s10 + $0xc] sm:$0xf]  ;;  %v1985_v24 = vld [vmem:[%s2837_s10 + $0x4] sm:$0xf] }
 0x1e3   : > { %1438 = vmatpush.bf16.msra.mxu3 %v1429_v16 }
 0x1e4   : > { %1978 = vmatmul.msk.bf16.vlgmr.msrb.gmra.mxu2 %vm1233_vm9, %v1190_v25  ;;  %1979 = vmatmul.msk.bf16.vlgmr.msrb.gmra.mxu3 %vm1233_vm9, %v1225_v26  ;;  %v1500_v25 = vsel %vm1370_vm10, %v1987_v22, 0  ;;  %v1522_v26 = vsel %vm1370_vm10, %v1989_v23, 0 }
 0x1e5   : > { %v1187_v27 = vpop.f32.mrf.mxu2  ;;  %v1222_v28 = vpop.f32.mrf.mxu3  ;;  %1509 = vmatpush.bf16.msrb.mxu2 %v1500_v25 }
 0x1e6   : > { %v1478_v27 = vsel %vm1370_vm10, %v1985_v24, 0 }
 0x1e7   : > { %1531 = vmatpush.bf16.msrb.mxu3 %v1522_v26  ;;  %1487 = vmatpush.bf16.msrb.mxu1 %v1478_v27 }
 0x25a   : > { %v1249_v30 = vpop.f32.mrf.mxu0  ;;  %v1268_v31 = vpop.f32.mrf.mxu1 }
 0x25b   : > { %v1250_v32 = vadd.f32 %v2118_v29, %v1249_v30  ;;  %v1269_v33 = vadd.f32 %v2118_v29, %v1268_v31 }
 0x25d   : > { %v1313_v34 = vsel %vm1233_vm9, %v1269_v33, -inf  ;;  %v1310_v35 = vsel %vm1233_vm9, %v1250_v32, -inf }
 0x25e   : > { %1314 = vmax.xlane.f32.xlu1 %v1313_v34  ;;  %1311 = vmax.xlane.f32.xlu0 %v1310_v35 }
 0x262   : > { %v1251_v36 = vpop.f32.mrf.mxu0  ;;  %v1270_v37 = vpop.f32.mrf.mxu1 }
 0x267   : > { %v1287_v38 = vpop.f32.mrf.mxu2  ;;  %v1306_v39 = vpop.f32.mrf.mxu3 }
 0x268   : > { %v1288_v40 = vadd.f32 %v2118_v29, %v1287_v38  ;;  %v1307_v42 = vadd.f32 %v2118_v29, %v1306_v39 }
 0x26a   : > { %v1316_v41 = vsel %vm1233_vm9, %v1288_v40, -inf  ;;  %v1319_v45 = vsel %vm1233_vm9, %v1307_v42, -inf }
 0x26b   : > { %1317 = vmax.xlane.f32.xlu2 %v1316_v41 }
 0x26f   : > { %v1289_v43 = vpop.f32.mrf.mxu2  ;;  %v1308_v44 = vpop.f32.mrf.mxu3 }
 0x270   : > { %v2133_v43 = vld [vmem:[%s2838_s11] ss:$0 sm:$0xff] }
 0x273   : > { %1320 = vmax.xlane.f32.xlu2 %v1319_v45 }
 0x2d1   : > { %v1312_v46 = vpop.xlane.xlu0 %1311  ;;  %v1315_v50 = vpop.xlane.xlu1 %1314 }
 0x2d2   : > { %v1322_v47 = vsub.f32 %v1250_v32, %v1312_v46  ;;  %v1323_v54 = vsub.f32 %v1269_v33, %v1315_v50 }
 0x2d4   : > { %v1326_v48 = vmul.f32 1.442695, %v1322_v47  ;;  %v1328_v56 = vmul.f32 1.442695, %v1323_v54 }
 0x2d6   : > { %2144 = vpow2.f32 %v1326_v48 }
 0x2dc   : > { %v2145_v49 = vpop.eup %2144 }
 0x2dd   : > { %v1334_v52 = vsel %vm1233_vm9, %v2145_v49, 0.0 }
 0x2de   : > { %v1318_v51 = vpop.xlane.xlu2 %1317  ;;  %1335 = vadd.xlane.f32.xlu1 %v1334_v52 }
 0x2df   : > { %v1324_v53 = vsub.f32 %v1288_v40, %v1318_v51 }
 0x2e1   : > { %v1330_v55 = vmul.f32 1.442695, %v1324_v53 }
 0x2e3   : > { %2146 = vpow2.f32 %v1330_v55 }
 0x2e4   : > { %2148 = vpow2.f32 %v1328_v56 }
 0x2e6   : > { %v1321_v57 = vpop.xlane.xlu2 %1320 }
 0x2e7   : > { %v1325_v58 = vsub.f32 %v1307_v42, %v1321_v57 }
 0x2e9   : > { %v2147_v59 = vpop.eup %2146  ;;  %v1332_v60 = vmul.f32 1.442695, %v1325_v58 }
 0x2ea   : > { %v1340_v61 = vsel %vm1233_vm9, %v2147_v59, 0.0  ;;  %v2149_v62 = vpop.eup %2148 }
 0x2eb   : > { %2150 = vpow2.f32 %v1332_v60  ;;  %1341 = vadd.xlane.f32.xlu2 %v1340_v61  ;;  %v1337_v1 = vsel %vm1233_vm9, %v2149_v62, 0.0  ;;  %v2049_v60 = vld [vmem:[%s2790_s14 + $0x8] sm:$0xff] }
 0x2f1   : > { %v2151_v63 = vpop.eup %2150 }
 0x2f2   : > { %v1343_v2 = vsel %vm1233_vm9, %v2151_v63, 0.0 }
 0x2f3   : > { %1338 = vadd.xlane.f32.xlu2 %v1337_v1  ;;  %1344 = vadd.xlane.f32.xlu0 %v1343_v2 }
 0x351   : > { %v1336_v3 = vpop.xlane.xlu1 %1335 }
 0x352   : > { %2152 = vrcp.f32 %v1336_v3 }
 0x358   : > { %v2153_v4 = vpop.eup %2152 }
 0x359   : > { %v1350_v5 = vmul.f32 %v2153_v4, %v2145_v49 }
 0x35b   : > { %v1354_v6 = vpack.c.bf16 %v1350_v5, %v1350_v5 }
 0x35d   : > { %1980 = vmatmul.msk.bf16.vlgmr.msra.gmra.mxu0 %vm1233_vm9, %v1354_v6  ;;  %1359 = vst.msk [vmem:[%s2644_s3] sm:$0xf] %vm824_vm8, %v1354_v6 }
 0x35e   : > { %v1342_v7 = vpop.xlane.xlu2 %1341  ;;  %1599 = vmatpush.bf16.msra.mxu0 %v2049_v60 }
 0x35f   : > { %2154 = vrcp.f32 %v1342_v7  ;;  %v2134_v7 = vld [vmem:[%s2788_s12] ss:$0 sm:$0xff] }
 0x365   : > { %v2155_v9 = vpop.eup %2154 }
 0x366   : > { %v1352_v10 = vmul.f32 %v2155_v9, %v2147_v59  ;;  %v1339_v11 = vpop.xlane.xlu2 %1338  ;;  %v1345_v12 = vpop.xlane.xlu0 %1344 }
 0x367   : > { %2156 = vrcp.f32 %v1339_v11 }
 0x368   : > { %v1356_v13 = vpack.c.bf16 %v1352_v10, %v1352_v10  ;;  %2158 = vrcp.f32 %v1345_v12 }
 0x36a   : > { %1982 = vmatmul.msk.bf16.vlgmr.msra.gmra.mxu2 %vm1233_vm9, %v1356_v13  ;;  %1361 = vst.msk [vmem:[%s2644_s3 + $0x8] sm:$0xf] %vm824_vm8, %v1356_v13 }
 0x36d   : > { %v2157_v14 = vpop.eup %2156 }
 0x36e   : > { %v2159_v15 = vpop.eup %2158  ;;  %v1351_v16 = vmul.f32 %v2157_v14, %v2149_v62  ;;  %v2053_v14 = vld [vmem:[%s2792_s16 + $0x18] sm:$0xff] }
 0x36f   : > { %v1353_v17 = vmul.f32 %v2159_v15, %v2151_v63  ;;  %v2052_v15 = vld [vmem:[%s2792_s16 + $0x10] sm:$0xff] }
 0x370   : > { %v1355_v18 = vpack.c.bf16 %v1351_v16, %v1351_v16  ;;  %v2051_v16 = vld [vmem:[%s2792_s16 + $0x8] sm:$0xff] }
 0x371   : > { %v1357_v19 = vpack.c.bf16 %v1353_v17, %v1353_v17  ;;  %v2050_v17 = vld [vmem:[%s2792_s16] sm:$0xff] }
 0x372   : > { %1981 = vmatmul.msk.bf16.vlgmr.msra.gmra.mxu1 %vm1233_vm9, %v1355_v18  ;;  %1360 = vst.msk [vmem:[%s2644_s3 + $0x4] sm:$0xf] %vm824_vm8, %v1355_v18  ;;  %v2136_v18 = vld [vmem:[%s2791_s15] ss:$0 sm:$0xff] }
 0x373   : > { %1983 = vmatmul.msk.bf16.vlgmr.msra.gmra.mxu3 %vm1233_vm9, %v1357_v19  ;;  %1362 = vst.msk [vmem:[%s2644_s3 + $0xc] sm:$0xf] %vm824_vm8, %v1357_v19  ;;  %1656 = vmatpush.bf16.msra.mxu1 %v2053_v14 }
 0x377   : > { %1657 = vmatpush.bf16.msra.mxu1 %v2052_v15 }
 0x37b   : > { %1658 = vmatpush.bf16.msra.mxu1 %v2051_v16 }
 0x37f   : > { %1659 = vmatpush.bf16.msra.mxu1 %v2050_v17 }
 0x3da   : > { %v1383_v28 = vpop.f32.mrf.mxu0 }
 0x3db   : > { %v1444_v29 = vpack.c.bf16 %v1383_v28, %v1383_v28 }
 0x3dd   : > { %1984 = vmatmul.msk.bf16.vlgmr.msrb.gmra.mxu0 %vm1233_vm9, %v1444_v29 }
 0x3e2   : > { %v1385_v30 = vpop.f32.mrf.mxu0 }
 0x3ed   : > { %v1421_v31 = vpop.f32.mrf.mxu2 }
 0x3ee   : > { %v1446_v32 = vpack.c.bf16 %v1421_v31, %v1421_v31 }
 0x3ef   : > { %v1402_v33 = vpop.f32.mrf.mxu1 }
 0x3f0   : > { %v1445_v34 = vpack.c.bf16 %v1402_v33, %v1402_v33  ;;  %1988 = vmatmul.msk.bf16.vlgmr.msrb.gmra.mxu2 %vm1233_vm9, %v1446_v32 }
 0x3f2   : > { %1986 = vmatmul.msk.bf16.vlgmr.msrb.gmra.mxu1 %vm1233_vm9, %v1445_v34 }
 0x3f5   : > { %v1423_v35 = vpop.f32.mrf.mxu2 }
 0x3f6   : > { %v1440_v36 = vpop.f32.mrf.mxu3 }
 0x3f7   : > { %v1447_v37 = vpack.c.bf16 %v1440_v36, %v1440_v36  ;;  %v1404_v38 = vpop.f32.mrf.mxu1 }
 0x3f9   : > { %1990 = vmatmul.msk.bf16.vlgmr.msrb.gmra.mxu3 %vm1233_vm9, %v1447_v37 }
 0x3fe   : > { %v1442_v39 = vpop.f32.mrf.mxu3 }
 0x45a   : > { %v1464_v40 = vpop.f32.mrf.mxu0 }
 0x45b   : > { %v1471_v45 = vadd.f32 %v2133_v43, %v1464_v40 }
 0x462   : > { %v1466_v41 = vpop.f32.mrf.mxu0 }
 0x46f   : > { %v1489_v42 = vpop.f32.mrf.mxu1 }
 0x470   : > { %v1493_v47 = vadd.f32 %v1489_v42, %v1471_v45 }
 0x473   : > { %v1511_v44 = vpop.f32.mrf.mxu2 }
 0x474   : > { %v1515_v48 = vadd.f32 %v1511_v44, %v1493_v47 }
 0x477   : > { %v1491_v46 = vpop.f32.mrf.mxu1 }
 0x47b   : > { %v1513_v49 = vpop.f32.mrf.mxu2 }
 0x47c   : > { %v1533_v50 = vpop.f32.mrf.mxu3 }
 0x47d   : > { %v1537_v51 = vadd.f32 %v1533_v50, %v1515_v48 }
 0x47f   : > { %v2681_v52 = vadd.f32 %v1537_v51, %v2456_v0  ;;  %v2048_v0 = vld [vmem:[%s2790_s14] sm:$0xff] }
 0x480   : > { %1600 = vmatpush.bf16.msra.mxu0 %v2048_v0 }
 0x481   : > { %v1539_v53 = vsel %vm717_vm0, %v2681_v52, 0.0 }
 0x482   : > { %1540 = vadd.xlane.f32.xlu0 %v1539_v53 }
 0x484   : > { %v1535_v54 = vpop.f32.mrf.mxu3 }
 0x4f5   : > { %v1541_v55 = vpop.xlane.xlu0 %1540 }
 0x4f6   : > { %v1542_v56 = vmul.f32 %v1541_v55, %v2460_v8 }
 0x4f8   : > { %v1543_v57 = vsub.f32 %v2681_v52, %v1542_v56 }
 0x4fa   : > { %v1544_v58 = vmul.f32 %v1543_v57, %v1543_v57 }
 0x4fc   : > { %v1545_v59 = vsel %vm717_vm0, %v1544_v58, 0.0 }
 0x4fd   : > { %1546 = vadd.xlane.f32.xlu1 %v1545_v59 }
 0x570   : > { %v1547_v61 = vpop.xlane.xlu1 %1546 }
 0x571   : > { %v1548_v62 = vmul.f32 %v1547_v61, %v2460_v8  ;;  %v2135_v8 = vld [vmem:[%s2789_s13] ss:$0 sm:$0xff] }
 0x573   : > { %v1549_v63 = vadd.f32 1e-05, %v1548_v62 }
 0x575   : > { %2160 = vrsqrt.f32 %v1549_v63  ;;  %vm1556_vm12 = vweird.f32 %v1549_v63 }
 0x57b   : > { %v2161_v1 = vpop.eup %2160 }
 0x57c   : > { %v1551_v2 = vmul.f32 %v2161_v1, %v1549_v63  ;;  %vm1557_vm11 = vweird.f32 %v2161_v1 }
 0x57d   : > { %vm1558_vm13 = vmor %vm1556_vm12, %vm1557_vm11 }
 0x57e   : > { %v1552_v3 = vmul.f32 %v2161_v1, %v1551_v2 }
 0x580   : > { %v1553_v4 = vmul.f32 0.5, %v1552_v3 }
 0x582   : > { %v1554_v5 = vsub.f32 1.5, %v1553_v4 }
 0x584   : > { %v1555_v6 = vmul.f32 %v2161_v1, %v1554_v5 }
 0x586   : > { %v1559_v9 = vsel %vm1558_vm13, %v2161_v1, %v1555_v6 }
 0x587   : > { %v1560_v10 = vmul.f32 %v1559_v9, %v1543_v57 }
 0x589   : > { %v1564_v11 = vmul.f32 %v2134_v7, %v1560_v10 }
 0x58b   : > { %v1568_v12 = vadd.f32 %v2135_v8, %v1564_v11 }
 0x58d   : > { %v1569_v13 = vpack.c.bf16 %v1568_v12, %v1568_v12 }
 0x58f   : > { %1999 = vmatmul.msk.bf16.vlgmr.msra.gmra.mxu0 %vm717_vm0, %v1569_v13 }
 0x60c   : > { %v1602_v19 = vpop.f32.mrf.mxu0 }
 0x60d   : > { %v1603_v20 = vadd.f32 %v2136_v18, %v1602_v19 }
 0x60f   : > { %v1606_v21 = vmul.f32 %v1603_v20, %v1603_v20 }
 0x611   : > { %v1607_v22 = vmul.f32 %v1606_v21, %v1603_v20 }
 0x613   : > { %v1608_v23 = vmul.f32 0.044715, %v1607_v22 }
 0x614   : > { %v1604_v24 = vpop.f32.mrf.mxu0 }
 0x615   : > { %v1609_v25 = vadd.f32 %v1608_v23, %v1603_v20 }
 0x617   : > { %v1610_v26 = vmul.f32 0.7978846, %v1609_v25 }
 0x619   : > { %2162 = vtanh.f32 %v1610_v26 }
 0x61f   : > { %v2163_v27 = vpop.eup %2162 }
 0x620   : > { %v1612_v28 = vadd.f32 1.0, %v2163_v27 }
 0x622   : > { %v1613_v29 = vmul.f32 0.5, %v1612_v28 }
 0x624   : > { %v1614_v30 = vmul.f32 %v1613_v29, %v1603_v20 }
 0x626   : > { %v1615_v31 = vpack.c.bf16 %v1614_v30, %v1614_v30 }
 0x628   : > { %2016 = vmatmul.msk.bf16.vlgmr.msra.gmra.mxu1 %vm1648_vm14, %v1615_v31 }
 0x629   : > { %2191 = shalt.err (!%p2188_p5)
}
 0x62a   : > { %s2277_s7 = smov 64   ;;  %s2278_s22 = smov 4   ;;  %v2137_v32 = vld [vmem:[%s2793_s17] ss:$0 sm:$0xff] }
 0x62b   : > { %2056 = dma.vmem_to_hbm [thread:$0]  (%p2429_p4), %s1707_s1, 256, %s1709_s27, %s1678_s5, %s2277_s7, %s2277_s7, %s2278_s22  }
 0x62c   : > { %s1829_s30 = sshll.u32 %s2640_s23, 3  ;;  %s2019_s0 = sshll.u32 %s2266_s18, 3 }
 0x62d   : > { %s1689_s11 = scalar_lea.hbm %s2796_s20, %s2019_s0  ;;  %s678_s9 = scalar_lea.vmem [#allocation4], %s1829_s30 }
 0x62e   : > { %s1691_s26 = sshll.u32 %s678_s9, 4  ;;  %s1693_s3 = sshll.u32 %s1689_s11, 4  ;;  %s1692_s26 = int_to_ptr.vmem [resolvable:$true] %s1691_s26  ;;  %s1694_s3 = int_to_ptr.hbm [resolvable:$true] %s1693_s3 }
 0x62f   : > { %s1673_s18 = scalar_lea.sflag [#allocation5], %s2640_s23  ;;  %s2206_s1 = sshra.s32 %s1694_s3, 4  ;;  %s2207_s1 = int_to_ptr.hbm [resolvable:$true] %s2206_s1 }
 0x630   : > { %s2208_s27 = scalar_lea.hbm %s2207_s1, 8  ;;  %s2212_s22 = scalar_lea.hbm %s2796_s20, 16 }
 0x631   : > { %p2209_p6 = scmp.ne.s32.totalorder %s2207_s1, %s2208_s27  ;;  %p2213_p10 = scmp.lt.s32.totalorder %s2207_s1, %s2796_s20 }
 0x632   : > { %p2214_p11 = scmp.lt.s32.totalorder %s2212_s22, %s2208_s27 }
 0x633   : > { %p2210_p7 = pnand %p2209_p6, %p2429_p4 }
 0x634   : > { %p2215_p12 = por %p2214_p11, %p2213_p10 }
 0x635   : > { %p2211_p9 = pneg %p2210_p7 }
 0x637   : > { %p2216_p13 = pnand %p2215_p12, %p2211_p9 }
 0x6a5   : > { %v1661_v33 = vpop.f32.mrf.mxu1 }
 0x6a6   : > { %v1665_v34 = vadd.f32 %v1661_v33, %v2681_v52 }
 0x6a8   : > { %v1670_v35 = vadd.f32 %v2137_v32, %v1665_v34 }
 0x6aa   : > { %1671 = vst.msk [vmem:[%s678_s9] sm:$0xff] %vm717_vm0, %v1670_v35 }
 0x6ab   : > { %2219 = shalt.err (!%p2216_p13)
}
 0x6ac   : > { %2055 = dma.vmem_to_hbm [thread:$0]  (%p2429_p4), %s1692_s26, 128, %s1694_s3, %s1673_s18  }
 0x6ad   : > { %v1663_v36 = vpop.f32.mrf.mxu1 }
 0x6ae PF: > { %p2066_p0 = scmp.ge.s32.totalorder %s2274_s19, 2  ;;  %s1723_s0 = sand.u32 1, %s2254_s2  }
 0x6af   : > { %s1724_s8 = scalar_lea.sflag [#allocation5], %s1723_s0 }
 0x6b0   : > { %p2060_p1 = pnand %p2066_p0, %p2436_p8 }
 0x6b2   : > { %p2061_p2 = pneg %p2060_p1 }
 0x6b4   : > { %2245 = dma.done.wait (%p2061_p2), %s1724_s8, 128  }
 0x6b5   : > { %2247 = vsyncadd (%p2061_p2), %s1724_s8, 4294967168  ;;  %s1734_s6 = scalar_lea.sflag [#allocation7], %s1723_s0 }
 0x6b6   : > { %2249 = dma.done.wait (%p2061_p2), %s1734_s6, 256  }
 0x6b7   : > { %2251 = vsyncadd (%p2061_p2), %s1734_s6, 4294967040  ;;  %s38_s19 = sadd.s32 1, %s2274_s19   ;;  %s2840_s4 = sld [smem:[#allocation10_spill]] }
 0x6b8   : > { %p35_p3 = scmp.ge.s32.totalorder %s38_s19, 4   ;;  %s2841_s26 = sld [smem:[#allocation14_spill]] }
 0x6b9   : > { %s2842_s18 = sld [smem:[#allocation11_spill]]  ;;  %s2844_s2 = smov %s2258_s25 }
 0x6ba   : > { %s2843_s27 = sld [smem:[#allocation12_spill]]  ;;  %37 = sbr.rel (!%p35_p3) target bundleno = 19 (0x13), region = 177 }
 0x6bd   : > { %s2845_s25 = smov %s2840_s4 }
 0x6bf   :  { %1740 = vsyncpa [#allocation5], 1 }
 0x6c0   :  { %1742 = vsyncpa [#allocation5 + $0x1], 1 }
 0x6c1   :  { %1743 = vsyncpa [#allocation7], 1 }
 0x6c2   :  { %1745 = vsyncpa [#allocation7 + $0x1], 1 }

// kernel: tpu_custom_call.1
= control target key start
LH: loop header
LB: loop body
LE: loop exit
PB: predicated region body
PF: predicated region fallthrough
CT: control target
= control target key end

     0   :  { %s2776_s0 = inlined_call_operand.vmem [shape: f32[2,8,32], index: 0, kind: input, shape index: {}]   ;;  %s2777_s1 = inlined_call_operand.vmem [shape: f32[2,1,8], index: 1, kind: input, shape index: {}]   ;;  %s2778_s2 = inlined_call_operand.vmem [shape: f32[1,32], index: 2, kind: input, shape index: {}]   ;;  %s2779_s3 = inlined_call_operand.vmem [shape: f32[1,32], index: 3, kind: input, shape index: {}]   ;;  %s2780_s4 = inlined_call_operand.vmem [shape: bf16[4,32,8], index: 4, kind: input, shape index: {}]   ;;  %s2781_s5 = inlined_call_operand.vmem [shape: f32[4,1,8], index: 5, kind: input, shape index: {}]   ;;  %s2782_s6 = inlined_call_operand.vmem [shape: bf16[4,32,8], index: 6, kind: input, shape index: {}]   ;;  %s2783_s7 = inlined_call_operand.vmem [shape: f32[4,1,8], index: 7, kind: input, shape index: {}]   ;;  %s2784_s8 = inlined_call_operand.vmem [shape: bf16[4,32,8], index: 8, kind: input, shape index: {}]   ;;  %s2785_s9 = inlined_call_operand.vmem [shape: f32[4,1,8], index: 9, kind: input, shape index: {}]   ;;  %s2786_s10 = inlined_call_operand.vmem [shape: bf16[4,8,32], index: 10, kind: input, shape index: {}]   ;;  %s2787_s11 = inlined_call_operand.vmem [shape: f32[1,32], index: 11, kind: input, shape index: {}]   ;;  %s2788_s12 = inlined_call_operand.vmem [shape: f32[1,32], index: 12, kind: input, shape index: {}]   ;;  %s2789_s13 = inlined_call_operand.vmem [shape: f32[1,32], index: 13, kind: input, shape index: {}]   ;;  %s2790_s14 = inlined_call_operand.vmem [shape: bf16[32,64], index: 14, kind: input, shape index: {}]   ;;  %s2791_s15 = inlined_call_operand.vmem [shape: f32[1,64], index: 15, kind: input, shape index: {}]   ;;  %s2792_s16 = inlined_call_operand.vmem [shape: bf16[64,32], index: 16, kind: input, shape index: {}]   ;;  %s2793_s17 = inlined_call_operand.vmem [shape: f32[1,32], index: 17, kind: input, shape index: {}]   ;;  %s2794_s18 = inlined_call_operand.vmem [shape: f32[1,32], index: 18, kind: input, shape index: {}]   ;;  %s2795_s19 = inlined_call_operand.vmem [shape: f32[1,32], index: 19, kind: input, shape index: {}]   ;;  %s2796_s20 = inlined_call_operand.hbm [shape: f32[2,8,32], index: 20, kind: output, shape index: {0}]   ;;  %s2797_s21 = inlined_call_operand.hbm [shape: bf16[2,4,8,8], index: 21, kind: output, shape index: {1}]  }
   0x1   :  { %2806 = sst [smem:[#allocation15_spill]] %s2776_s0 }
   0x2   :  { %2807 = sst [smem:[#allocation16_spill]] %s2777_s1 }
   0x3   :  { %2808 = sst [smem:[#allocation17_spill]] %s2778_s2 }
   0x4   :  { %2809 = sst [smem:[#allocation18_spill]] %s2779_s3 }
   0x5   :  { %2810 = sst [smem:[#allocation19_spill]] %s2780_s4 }
   0x6   :  { %2811 = sst [smem:[#allocation20_spill]] %s2781_s5 }
   0x7   :  { %2812 = sst [smem:[#allocation21_spill]] %s2782_s6 }
   0x8   :  { %2813 = sst [smem:[#allocation22_spill]] %s2783_s7 }
   0x9   :  { %2814 = sst [smem:[#allocation23_spill]] %s2784_s8 }
   0xa   :  { %2815 = sst [smem:[#allocation24_spill]] %s2785_s9 }
   0xb   :  { %2816 = sst [smem:[#allocation25_spill]] %s2786_s10 }
   0xc   :  { %2817 = sst [smem:[#allocation26_spill]] %s2787_s11 }
   0xd   :  { %27 = vsyncpa [#allocation5], 0 }
   0xe   :  { %29 = vsyncpa [#allocation5 + $0x1], 0 }
   0xf   :  { %30 = vsyncpa [#allocation7], 0 }
  0x10   :  { %32 = vsyncpa [#allocation7 + $0x1], 0  ;;  %s2389_s2 = smov 0   ;;  %s2391_s25 = smov 0  }
  0x11   :  { %s2393_s26 = smov 0   ;;  %s2395_s18 = smov 0  }
  0x12   :  { %s2397_s27 = smov 0   ;;  %s2399_s19 = smov 0  }
  0x13 LB: > { %2818 = sst [smem:[#allocation10_spill]] %s2262_s26  ;;  %s1824_s3 = sadd.s32 4294967295, %s2274_s19   ;;  %s2274_s19 = sphi %s2399_s19, %s38_s19   ;;  %s2270_s27 = sphi %s2397_s27, %s2843_s27   ;;  %s2266_s18 = sphi %s2395_s18, %s2842_s18   ;;  %s2262_s26 = sphi %s2393_s26, %s2841_s26   ;;  %s2258_s25 = sphi %s2391_s25, %s2845_s25   ;;  %s2254_s2 = sphi %s2389_s2, %s2844_s2  }
  0x14   : > { %2819 = sst [smem:[#allocation11_spill]] %s2270_s27  ;;  %s1825_s28 = sadd.s32 4294967294, %s2274_s19  }
  0x15   : > { %s50_s29 = sadd.s32 1, %s2270_s27  ;;  %s489_s0 = sadd.s32 1, %s2262_s26 }
  0x16   : > { %p52_p0 = scmp.ge.s32.totalorder %s50_s29, 2  ;;  %p499_p1 = scmp.ne.s32.totalorder %s2262_s26, %s2258_s25 }
  0x17   : > { %p500_p2 = scmp.eq.s32.totalorder %s1824_s3, 1  ;;  %p505_p3 = scmp.ne.s32.totalorder %s2258_s25, %s2254_s2 }
  0x18   : > { %s2847_s29 = smov (%p52_p0, %s50_s29), 0  ;;  %p506_p5 = scmp.eq.s32.totalorder %s1825_s28, 1 }
  0x19   : > { %2820 = sst [smem:[#allocation12_spill]] %s2847_s29  ;;  %p2429_p4 = por %p500_p2, %p499_p1 }
  0x1a   : > { %s484_s30 = ssub.s32 %s2270_s27, %s2847_s29  ;;  %p1828_p6 = scmp.ge.s32.totalorder %s2274_s19, 1 }
  0x1b   : > { %p487_p7 = scmp.eq.s32.totalorder %s484_s30, 0  ;;  %p2436_p8 = por %p506_p5, %p505_p3 }
  0x1c   : > { %p619_p9 = scmp.lt.s32.totalorder %s2274_s19, 3 }
  0x1d   : > { %s2822_s5 = scalar_select %p2436_p8, 1, 0 }
  0x1e   : > { %s2442_s22 = scalar_select %p487_p7, %s2262_s26, %s489_s0  }
  0x1f   : > { %2823 = sst [smem:[#allocation13_spill]] %s2822_s5  ;;  %p620_p10 = pnand %p1828_p6, %p619_p9 }
  0x20   : > { %2824 = sst [smem:[#allocation14_spill]] %s2442_s22  ;;  %p686_p11 = scmp.lt.s32.totalorder (!%p620_p10), %s2266_s18, 1 }
  0x21   : > { %623 = sbr.rel (%p620_p10) target bundleno = 1710 (0x6ae), region = 100  ;;  %s2825_s28 = sld [smem:[#allocation16_spill]] (!%p620_p10) }
  0x22   : > { %s2826_s5 = sld [smem:[#allocation15_spill]] (!%p620_p10) }
  0x23   : > { %s2827_s6 = sld [smem:[#allocation21_spill]] (!%p620_p10) }
  0x24   : > { %s2828_s8 = sld [smem:[#allocation23_spill]] (!%p620_p10) }
  0x25   : > { %s2829_s24 = sld [smem:[#allocation17_spill]] (!%p620_p10) }
  0x26   : > { %s2446_s23 = scalar_select %p686_p11, %s2266_s18, 1  ;;  %vm717_vm0 = vcmask 261120   ;;  %v2276_v2 = vmov 32.0   ;;  %vm824_vm8 = vcmask 60416   ;;  %vm1233_vm9 = vcmask 64512  }
  0x27   : > { %2138 = vrcp.f32 %v2276_v2  ;;  %s2830_s22 = sld [smem:[#allocation18_spill]]  ;;  %vm1370_vm10 = vcmask 1043456   ;;  %vm1648_vm14 = vcmask 523264  }
  0x28   : > { %s1831_s1 = sshll.u32 %s2446_s23, 3  ;;  %s2831_s27 = sld [smem:[#allocation19_spill]] }
  0x29   : > { %s689_s0 = scalar_lea.vmem %s2826_s5, %s1831_s1  ;;  %v2025_v19 = vld [vmem:[%s2827_s6 + $0x8] sm:$0xff]  ;;  %v2029_v21 = vld [vmem:[%s2827_s6 + $0x18] sm:$0xff]  ;;  %v2024_v23 = vld [vmem:[%s2827_s6] sm:$0xff]  ;;  %s2833_s7 = sld [smem:[#allocation22_spill]] }
  0x2a   : > { %v2456_v0 = vld [vmem:[%s689_s0] sm:$0xff]  ;;  %v2027_v20 = vld [vmem:[%s2828_s8 + $0x8] sm:$0xff]  ;;  %v2031_v22 = vld [vmem:[%s2828_s8 + $0x18] sm:$0xff]  ;;  %784 = vmatpush.bf16.msra.mxu0 %v2025_v19  ;;  %854 = vmatpush.bf16.msra.mxu2 %v2029_v21  ;;  %s2834_s9 = sld [smem:[#allocation24_spill]]  ;;  %s2836_s5 = scalar_lea.vmem %s2825_s28, %s2446_s23 }
  0x2b   : > { %v718_v1 = vsel %vm717_vm0, %v2456_v0, 0.0  ;;  %816 = vmatpush.bf16.msra.mxu1 %v2027_v20  ;;  %887 = vmatpush.bf16.msra.mxu3 %v2031_v22  ;;  %v2026_v24 = vld [vmem:[%s2828_s8] sm:$0xff]  ;;  %v2028_v25 = vld [vmem:[%s2827_s6 + $0x10] sm:$0xff]  ;;  %v2037_v29 = vld [vmem:[%s2827_s6 + $0x38] sm:$0xff]  ;;  %s2835_s1 = sld [smem:[#allocation20_spill]]  ;;  %s2640_s23 = sand.u32 1, %s2258_s25  }
  0x2c   : > { %719 = vadd.xlane.f32.xlu0 %v718_v1  ;;  %v2030_v26 = vld [vmem:[%s2828_s8 + $0x10] sm:$0xff]  ;;  %v2033_v30 = vld [vmem:[%s2827_s6 + $0x28] sm:$0xff]  ;;  %v2039_v32 = vld [vmem:[%s2828_s8 + $0x38] sm:$0xff]  ;;  %s2837_s10 = sld [smem:[#allocation25_spill]] }
  0x2d   : > { %v2139_v3 = vpop.eup %2138  ;;  %v2035_v31 = vld [vmem:[%s2828_s8 + $0x28] sm:$0xff]  ;;  %v2036_v34 = vld [vmem:[%s2827_s6 + $0x30] sm:$0xff]  ;;  %v2032_v35 = vld [vmem:[%s2827_s6 + $0x20] sm:$0xff]  ;;  %s2838_s11 = sld [smem:[#allocation26_spill]] }
  0x2e   : > { %v722_v4 = vmul.f32 32.0, %v2139_v3  ;;  %vm726_vm1 = vweird.f32 %v2139_v3  ;;  %785 = vmatpush.bf16.msra.mxu0 %v2024_v23  ;;  %855 = vmatpush.bf16.msra.mxu2 %v2028_v25  ;;  %v2034_v36 = vld [vmem:[%s2828_s8 + $0x20] sm:$0xff]  ;;  %v2038_v37 = vld [vmem:[%s2828_s8 + $0x30] sm:$0xff]  ;;  %s2832_s29 = smov %s2831_s27  ;;  %v2045_v56 = vld [vmem:[%s2831_s27 + $0x28] sm:$0xff] }
  0x2f   : > { %817 = vmatpush.bf16.msra.mxu1 %v2026_v24  ;;  %888 = vmatpush.bf16.msra.mxu3 %v2030_v26  ;;  %v2119_v47 = vld [vmem:[%s2829_s24] ss:$0 sm:$0xff]  ;;  %v2041_v57 = vld [vmem:[%s2832_s29 + $0x8] sm:$0xff]  ;;  %v2043_v59 = vld [vmem:[%s2832_s29 + $0x18] sm:$0xff]  ;;  %s1830_s24 = sshll.u32 %s2640_s23, 4 }
  0x30   : > { %v723_v5 = vsub.f32 1.0, %v722_v4  ;;  %v2120_v50 = vld [vmem:[%s2830_s22] ss:$0 sm:$0xff]  ;;  %v2047_v60 = vld [vmem:[%s2832_s29 + $0x38] sm:$0xff]  ;;  %v2046_v2 = vld [vmem:[%s2832_s29 + $0x30] sm:$0xff]  ;;  %s2644_s3 = scalar_lea.vmem [#allocation6], %s1830_s24 }
  0x31   : > { %v2044_v61 = vld [vmem:[%s2832_s29 + $0x20] sm:$0xff] }
  0x32   : > { %v724_v6 = vmul.f32 %v2139_v3, %v723_v5  ;;  %998 = vmatpush.bf16.msrb.mxu2 %v2037_v29  ;;  %926 = vmatpush.bf16.msrb.mxu0 %v2033_v30  ;;  %v2040_v62 = vld [vmem:[%s2832_s29] sm:$0xff] }
  0x33   : > { %959 = vmatpush.bf16.msrb.mxu1 %v2035_v31  ;;  %1031 = vmatpush.bf16.msrb.mxu3 %v2039_v32  ;;  %v2123_v19 = vld [vmem:[%s2833_s7 + $0x1] ss:$0 sm:$0xff]  ;;  %v2125_v29 = vld [vmem:[%s2833_s7 + $0x2] ss:$0 sm:$0xff] }
  0x34   : > { %1047 = vadd.xlane.f32.xlu0 %v718_v1  ;;  %v725_v7 = vadd.f32 %v2139_v3, %v724_v6  ;;  %v2042_v1 = vld [vmem:[%s2832_s29 + $0x10] sm:$0xff]  ;;  %v2124_v20 = vld [vmem:[%s2834_s9 + $0x1] ss:$0 sm:$0xff]  ;;  %v2126_v31 = vld [vmem:[%s2834_s9 + $0x2] ss:$0 sm:$0xff] }
  0x36   : > { %v2460_v8 = vsel %vm726_vm1, %v2139_v3, %v725_v7  ;;  %999 = vmatpush.bf16.msrb.mxu2 %v2036_v34  ;;  %927 = vmatpush.bf16.msrb.mxu0 %v2032_v35 }
  0x37   : > { %960 = vmatpush.bf16.msrb.mxu1 %v2034_v36  ;;  %1032 = vmatpush.bf16.msrb.mxu3 %v2038_v37 }
  0x9f   : > { %v720_v9 = vpop.xlane.xlu0 %719 }
  0xa0   : > { %v728_v10 = vmul.f32 %v2460_v8, %v720_v9 }
  0xa2   : > { %v2464_v11 = vsub.f32 %v2456_v0, %v728_v10 }
  0xa4   : > { %v730_v12 = vmul.f32 %v2464_v11, %v2464_v11 }
  0xa6   : > { %v731_v13 = vsel %vm717_vm0, %v730_v12, 0.0  ;;  %v2122_v12 = vld [vmem:[%s2834_s9] ss:$0 sm:$0xff] }
  0xa7   : > { %732 = vadd.xlane.f32.xlu1 %v731_v13  ;;  %v1048_v14 = vpop.xlane.xlu0 %1047 }
  0xa8   : > { %v1056_v15 = vmul.f32 %v1048_v14, %v2460_v8 }
  0xaa   : > { %v2471_v16 = vsub.f32 %v2456_v0, %v1056_v15 }
  0xac   : > { %v1058_v17 = vmul.f32 %v2471_v16, %v2471_v16 }
  0xae   : > { %v1059_v18 = vsel %vm717_vm0, %v1058_v17, 0.0 }
  0xaf   : > { %1060 = vadd.xlane.f32.xlu1 %v1059_v18 }
 0x11a   : > { %v733_v27 = vpop.xlane.xlu1 %732 }
 0x11b   : > { %v734_v28 = vmul.f32 %v733_v27, %v2460_v8 }
 0x11d   : > { %v735_v33 = vadd.f32 1e-05, %v734_v28 }
 0x11f   : > { %2140 = vrsqrt.f32 %v735_v33  ;;  %vm742_vm3 = vweird.f32 %v735_v33 }
 0x122   : > { %v1061_v38 = vpop.xlane.xlu1 %1060 }
 0x123   : > { %v1062_v39 = vmul.f32 %v1061_v38, %v2460_v8 }
 0x125   : > { %v2141_v40 = vpop.eup %2140  ;;  %v1063_v42 = vadd.f32 1e-05, %v1062_v39 }
 0x126   : > { %v737_v41 = vmul.f32 %v2141_v40, %v735_v33  ;;  %vm743_vm2 = vweird.f32 %v2141_v40 }
 0x127   : > { %2142 = vrsqrt.f32 %v1063_v42  ;;  %vm744_vm4 = vmor %vm742_vm3, %vm743_vm2  ;;  %vm1070_vm5 = vweird.f32 %v1063_v42 }
 0x128   : > { %v738_v43 = vmul.f32 %v2141_v40, %v737_v41 }
 0x12a   : > { %v739_v44 = vmul.f32 0.5, %v738_v43 }
 0x12c   : > { %v740_v45 = vsub.f32 1.5, %v739_v44  ;;  %v2127_v44 = vld [vmem:[%s2833_s7 + $0x3] ss:$0 sm:$0xff] }
 0x12d   : > { %v2143_v49 = vpop.eup %2142 }
 0x12e   : > { %v741_v46 = vmul.f32 %v2141_v40, %v740_v45  ;;  %v1065_v53 = vmul.f32 %v2143_v49, %v1063_v42  ;;  %vm1071_vm6 = vweird.f32 %v2143_v49 }
 0x12f   : > { %vm1072_vm7 = vmor %vm1070_vm5, %vm1071_vm6 }
 0x130   : > { %v745_v48 = vsel %vm744_vm4, %v2141_v40, %v741_v46  ;;  %v1066_v58 = vmul.f32 %v2143_v49, %v1065_v53 }
 0x131   : > { %v746_v51 = vmul.f32 %v745_v48, %v2464_v11  ;;  %v2121_v11 = vld [vmem:[%s2833_s7] ss:$0 sm:$0xff]  ;;  %s2054_s7 = sshll.u32 %s2266_s18, 4 }
 0x132   : > { %v1067_v63 = vmul.f32 0.5, %v1066_v58  ;;  %s1705_s0 = scalar_lea.hbm %s2797_s21, %s2054_s7 }
 0x133   : > { %v750_v52 = vmul.f32 %v2119_v47, %v746_v51  ;;  %s1708_s27 = sshll.u32 %s1705_s0, 4  ;;  %s1709_s27 = int_to_ptr.hbm [resolvable:$true] %s1708_s27 }
 0x134   : > { %v1068_v3 = vsub.f32 1.5, %v1067_v63  ;;  %s2178_s24 = sshra.s32 %s1709_s27, 4  ;;  %s2179_s24 = int_to_ptr.hbm [resolvable:$true] %s2178_s24 }
 0x135   : > { %v754_v54 = vadd.f32 %v2120_v50, %v750_v52  ;;  %s2180_s26 = scalar_lea.hbm %s2179_s24, 16  ;;  %p2185_p1 = scmp.lt.s32.totalorder %s2179_s24, %s2797_s21 }
 0x136   : > { %v1069_v4 = vmul.f32 %v2143_v49, %v1068_v3  ;;  %p2181_p12 = scmp.ne.s32.totalorder %s2179_s24, %s2180_s26 }
 0x137   : > { %v755_v55 = vpack.c.bf16 %v754_v54, %v754_v54 }
 0x138   : > { %v1073_v5 = vsel %vm1072_vm7, %v2143_v49, %v1069_v4  ;;  %p2182_p13 = pnand %p2181_p12, %p2429_p4 }
 0x139   : > { %1840 = vmatmul.msk.bf16.vlgmr.msra.gmra.mxu0 %vm717_vm0, %v755_v55  ;;  %1849 = vmatmul.msk.bf16.vlgmr.msra.gmra.mxu1 %vm717_vm0, %v755_v55  ;;  %v1074_v6 = vmul.f32 %v1073_v5, %v2471_v16 }
 0x13a   : > { %1862 = vmatmul.msk.bf16.vlgmr.msra.gmra.mxu2 %vm717_vm0, %v755_v55  ;;  %1875 = vmatmul.msk.bf16.vlgmr.msra.gmra.mxu3 %vm717_vm0, %v755_v55  ;;  %p2183_p0 = pneg %p2182_p13 }
 0x13b   : > { %1182 = vmatpush.bf16.msra.mxu2 %v2045_v56  ;;  %1112 = vmatpush.bf16.msra.mxu0 %v2041_v57  ;;  %v1078_v7 = vmul.f32 %v2119_v47, %v1074_v6  ;;  %v2128_v47 = vld [vmem:[%s2834_s9 + $0x3] ss:$0 sm:$0xff]  ;;  %v2129_v57 = vld [vmem:[%s2835_s1] ss:$0 sm:$0xff]  ;;  %v2131_v6 = vld [vmem:[%s2835_s1 + $0x2] ss:$0 sm:$0xff] }
 0x13c   : > { %1147 = vmatpush.bf16.msra.mxu1 %v2043_v59  ;;  %1217 = vmatpush.bf16.msra.mxu3 %v2047_v60  ;;  %v2130_v59 = vld [vmem:[%s2835_s1 + $0x1] ss:$0 sm:$0xff]  ;;  %s2184_s9 = scalar_lea.hbm %s2797_s21, 32 }
 0x13d   : > { %v1082_v9 = vadd.f32 %v2120_v50, %v1078_v7  ;;  %p2186_p2 = scmp.lt.s32.totalorder %s2184_s9, %s2180_s26 }
 0x13f   : > { %1183 = vmatpush.bf16.msra.mxu2 %v2044_v61  ;;  %1113 = vmatpush.bf16.msra.mxu0 %v2040_v62  ;;  %v1083_v10 = vpack.c.bf16 %v1082_v9, %v1082_v9  ;;  %p2187_p3 = por %p2186_p2, %p2185_p1 }
 0x140   : > { %1148 = vmatpush.bf16.msra.mxu1 %v2042_v1  ;;  %1218 = vmatpush.bf16.msra.mxu3 %v2046_v2 }
 0x141   : > { %p2188_p5 = pnand %p2187_p3, %p2183_p0 }
 0x149   : > { %1888 = vmatmul.msk.bf16.vlgmr.msrb.gmra.mxu0 %vm717_vm0, %v755_v55  ;;  %1901 = vmatmul.msk.bf16.vlgmr.msrb.gmra.mxu1 %vm717_vm0, %v755_v55 }
 0x14a   : > { %1914 = vmatmul.msk.bf16.vlgmr.msrb.gmra.mxu2 %vm717_vm0, %v755_v55  ;;  %1927 = vmatmul.msk.bf16.vlgmr.msrb.gmra.mxu3 %vm717_vm0, %v755_v55 }
 0x159   : > { %1936 = vmatmul.msk.bf16.vlgmr.msra.gmra.mxu0 %vm717_vm0, %v1083_v10  ;;  %1949 = vmatmul.msk.bf16.vlgmr.msra.gmra.mxu1 %vm717_vm0, %v1083_v10 }
 0x15a   : > { %1962 = vmatmul.msk.bf16.vlgmr.msra.gmra.mxu2 %vm717_vm0, %v1083_v10  ;;  %1975 = vmatmul.msk.bf16.vlgmr.msra.gmra.mxu3 %vm717_vm0, %v1083_v10 }
 0x1b6   : > { %v787_v13 = vpop.f32.mrf.mxu0  ;;  %v819_v14 = vpop.f32.mrf.mxu1 }
 0x1b7   : > { %v788_v15 = vadd.f32 %v2121_v11, %v787_v13  ;;  %v820_v16 = vadd.f32 %v2122_v12, %v819_v14  ;;  %v2132_v13 = vld [vmem:[%s2835_s1 + $0x3] ss:$0 sm:$0xff]  ;;  %s1706_s1 = sshll.u32 %s2644_s3, 4  ;;  %s1707_s1 = int_to_ptr.vmem [resolvable:$true] %s1706_s1 }
 0x1b9   : > { %v823_v17 = vpack.c.bf16 %v788_v15, %v788_v15  ;;  %v826_v18 = vpack.c.bf16 %v820_v16, %v820_v16 }
 0x1bb   : > { %825 = vst.msk [vmem:[#allocation2] sm:$0xf] %vm824_vm8, %v823_v17 }
 0x1bc   : > { %827 = vst.msk [vmem:[#allocation3] sm:$0xf] %vm824_vm8, %v826_v18 }
 0x1bd   : > { %v857_v21 = vpop.f32.mrf.mxu2  ;;  %v890_v22 = vpop.f32.mrf.mxu3 }
 0x1be   : > { %v858_v23 = vadd.f32 %v2123_v19, %v857_v21  ;;  %v891_v24 = vadd.f32 %v2124_v20, %v890_v22  ;;  %v789_v25 = vpop.f32.mrf.mxu0  ;;  %v821_v26 = vpop.f32.mrf.mxu1 }
 0x1c0   : > { %v894_v27 = vpack.c.bf16 %v858_v23, %v858_v23  ;;  %v897_v28 = vpack.c.bf16 %v891_v24, %v891_v24 }
 0x1c2   : > { %896 = vst.msk [vmem:[#allocation2 + $0x4] sm:$0xf] %vm824_vm8, %v894_v27  ;;  %v1226_v30 = vld [vmem:[#allocation2] sm:$0xf] }
 0x1c3   : > { %899 = vst.msk [vmem:[#allocation3 + $0x4] sm:$0xf] %vm824_vm8, %v897_v28  ;;  %v1238_v32 = vsel %vm1233_vm9, %v1226_v30, 0  ;;  %v1363_v33 = vld [vmem:[#allocation3] sm:$0xf] }
 0x1c4   : > { %1247 = vmatpush.bf16.xpose.msrb.mxu0 %v1238_v32  ;;  %v1372_v34 = vsel %vm1370_vm10, %v1363_v33, 0 }
 0x1c5   : > { %v859_v35 = vpop.f32.mrf.mxu2  ;;  %v892_v36 = vpop.f32.mrf.mxu3 }
 0x1c6   : > { %v929_v37 = vpop.f32.mrf.mxu0  ;;  %v962_v38 = vpop.f32.mrf.mxu1 }
 0x1c7   : > { %v930_v39 = vadd.f32 %v2125_v29, %v929_v37  ;;  %v963_v40 = vadd.f32 %v2126_v31, %v962_v38  ;;  %v2118_v29 = vld [vmem:[%s2836_s5] ss:$0 sm:$0xff]  ;;  %s1678_s5 = scalar_lea.sflag [#allocation7], %s2640_s23 }
 0x1c9   : > { %v966_v41 = vpack.c.bf16 %v930_v39, %v930_v39  ;;  %v969_v42 = vpack.c.bf16 %v963_v40, %v963_v40  ;;  %v1227_v43 = vld [vmem:[#allocation2 + $0x4] sm:$0xf] }
 0x1ca   : > { %v1257_v45 = vsel %vm1233_vm9, %v1227_v43, 0  ;;  %v1364_v46 = vld [vmem:[#allocation3 + $0x4] sm:$0xf] }
 0x1cb   : > { %968 = vst.msk [vmem:[#allocation2 + $0x8] sm:$0xf] %vm824_vm8, %v966_v41  ;;  %1266 = vmatpush.bf16.xpose.msrb.mxu1 %v1257_v45  ;;  %v1391_v48 = vsel %vm1370_vm10, %v1364_v46, 0 }
 0x1cc   : > { %1381 = vmatpush.bf16.msra.mxu0 %v1372_v34  ;;  %971 = vst.msk [vmem:[#allocation3 + $0x8] sm:$0xf] %vm824_vm8, %v969_v42 }
 0x1cd   : > { %v1001_v49 = vpop.f32.mrf.mxu2  ;;  %v1034_v50 = vpop.f32.mrf.mxu3 }
 0x1ce   : > { %v1002_v51 = vadd.f32 %v2127_v44, %v1001_v49  ;;  %v1035_v52 = vadd.f32 %v2128_v47, %v1034_v50  ;;  %v931_v53 = vpop.f32.mrf.mxu0  ;;  %v964_v54 = vpop.f32.mrf.mxu1 }
 0x1d0   : > { %v1038_v55 = vpack.c.bf16 %v1002_v51, %v1002_v51  ;;  %v1041_v56 = vpack.c.bf16 %v1035_v52, %v1035_v52 }
 0x1d2   : > { %1040 = vst.msk [vmem:[#allocation2 + $0xc] sm:$0xf] %vm824_vm8, %v1038_v55  ;;  %v1228_v58 = vld [vmem:[#allocation2 + $0x8] sm:$0xf] }
 0x1d3   : > { %1400 = vmatpush.bf16.msra.mxu1 %v1391_v48  ;;  %1043 = vst.msk [vmem:[#allocation3 + $0xc] sm:$0xf] %vm824_vm8, %v1041_v56  ;;  %v1276_v60 = vsel %vm1233_vm9, %v1228_v58, 0  ;;  %v1365_v61 = vld [vmem:[#allocation3 + $0x8] sm:$0xf] }
 0x1d4   : > { %1285 = vmatpush.bf16.xpose.msrb.mxu2 %v1276_v60  ;;  %v1410_v62 = vsel %vm1370_vm10, %v1365_v61, 0 }
 0x1d5   : > { %v1003_v63 = vpop.f32.mrf.mxu2  ;;  %v1036_v1 = vpop.f32.mrf.mxu3 }
 0x1d6   : > { %v1115_v2 = vpop.f32.mrf.mxu0  ;;  %v1150_v3 = vpop.f32.mrf.mxu1 }
 0x1d7   : > { %v1116_v4 = vadd.f32 %v2129_v57, %v1115_v2  ;;  %v1151_v5 = vadd.f32 %v2130_v59, %v1150_v3 }
 0x1d9   : > { %v1119_v7 = vmul.f32 0.35355338, %v1116_v4  ;;  %v1154_v9 = vmul.f32 0.35355338, %v1151_v5  ;;  %v1229_v10 = vld [vmem:[#allocation2 + $0xc] sm:$0xf] }
 0x1da   : > { %v1295_v11 = vsel %vm1233_vm9, %v1229_v10, 0  ;;  %v1366_v12 = vld [vmem:[#allocation3 + $0xc] sm:$0xf] }
 0x1db   : > { %v1120_v14 = vpack.c.bf16 %v1119_v7, %v1119_v7  ;;  %v1155_v15 = vpack.c.bf16 %v1154_v9, %v1154_v9  ;;  %1304 = vmatpush.bf16.xpose.msrb.mxu3 %v1295_v11  ;;  %v1429_v16 = vsel %vm1370_vm10, %v1366_v12, 0 }
 0x1dc   : > { %1419 = vmatpush.bf16.msra.mxu2 %v1410_v62 }
 0x1dd   : > { %v1185_v17 = vpop.f32.mrf.mxu2  ;;  %v1220_v18 = vpop.f32.mrf.mxu3  ;;  %1976 = vmatmul.msk.bf16.vlgmr.msrb.gmra.mxu0 %vm1233_vm9, %v1120_v14  ;;  %1977 = vmatmul.msk.bf16.vlgmr.msrb.gmra.mxu1 %vm1233_vm9, %v1155_v15 }
 0x1de   : > { %v1186_v19 = vadd.f32 %v2131_v6, %v1185_v17  ;;  %v1221_v20 = vadd.f32 %v2132_v13, %v1220_v18  ;;  %v1117_v21 = vpop.f32.mrf.mxu0  ;;  %v1152_v22 = vpop.f32.mrf.mxu1 }
 0x1df   : > { %v1987_v22 = vld [vmem:[%s2837_s10 + $0x8] sm:$0xf] }
 0x1e0   : > { %v1189_v23 = vmul.f32 0.35355338, %v1186_v19  ;;  %v1224_v24 = vmul.f32 0.35355338, %v1221_v20  ;;  %v1448_v20 = vld [vmem:[%s2837_s10] sm:$0xf] }
 0x1e1   : > { %v1453_v21 = vsel %vm1370_vm10, %v1448_v20, 0 }
 0x1e2   : > { %v1190_v25 = vpack.c.bf16 %v1189_v23, %v1189_v23  ;;  %v1225_v26 = vpack.c.bf16 %v1224_v24, %v1224_v24  ;;  %1462 = vmatpush.bf16.msrb.mxu0 %v1453_v21  ;;  %v1989_v23 = vld [vmem:[%s2837_s10 + $0xc] sm:$0xf]  ;;  %v1985_v24 = vld [vmem:[%s2837_s10 + $0x4] sm:$0xf] }
 0x1e3   : > { %1438 = vmatpush.bf16.msra.mxu3 %v1429_v16 }
 0x1e4   : > { %1978 = vmatmul.msk.bf16.vlgmr.msrb.gmra.mxu2 %vm1233_vm9, %v1190_v25  ;;  %1979 = vmatmul.msk.bf16.vlgmr.msrb.gmra.mxu3 %vm1233_vm9, %v1225_v26  ;;  %v1500_v25 = vsel %vm1370_vm10, %v1987_v22, 0  ;;  %v1522_v26 = vsel %vm1370_vm10, %v1989_v23, 0 }
 0x1e5   : > { %v1187_v27 = vpop.f32.mrf.mxu2  ;;  %v1222_v28 = vpop.f32.mrf.mxu3  ;;  %1509 = vmatpush.bf16.msrb.mxu2 %v1500_v25 }
 0x1e6   : > { %v1478_v27 = vsel %vm1370_vm10, %v1985_v24, 0 }
 0x1e7   : > { %1531 = vmatpush.bf16.msrb.mxu3 %v1522_v26  ;;  %1487 = vmatpush.bf16.msrb.mxu1 %v1478_v27 }
 0x25a   : > { %v1249_v30 = vpop.f32.mrf.mxu0  ;;  %v1268_v31 = vpop.f32.mrf.mxu1 }
 0x25b   : > { %v1250_v32 = vadd.f32 %v2118_v29, %v1249_v30  ;;  %v1269_v33 = vadd.f32 %v2118_v29, %v1268_v31 }
 0x25d   : > { %v1313_v34 = vsel %vm1233_vm9, %v1269_v33, -inf  ;;  %v1310_v35 = vsel %vm1233_vm9, %v1250_v32, -inf }
 0x25e   : > { %1314 = vmax.xlane.f32.xlu1 %v1313_v34  ;;  %1311 = vmax.xlane.f32.xlu0 %v1310_v35 }
 0x262   : > { %v1251_v36 = vpop.f32.mrf.mxu0  ;;  %v1270_v37 = vpop.f32.mrf.mxu1 }
 0x267   : > { %v1287_v38 = vpop.f32.mrf.mxu2  ;;  %v1306_v39 = vpop.f32.mrf.mxu3 }
 0x268   : > { %v1288_v40 = vadd.f32 %v2118_v29, %v1287_v38  ;;  %v1307_v42 = vadd.f32 %v2118_v29, %v1306_v39 }
 0x26a   : > { %v1316_v41 = vsel %vm1233_vm9, %v1288_v40, -inf  ;;  %v1319_v45 = vsel %vm1233_vm9, %v1307_v42, -inf }
 0x26b   : > { %1317 = vmax.xlane.f32.xlu2 %v1316_v41 }
 0x26f   : > { %v1289_v43 = vpop.f32.mrf.mxu2  ;;  %v1308_v44 = vpop.f32.mrf.mxu3 }
 0x270   : > { %v2133_v43 = vld [vmem:[%s2838_s11] ss:$0 sm:$0xff] }
 0x273   : > { %1320 = vmax.xlane.f32.xlu2 %v1319_v45 }
 0x2d1   : > { %v1312_v46 = vpop.xlane.xlu0 %1311  ;;  %v1315_v50 = vpop.xlane.xlu1 %1314 }
 0x2d2   : > { %v1322_v47 = vsub.f32 %v1250_v32, %v1312_v46  ;;  %v1323_v54 = vsub.f32 %v1269_v33, %v1315_v50 }
 0x2d4   : > { %v1326_v48 = vmul.f32 1.442695, %v1322_v47  ;;  %v1328_v56 = vmul.f32 1.442695, %v1323_v54 }
 0x2d6   : > { %2144 = vpow2.f32 %v1326_v48 }
 0x2dc   : > { %v2145_v49 = vpop.eup %2144 }
 0x2dd   : > { %v1334_v52 = vsel %vm1233_vm9, %v2145_v49, 0.0 }
 0x2de   : > { %v1318_v51 = vpop.xlane.xlu2 %1317  ;;  %1335 = vadd.xlane.f32.xlu1 %v1334_v52 }
 0x2df   : > { %v1324_v53 = vsub.f32 %v1288_v40, %v1318_v51 }
 0x2e1   : > { %v1330_v55 = vmul.f32 1.442695, %v1324_v53 }
 0x2e3   : > { %2146 = vpow2.f32 %v1330_v55 }
 0x2e4   : > { %2148 = vpow2.f32 %v1328_v56 }
 0x2e6   : > { %v1321_v57 = vpop.xlane.xlu2 %1320 }
 0x2e7   : > { %v1325_v58 = vsub.f32 %v1307_v42, %v1321_v57 }
 0x2e9   : > { %v2147_v59 = vpop.eup %2146  ;;  %v1332_v60 = vmul.f32 1.442695, %v1325_v58 }
 0x2ea   : > { %v1340_v61 = vsel %vm1233_vm9, %v2147_v59, 0.0  ;;  %v2149_v62 = vpop.eup %2148 }
 0x2eb   : > { %2150 = vpow2.f32 %v1332_v60  ;;  %1341 = vadd.xlane.f32.xlu2 %v1340_v61  ;;  %v1337_v1 = vsel %vm1233_vm9, %v2149_v62, 0.0  ;;  %v2049_v60 = vld [vmem:[%s2790_s14 + $0x8] sm:$0xff] }
 0x2f1   : > { %v2151_v63 = vpop.eup %2150 }
 0x2f2   : > { %v1343_v2 = vsel %vm1233_vm9, %v2151_v63, 0.0 }
 0x2f3   : > { %1338 = vadd.xlane.f32.xlu2 %v1337_v1  ;;  %1344 = vadd.xlane.f32.xlu0 %v1343_v2 }
 0x351   : > { %v1336_v3 = vpop.xlane.xlu1 %1335 }
 0x352   : > { %2152 = vrcp.f32 %v1336_v3 }
 0x358   : > { %v2153_v4 = vpop.eup %2152 }
 0x359   : > { %v1350_v5 = vmul.f32 %v2153_v4, %v2145_v49 }
 0x35b   : > { %v1354_v6 = vpack.c.bf16 %v1350_v5, %v1350_v5 }
 0x35d   : > { %1980 = vmatmul.msk.bf16.vlgmr.msra.gmra.mxu0 %vm1233_vm9, %v1354_v6  ;;  %1359 = vst.msk [vmem:[%s2644_s3] sm:$0xf] %vm824_vm8, %v1354_v6 }
 0x35e   : > { %v1342_v7 = vpop.xlane.xlu2 %1341  ;;  %1599 = vmatpush.bf16.msra.mxu0 %v2049_v60 }
 0x35f   : > { %2154 = vrcp.f32 %v1342_v7  ;;  %v2134_v7 = vld [vmem:[%s2788_s12] ss:$0 sm:$0xff] }
 0x365   : > { %v2155_v9 = vpop.eup %2154 }
 0x366   : > { %v1352_v10 = vmul.f32 %v2155_v9, %v2147_v59  ;;  %v1339_v11 = vpop.xlane.xlu2 %1338  ;;  %v1345_v12 = vpop.xlane.xlu0 %1344 }
 0x367   : > { %2156 = vrcp.f32 %v1339_v11 }
 0x368   : > { %v1356_v13 = vpack.c.bf16 %v1352_v10, %v1352_v10  ;;  %2158 = vrcp.f32 %v1345_v12 }
 0x36a   : > { %1982 = vmatmul.msk.bf16.vlgmr.msra.gmra.mxu2 %vm1233_vm9, %v1356_v13  ;;  %1361 = vst.msk [vmem:[%s2644_s3 + $0x8] sm:$0xf] %vm824_vm8, %v1356_v13 }
 0x36d   : > { %v2157_v14 = vpop.eup %2156 }
 0x36e   : > { %v2159_v15 = vpop.eup %2158  ;;  %v1351_v16 = vmul.f32 %v2157_v14, %v2149_v62  ;;  %v2053_v14 = vld [vmem:[%s2792_s16 + $0x18] sm:$0xff] }
 0x36f   : > { %v1353_v17 = vmul.f32 %v2159_v15, %v2151_v63  ;;  %v2052_v15 = vld [vmem:[%s2792_s16 + $0x10] sm:$0xff] }
 0x370   : > { %v1355_v18 = vpack.c.bf16 %v1351_v16, %v1351_v16  ;;  %v2051_v16 = vld [vmem:[%s2792_s16 + $0x8] sm:$0xff] }
 0x371   : > { %v1357_v19 = vpack.c.bf16 %v1353_v17, %v1353_v17  ;;  %v2050_v17 = vld [vmem:[%s2792_s16] sm:$0xff] }
 0x372   : > { %1981 = vmatmul.msk.bf16.vlgmr.msra.gmra.mxu1 %vm1233_vm9, %v1355_v18  ;;  %1360 = vst.msk [vmem:[%s2644_s3 + $0x4] sm:$0xf] %vm824_vm8, %v1355_v18  ;;  %v2136_v18 = vld [vmem:[%s2791_s15] ss:$0 sm:$0xff] }
 0x373   : > { %1983 = vmatmul.msk.bf16.vlgmr.msra.gmra.mxu3 %vm1233_vm9, %v1357_v19  ;;  %1362 = vst.msk [vmem:[%s2644_s3 + $0xc] sm:$0xf] %vm824_vm8, %v1357_v19  ;;  %1656 = vmatpush.bf16.msra.mxu1 %v2053_v14 }
 0x377   : > { %1657 = vmatpush.bf16.msra.mxu1 %v2052_v15 }
 0x37b   : > { %1658 = vmatpush.bf16.msra.mxu1 %v2051_v16 }
 0x37f   : > { %1659 = vmatpush.bf16.msra.mxu1 %v2050_v17 }
 0x3da   : > { %v1383_v28 = vpop.f32.mrf.mxu0 }
 0x3db   : > { %v1444_v29 = vpack.c.bf16 %v1383_v28, %v1383_v28 }
 0x3dd   : > { %1984 = vmatmul.msk.bf16.vlgmr.msrb.gmra.mxu0 %vm1233_vm9, %v1444_v29 }
 0x3e2   : > { %v1385_v30 = vpop.f32.mrf.mxu0 }
 0x3ed   : > { %v1421_v31 = vpop.f32.mrf.mxu2 }
 0x3ee   : > { %v1446_v32 = vpack.c.bf16 %v1421_v31, %v1421_v31 }
 0x3ef   : > { %v1402_v33 = vpop.f32.mrf.mxu1 }
 0x3f0   : > { %v1445_v34 = vpack.c.bf16 %v1402_v33, %v1402_v33  ;;  %1988 = vmatmul.msk.bf16.vlgmr.msrb.gmra.mxu2 %vm1233_vm9, %v1446_v32 }
 0x3f2   : > { %1986 = vmatmul.msk.bf16.vlgmr.msrb.gmra.mxu1 %vm1233_vm9, %v1445_v34 }
 0x3f5   : > { %v1423_v35 = vpop.f32.mrf.mxu2 }
 0x3f6   : > { %v1440_v36 = vpop.f32.mrf.mxu3 }
 0x3f7   : > { %v1447_v37 = vpack.c.bf16 %v1440_v36, %v1440_v36  ;;  %v1404_v38 = vpop.f32.mrf.mxu1 }
 0x3f9   : > { %1990 = vmatmul.msk.bf16.vlgmr.msrb.gmra.mxu3 %vm1233_vm9, %v1447_v37 }
 0x3fe   : > { %v1442_v39 = vpop.f32.mrf.mxu3 }
 0x45a   : > { %v1464_v40 = vpop.f32.mrf.mxu0 }
 0x45b   : > { %v1471_v45 = vadd.f32 %v2133_v43, %v1464_v40 }
 0x462   : > { %v1466_v41 = vpop.f32.mrf.mxu0 }
 0x46f   : > { %v1489_v42 = vpop.f32.mrf.mxu1 }
 0x470   : > { %v1493_v47 = vadd.f32 %v1489_v42, %v1471_v45 }
 0x473   : > { %v1511_v44 = vpop.f32.mrf.mxu2 }
 0x474   : > { %v1515_v48 = vadd.f32 %v1511_v44, %v1493_v47 }
 0x477   : > { %v1491_v46 = vpop.f32.mrf.mxu1 }
 0x47b   : > { %v1513_v49 = vpop.f32.mrf.mxu2 }
 0x47c   : > { %v1533_v50 = vpop.f32.mrf.mxu3 }
 0x47d   : > { %v1537_v51 = vadd.f32 %v1533_v50, %v1515_v48 }
 0x47f   : > { %v2681_v52 = vadd.f32 %v1537_v51, %v2456_v0  ;;  %v2048_v0 = vld [vmem:[%s2790_s14] sm:$0xff] }
 0x480   : > { %1600 = vmatpush.bf16.msra.mxu0 %v2048_v0 }
 0x481   : > { %v1539_v53 = vsel %vm717_vm0, %v2681_v52, 0.0 }
 0x482   : > { %1540 = vadd.xlane.f32.xlu0 %v1539_v53 }
 0x484   : > { %v1535_v54 = vpop.f32.mrf.mxu3 }
 0x4f5   : > { %v1541_v55 = vpop.xlane.xlu0 %1540 }
 0x4f6   : > { %v1542_v56 = vmul.f32 %v1541_v55, %v2460_v8 }
 0x4f8   : > { %v1543_v57 = vsub.f32 %v2681_v52, %v1542_v56 }
 0x4fa   : > { %v1544_v58 = vmul.f32 %v1543_v57, %v1543_v57 }
 0x4fc   : > { %v1545_v59 = vsel %vm717_vm0, %v1544_v58, 0.0 }
 0x4fd   : > { %1546 = vadd.xlane.f32.xlu1 %v1545_v59 }
 0x570   : > { %v1547_v61 = vpop.xlane.xlu1 %1546 }
 0x571   : > { %v1548_v62 = vmul.f32 %v1547_v61, %v2460_v8  ;;  %v2135_v8 = vld [vmem:[%s2789_s13] ss:$0 sm:$0xff] }
 0x573   : > { %v1549_v63 = vadd.f32 1e-05, %v1548_v62 }
 0x575   : > { %2160 = vrsqrt.f32 %v1549_v63  ;;  %vm1556_vm12 = vweird.f32 %v1549_v63 }
 0x57b   : > { %v2161_v1 = vpop.eup %2160 }
 0x57c   : > { %v1551_v2 = vmul.f32 %v2161_v1, %v1549_v63  ;;  %vm1557_vm11 = vweird.f32 %v2161_v1 }
 0x57d   : > { %vm1558_vm13 = vmor %vm1556_vm12, %vm1557_vm11 }
 0x57e   : > { %v1552_v3 = vmul.f32 %v2161_v1, %v1551_v2 }
 0x580   : > { %v1553_v4 = vmul.f32 0.5, %v1552_v3 }
 0x582   : > { %v1554_v5 = vsub.f32 1.5, %v1553_v4 }
 0x584   : > { %v1555_v6 = vmul.f32 %v2161_v1, %v1554_v5 }
 0x586   : > { %v1559_v9 = vsel %vm1558_vm13, %v2161_v1, %v1555_v6 }
 0x587   : > { %v1560_v10 = vmul.f32 %v1559_v9, %v1543_v57 }
 0x589   : > { %v1564_v11 = vmul.f32 %v2134_v7, %v1560_v10 }
 0x58b   : > { %v1568_v12 = vadd.f32 %v2135_v8, %v1564_v11 }
 0x58d   : > { %v1569_v13 = vpack.c.bf16 %v1568_v12, %v1568_v12 }
 0x58f   : > { %1999 = vmatmul.msk.bf16.vlgmr.msra.gmra.mxu0 %vm717_vm0, %v1569_v13 }
 0x60c   : > { %v1602_v19 = vpop.f32.mrf.mxu0 }
 0x60d   : > { %v1603_v20 = vadd.f32 %v2136_v18, %v1602_v19 }
 0x60f   : > { %v1606_v21 = vmul.f32 %v1603_v20, %v1603_v20 }
 0x611   : > { %v1607_v22 = vmul.f32 %v1606_v21, %v1603_v20 }
 0x613   : > { %v1608_v23 = vmul.f32 0.044715, %v1607_v22 }
 0x614   : > { %v1604_v24 = vpop.f32.mrf.mxu0 }
 0x615   : > { %v1609_v25 = vadd.f32 %v1608_v23, %v1603_v20 }
 0x617   : > { %v1610_v26 = vmul.f32 0.7978846, %v1609_v25 }
 0x619   : > { %2162 = vtanh.f32 %v1610_v26 }
 0x61f   : > { %v2163_v27 = vpop.eup %2162 }
 0x620   : > { %v1612_v28 = vadd.f32 1.0, %v2163_v27 }
 0x622   : > { %v1613_v29 = vmul.f32 0.5, %v1612_v28 }
 0x624   : > { %v1614_v30 = vmul.f32 %v1613_v29, %v1603_v20 }
 0x626   : > { %v1615_v31 = vpack.c.bf16 %v1614_v30, %v1614_v30 }
 0x628   : > { %2016 = vmatmul.msk.bf16.vlgmr.msra.gmra.mxu1 %vm1648_vm14, %v1615_v31 }
 0x629   : > { %2191 = shalt.err (!%p2188_p5)
}
 0x62a   : > { %s2277_s7 = smov 64   ;;  %s2278_s22 = smov 4   ;;  %v2137_v32 = vld [vmem:[%s2793_s17] ss:$0 sm:$0xff] }
 0x62b   : > { %2056 = dma.vmem_to_hbm [thread:$0]  (%p2429_p4), %s1707_s1, 256, %s1709_s27, %s1678_s5, %s2277_s7, %s2277_s7, %s2278_s22  }
 0x62c   : > { %s1829_s30 = sshll.u32 %s2640_s23, 3  ;;  %s2019_s0 = sshll.u32 %s2266_s18, 3 }
 0x62d   : > { %s1689_s11 = scalar_lea.hbm %s2796_s20, %s2019_s0  ;;  %s678_s9 = scalar_lea.vmem [#allocation4], %s1829_s30 }
 0x62e   : > { %s1691_s26 = sshll.u32 %s678_s9, 4  ;;  %s1693_s3 = sshll.u32 %s1689_s11, 4  ;;  %s1692_s26 = int_to_ptr.vmem [resolvable:$true] %s1691_s26  ;;  %s1694_s3 = int_to_ptr.hbm [resolvable:$true] %s1693_s3 }
 0x62f   : > { %s1673_s18 = scalar_lea.sflag [#allocation5], %s2640_s23  ;;  %s2206_s1 = sshra.s32 %s1694_s3, 4  ;;  %s2207_s1 = int_to_ptr.hbm [resolvable:$true] %s2206_s1 }
 0x630   : > { %s2208_s27 = scalar_lea.hbm %s2207_s1, 8  ;;  %s2212_s22 = scalar_lea.hbm %s2796_s20, 16 }
 0x631   : > { %p2209_p6 = scmp.ne.s32.totalorder %s2207_s1, %s2208_s27  ;;  %p2213_p10 = scmp.lt.s32.totalorder %s2207_s1, %s2796_s20 }
 0x632   : > { %p2214_p11 = scmp.lt.s32.totalorder %s2212_s22, %s2208_s27 }
 0x633   : > { %p2210_p7 = pnand %p2209_p6, %p2429_p4 }
 0x634   : > { %p2215_p12 = por %p2214_p11, %p2213_p10 }
 0x635   : > { %p2211_p9 = pneg %p2210_p7 }
 0x637   : > { %p2216_p13 = pnand %p2215_p12, %p2211_p9 }
 0x6a5   : > { %v1661_v33 = vpop.f32.mrf.mxu1 }
 0x6a6   : > { %v1665_v34 = vadd.f32 %v1661_v33, %v2681_v52 }
 0x6a8   : > { %v1670_v35 = vadd.f32 %v2137_v32, %v1665_v34 }
 0x6aa   : > { %1671 = vst.msk [vmem:[%s678_s9] sm:$0xff] %vm717_vm0, %v1670_v35 }
 0x6ab   : > { %2219 = shalt.err (!%p2216_p13)
}
 0x6ac   : > { %2055 = dma.vmem_to_hbm [thread:$0]  (%p2429_p4), %s1692_s26, 128, %s1694_s3, %s1673_s18  }
 0x6ad   : > { %v1663_v36 = vpop.f32.mrf.mxu1 }
 0x6ae PF: > { %p2066_p0 = scmp.ge.s32.totalorder %s2274_s19, 2  ;;  %s1723_s0 = sand.u32 1, %s2254_s2  }
 0x6af   : > { %s1724_s8 = scalar_lea.sflag [#allocation5], %s1723_s0 }
 0x6b0   : > { %p2060_p1 = pnand %p2066_p0, %p2436_p8 }
 0x6b2   : > { %p2061_p2 = pneg %p2060_p1 }
 0x6b4   : > { %2245 = dma.done.wait (%p2061_p2), %s1724_s8, 128  }
 0x6b5   : > { %2247 = vsyncadd (%p2061_p2), %s1724_s8, 4294967168  ;;  %s1734_s6 = scalar_lea.sflag [#allocation7], %s1723_s0 }
 0x6b6   : > { %2249 = dma.done.wait (%p2061_p2), %s1734_s6, 256  }
 0x6b7   : > { %2251 = vsyncadd (%p2061_p2), %s1734_s6, 4294967040  ;;  %s38_s19 = sadd.s32 1, %s2274_s19   ;;  %s2840_s4 = sld [smem:[#allocation10_spill]] }
 0x6b8   : > { %p35_p3 = scmp.ge.s32.totalorder %s38_s19, 4   ;;  %s2841_s26 = sld [smem:[#allocation14_spill]] }
 0x6b9   : > { %s2842_s18 = sld [smem:[#allocation11_spill]]  ;;  %s2844_s2 = smov %s2258_s25 }
 0x6ba   : > { %s2843_s27 = sld [smem:[#allocation12_spill]]  ;;  %37 = sbr.rel (!%p35_p3) target bundleno = 19 (0x13), region = 177 }
 0x6bd   : > { %s2845_s25 = smov %s2840_s4 }
 0x6bf   :  { %1740 = vsyncpa [#allocation5], 1 }
 0x6c0   :  { %1742 = vsyncpa [#allocation5 + $0x1], 1 }
 0x6c1   :  { %1743 = vsyncpa [#allocation7], 1 }
 0x6c2   :  { %1745 = vsyncpa [#allocation7 + $0x1], 1 }

</bundles_post_ra>
